<compile_context>
chip_gen: v7x
topology: tpu7x:2x2x1
jax: 0.10.0
libtpu: 0.0.40
codegen_flags: <defaults>
</compile_context>

<pallas_src>
import functools

import jax
import jax.numpy as jnp
from jax.experimental import pallas as pl
from jax.experimental.pallas import tpu as pltpu


# ----------------------------- shared helpers ------------------------------

def _layernorm(z, g, b, eps):
    mu = jnp.mean(z, axis=-1, keepdims=True)
    var = jnp.mean((z - mu) ** 2, axis=-1, keepdims=True)
    return (z - mu) * jax.lax.rsqrt(var + eps) * g + b


def _rep_spec(shape):
    """BlockSpec for a weight replicated across the grid (always block 0)."""
    rank = len(shape)
    return pl.BlockSpec(shape, lambda b, _r=rank: (0,) * _r)


# ------------------- fused patch-embedding (+cls/pos) kernel ----------------

def _embed_kernel(p_ref, w_ref, add_ref, o_ref):
    # p_ref[0]: [S, P] (row 0 is zeros -> becomes cls token via `add`),
    # w_ref: [P, D] bf16, add_ref: [S, D] (row0 = cls+pos0, rows1.. = bias+pos).
    t = jnp.dot(p_ref[0].astype(jnp.bfloat16), w_ref[...],
                preferred_element_type=jnp.float32)
    o_ref[0] = (t + add_ref[...]).astype(o_ref.dtype)


def pallas_embed(patches_p, w_bf16, addend):
    B, S, P = patches_p.shape
    D = w_bf16.shape[1]
    return pl.pallas_call(
        _embed_kernel,
        out_shape=jax.ShapeDtypeStruct((B, S, D), jnp.float32),
        grid=(B,),
        in_specs=[pl.BlockSpec((1, S, P), lambda b: (b, 0, 0)),
                  _rep_spec((P, D)),
                  _rep_spec((S, D))],
        out_specs=pl.BlockSpec((1, S, D), lambda b: (b, 0, 0)),
        compiler_params=pltpu.CompilerParams(dimension_semantics=("parallel",)),
    )(patches_p, w_bf16, addend)


# ------------------ fully fused transformer encoder layer -------------------

def _encoder_layer_kernel(x_ref, wq_ref, bq_ref, wk_ref, bk_ref, wv_ref, bv_ref,
                          wo_ref, bo_ref, ln1g_ref, ln1b_ref,
                          wff1_ref, bff1_ref, wff2_ref, bff2_ref,
                          ln2g_ref, ln2b_ref, o_ref, *, nhead, eps):
    x = x_ref[0].astype(jnp.float32)                      # [S, D]
    S, D = x.shape
    hd = D // nhead
    scale = 1.0 / float(hd) ** 0.5
    x_bf = x.astype(jnp.bfloat16)

    # Multi-head self-attention; heads are leading-dim slices of the packed
    # weights, and head outputs accumulate directly through the out-projection
    # (no concat / transpose, everything stays in VMEM).
    attn = jnp.zeros((S, D), jnp.float32)
    for h in range(nhead):                                # unrolled at trace time
        q = jnp.dot(x_bf, wq_ref[h], preferred_element_type=jnp.float32) + bq_ref[h]
        k = jnp.dot(x_bf, wk_ref[h], preferred_element_type=jnp.float32) + bk_ref[h]
        v = jnp.dot(x_bf, wv_ref[h], preferred_element_type=jnp.float32) + bv_ref[h]
        s = jax.lax.dot_general(q.astype(jnp.bfloat16), k.astype(jnp.bfloat16),
                                (((1,), (1,)), ((), ())),
                                preferred_element_type=jnp.float32) * scale
        m = jnp.max(s, axis=-1, keepdims=True)
        p = jnp.exp(s - m)
        p = p * pl.reciprocal(jnp.sum(p, axis=-1, keepdims=True), approx=True)
        o_h = jnp.dot(p.astype(jnp.bfloat16), v.astype(jnp.bfloat16),
                      preferred_element_type=jnp.float32)              # [S, hd]
        attn = attn + jnp.dot(o_h.astype(jnp.bfloat16), wo_ref[h],
                              preferred_element_type=jnp.float32)      # [S, D]

    # Residual + LayerNorm 1 (f32 epilogue).
    x1 = _layernorm(x + attn + bo_ref[...], ln1g_ref[...], ln1b_ref[...], eps)

    # Feed-forward (ReLU) fused, then residual + LayerNorm 2.
    h1 = jnp.dot(x1.astype(jnp.bfloat16), wff1_ref[...],
                 preferred_element_type=jnp.float32) + bff1_ref[...]
    h1 = jnp.maximum(h1, 0.0)
    ff = jnp.dot(h1.astype(jnp.bfloat16), wff2_ref[...],
                 preferred_element_type=jnp.float32) + bff2_ref[...]

    x2 = _layernorm(x1 + ff, ln2g_ref[...], ln2b_ref[...], eps)
    o_ref[0] = x2.astype(o_ref.dtype)


def pallas_encoder_layer(x, p, *, nhead, eps=1e-5):
    B, S, D = x.shape
    hd = D // nhead
    F = p["w_ff1"].shape[1]
    return pl.pallas_call(
        functools.partial(_encoder_layer_kernel, nhead=nhead, eps=eps),
        out_shape=jax.ShapeDtypeStruct((B, S, D), x.dtype),
        grid=(B,),
        in_specs=[
            pl.BlockSpec((1, S, D), lambda b: (b, 0, 0)),   # x
            _rep_spec((nhead, D, hd)), _rep_spec((nhead, 1, hd)),   # w_q, b_q
            _rep_spec((nhead, D, hd)), _rep_spec((nhead, 1, hd)),   # w_k, b_k
            _rep_spec((nhead, D, hd)), _rep_spec((nhead, 1, hd)),   # w_v, b_v
            _rep_spec((nhead, hd, D)), _rep_spec((1, D)),           # w_o, b_o
            _rep_spec((1, D)), _rep_spec((1, D)),                   # ln1 g, b
            _rep_spec((D, F)), _rep_spec((1, F)),                   # ff1
            _rep_spec((F, D)), _rep_spec((1, D)),                   # ff2
            _rep_spec((1, D)), _rep_spec((1, D)),                   # ln2 g, b
        ],
        out_specs=pl.BlockSpec((1, S, D), lambda b: (b, 0, 0)),
        compiler_params=pltpu.CompilerParams(dimension_semantics=("parallel",)),
    )(x, p["w_q"], p["b_q"], p["w_k"], p["b_k"], p["w_v"], p["b_v"],
      p["w_o"], p["b_o"], p["ln1_g"], p["ln1_b"],
      p["w_ff1"], p["b_ff1"], p["w_ff2"], p["b_ff2"],
      p["ln2_g"], p["ln2_b"])


# ------------------- fused classifier head (LayerNorm + Linear) -------------

def _head_kernel(x_ref, g_ref, b_ref, w_ref, bh_ref, o_ref, *, eps):
    xn = _layernorm(x_ref[...].astype(jnp.float32), g_ref[...], b_ref[...], eps)
    y = jnp.dot(xn.astype(jnp.bfloat16), w_ref[...],
                preferred_element_type=jnp.float32) + bh_ref[...]
    o_ref[...] = y.astype(o_ref.dtype)


def pallas_head(cls_tok, g, b, w_bf16, bias, eps=1e-5):
    B, D = cls_tok.shape
    N = w_bf16.shape[1]
    return pl.pallas_call(
        functools.partial(_head_kernel, eps=eps),
        out_shape=jax.ShapeDtypeStruct((B, N), jnp.float32),
        grid=(1,),
        in_specs=[pl.BlockSpec((B, D), lambda i: (0, 0)),
                  pl.BlockSpec((1, D), lambda i: (0, 0)),
                  pl.BlockSpec((1, D), lambda i: (0, 0)),
                  pl.BlockSpec((D, N), lambda i: (0, 0)),
                  pl.BlockSpec((1, N), lambda i: (0, 0))],
        out_specs=pl.BlockSpec((B, N), lambda i: (0, 0)),
    )(cls_tok, g.reshape(1, D), b.reshape(1, D), w_bf16, bias.reshape(1, N))


# ----------------------------- Model forward --------------------------------

def vivit_forward(x, params, *, nhead):
    B, T, C, H, W = x.shape
    ph = pw = 16  # forward() hardcodes unfold(…, 16, 16), matching patch_size=16
    nH, nW = H // ph, W // pw
    num_patches = nH * nW

    # torch: x.reshape(B*T,C,H,W).unfold(2,16,16).unfold(3,16,16).contiguous()
    #          .view(B, T*num_patches, -1)   (exact view() semantics)
    # TODO(synk): fuse this gather into the embed kernel via an index_map/Element
    # gather to avoid the one-time HBM relayout of the video tensor.
    p = x.reshape(B * T, C, nH, ph, nW, pw)
    p = jnp.transpose(p, (0, 1, 2, 4, 3, 5))
    patches = p.reshape(B, T * num_patches, C * ph * pw)
    N = T * num_patches
    S = N + 1

    # Prepend a zero row so the embed kernel emits [S, D] tokens in one
    # lane-dense store: row 0 becomes cls + pos[0] via the precomputed additive
    # term, rows 1..N become patch@W + bias + pos.
    patches_p = jnp.concatenate(
        [jnp.zeros((B, 1, patches.shape[-1]), patches.dtype), patches], axis=1)

    h = pallas_embed(patches_p, params["patch_w"], params["embed_addend"][:S])

    for layer in params["layers"]:
        h = pallas_encoder_layer(h, layer, nhead=nhead)

    cls_out = h[:, 0, :]    # tiny one-off slice; head LN+Linear fused below
    return pallas_head(cls_out, params["head_ln_g"], params["head_ln_b"],
                       params["head_w"], params["head_b"])


# ----------------------------- Parameters -----------------------------------

def init_params(key, *, num_classes, num_frames, image_size, patch_size, dim,
                ffn_dim, num_layers):
    num_patches = (image_size // patch_size) ** 2
    patch_dim = 3 * patch_size * patch_size
    keys = jax.random.split(key, 4 + num_layers)

    def dense(k, fan_in, fan_out):
        kw, kb = jax.random.split(k)
        w = jax.random.normal(kw, (fan_in, fan_out), jnp.float32) / jnp.sqrt(float(fan_in))
        b = 0.01 * jax.random.normal(kb, (fan_out,), jnp.float32)
        return w, b

    params = {}
    params["patch_w"], params["patch_b"] = dense(keys[0], patch_dim, dim)
    params["pos_embedding"] = jax.random.normal(
        keys[1], (1, num_frames * num_patches + 1, dim), jnp.float32)
    params["cls_token"] = jax.random.normal(keys[2], (1, 1, dim), jnp.float32)

    layers = []
    for l in range(num_layers):
        ks = jax.random.split(keys[3 + l], 4)
        layer = {}
        layer["w_qkv"], layer["b_qkv"] = dense(ks[0], dim, 3 * dim)
        layer["w_o"], layer["b_o"] = dense(ks[1], dim, dim)
        layer["w_ff1"], layer["b_ff1"] = dense(ks[2], dim, ffn_dim)
        layer["w_ff2"], layer["b_ff2"] = dense(ks[3], ffn_dim, dim)
        layer["ln1_g"] = jnp.ones((dim,), jnp.float32)
        layer["ln1_b"] = jnp.zeros((dim,), jnp.float32)
        layer["ln2_g"] = jnp.ones((dim,), jnp.float32)
        layer["ln2_b"] = jnp.zeros((dim,), jnp.float32)
        layers.append(layer)
    params["layers"] = layers

    params["head_ln_g"] = jnp.ones((dim,), jnp.float32)
    params["head_ln_b"] = jnp.zeros((dim,), jnp.float32)
    params["head_w"], params["head_b"] = dense(keys[3 + num_layers], dim, num_classes)
    return params


def pack_params(p, *, nhead):
    """One-time repack of torch-like params into kernel-ready form:
    per-head attention weights, bf16 matmul weights, 2-D biases, fused
    (cls/pos/bias) additive term for the embedding kernel."""
    dim = p["cls_token"].shape[-1]
    hd = dim // nhead
    bf16 = lambda w: w.astype(jnp.bfloat16)

    pos = p["pos_embedding"][0]                                   # [S_full, dim]
    S_full = pos.shape[0]
    bias_rows = jnp.concatenate(
        [p["cls_token"][0], jnp.broadcast_to(p["patch_b"], (S_full - 1, dim))], axis=0)

    packed = {
        "patch_w": bf16(p["patch_w"]),
        "embed_addend": pos + bias_rows,
        "head_ln_g": p["head_ln_g"],
        "head_ln_b": p["head_ln_b"],
        "head_w": bf16(p["head_w"]),
        "head_b": p["head_b"],
        "layers": [],
    }

    def per_head_w(w):   # [dim, dim] -> [nhead, dim, hd] (head h = cols h*hd:(h+1)*hd)
        return jnp.transpose(w.reshape(dim, nhead, hd), (1, 0, 2))

    for lp in p["layers"]:
        wq, wk, wv = jnp.split(lp["w_qkv"], 3, axis=1)
        bq, bk, bv = jnp.split(lp["b_qkv"], 3)
        packed["layers"].append({
            "w_q": bf16(per_head_w(wq)), "b_q": bq.reshape(nhead, 1, hd),
            "w_k": bf16(per_head_w(wk)), "b_k": bk.reshape(nhead, 1, hd),
            "w_v": bf16(per_head_w(wv)), "b_v": bv.reshape(nhead, 1, hd),
            "w_o": bf16(lp["w_o"].reshape(nhead, hd, dim)),
            "b_o": lp["b_o"].reshape(1, dim),
            "ln1_g": lp["ln1_g"].reshape(1, dim), "ln1_b": lp["ln1_b"].reshape(1, dim),
            "w_ff1": bf16(lp["w_ff1"]), "b_ff1": lp["b_ff1"].reshape(1, -1),
            "w_ff2": bf16(lp["w_ff2"]), "b_ff2": lp["b_ff2"].reshape(1, dim),
            "ln2_g": lp["ln2_g"].reshape(1, dim), "ln2_b": lp["ln2_b"].reshape(1, dim),
        })
    return packed


# ----------------------------- Main -----------------------------------------

if __name__ == "__main__":
    # Small shapes consistent with the forward: patch size is hardcoded to 16,
    # so spatial must be a multiple of 16.  d_model chosen lane-dense (128).
    B, T, C, H, W = 2, 2, 3, 32, 32
    num_classes = 5
    patch_size = 16
    dim = 128         # d_model (multiple of 128 for lane-dense stores); nhead=8 -> hd=16
    nhead = 8
    ffn_dim = 256     # TODO(synk): PyTorch default dim_feedforward=2048; scaled down for the small test
    num_layers = 4

    key = jax.random.PRNGKey(0)
    kx, kp = jax.random.split(key)
    x = jax.random.normal(kx, (B, T, C, H, W), jnp.float32)
    raw_params = init_params(kp, num_classes=num_classes, num_frames=T, image_size=H,
                             patch_size=patch_size, dim=dim, ffn_dim=ffn_dim,
                             num_layers=num_layers)
    params = pack_params(raw_params, nhead=nhead)

    fwd = jax.jit(functools.partial(vivit_forward, nhead=nhead))
    logits = fwd(x, params)
    logits = jax.block_until_ready(logits)
    assert logits.shape == (B, num_classes), logits.shape
    assert bool(jnp.all(jnp.isfinite(logits)))
    print("KERNEL_OK")
</pallas_src>

<mosaic_0001>
module attributes {stable_mosaic.version = 11 : i64} {
  func.func @_embed_kernel(%arg0: i32, %arg1: memref<1x9x768xf32, #tpu.memory_space<vmem>>, %arg2: memref<768x128xbf16, #tpu.memory_space<vmem>>, %arg3: memref<9x128xf32, #tpu.memory_space<vmem>>, %arg4: memref<1x9x128xf32, #tpu.memory_space<vmem>>) attributes {dimension_semantics = [#tpu.dimension_semantics<parallel>], iteration_bounds = array<i64: 2>, scalar_prefetch = 0 : i64, scratch_operands = 0 : i64, tpu.core_type = #tpu.core_type<tc>, window_params = [{transform_indices = @transform_0, window_bounds = array<i64: 1, 9, 768>}, {pipeline_mode = #tpu.pipeline_mode<synchronous>, transform_indices = @transform_1, window_bounds = array<i64: 768, 128>}, {pipeline_mode = #tpu.pipeline_mode<synchronous>, transform_indices = @transform_2, window_bounds = array<i64: 9, 128>}, {transform_indices = @transform_3, window_bounds = array<i64: 1, 9, 128>}]} {
    %c0 = arith.constant 0 : index
    %c0_0 = arith.constant 0 : index
    %c0_1 = arith.constant 0 : index
    %0 = vector.load %arg1[%c0, %c0_0, %c0_1] : memref<1x9x768xf32, #tpu.memory_space<vmem>>, vector<1x9x768xf32>
    %1 = vector.shape_cast %0 : vector<1x9x768xf32> to vector<9x768xf32>
    %2 = arith.truncf %1 : vector<9x768xf32> to vector<9x768xbf16>
    %c0_2 = arith.constant 0 : index
    %c0_3 = arith.constant 0 : index
    %3 = vector.load %arg2[%c0_2, %c0_3] : memref<768x128xbf16, #tpu.memory_space<vmem>>, vector<768x128xbf16>
    %cst = arith.constant dense<0.000000e+00> : vector<9x128xf32>
    %4 = tpu.matmul %2, %3, %cst {dimension_numbers = #tpu.dot_dimension_numbers<[1], [0], [0], [1], [0, 0, 1, 1], [], []>} : vector<9x768xbf16>, vector<768x128xbf16>, vector<9x128xf32> -> vector<9x128xf32>
    %c0_4 = arith.constant 0 : index
    %c0_5 = arith.constant 0 : index
    %5 = vector.load %arg3[%c0_4, %c0_5] : memref<9x128xf32, #tpu.memory_space<vmem>>, vector<9x128xf32>
    %6 = arith.addf %4, %5 : vector<9x128xf32>
    %c0_6 = arith.constant 0 : index
    %c0_7 = arith.constant 0 : index
    %c0_8 = arith.constant 0 : index
    %7 = vector.load %arg4[%c0_6, %c0_7, %c0_8] : memref<1x9x128xf32, #tpu.memory_space<vmem>>, vector<1x9x128xf32>
    %8 = vector.shape_cast %7 : vector<1x9x128xf32> to vector<9x128xf32>
    %9 = vector.shape_cast %6 : vector<9x128xf32> to vector<1x9x128xf32>
    tpu.vector_store %arg4[%c0_6, %c0_7, %c0_8], %9 {strides = array<i32>} : memref<1x9x128xf32, #tpu.memory_space<vmem>>, vector<1x9x128xf32>,
    return
  }
  func.func @transform_0(%arg0: i32) -> (i32, i32, i32) {
    %c0_i32 = arith.constant 0 : i32
    %c0_i32_0 = arith.constant 0 : i32
    %c0_i32_1 = arith.constant 0 : i32
    return %arg0, %c0_i32, %c0_i32_0 : i32, i32, i32
  }
  func.func @transform_1(%arg0: i32) -> (i32, i32) {
    %c0_i32 = arith.constant 0 : i32
    %c0_i32_0 = arith.constant 0 : i32
    %c0_i32_1 = arith.constant 0 : i32
    return %c0_i32, %c0_i32_0 : i32, i32
  }
  func.func @transform_2(%arg0: i32) -> (i32, i32) {
    %c0_i32 = arith.constant 0 : i32
    %c0_i32_0 = arith.constant 0 : i32
    %c0_i32_1 = arith.constant 0 : i32
    return %c0_i32, %c0_i32_0 : i32, i32
  }
  func.func @transform_3(%arg0: i32) -> (i32, i32, i32) {
    %c0_i32 = arith.constant 0 : i32
    %c0_i32_0 = arith.constant 0 : i32
    %c0_i32_1 = arith.constant 0 : i32
    return %arg0, %c0_i32, %c0_i32_0 : i32, i32, i32
  }
}

module attributes {stable_mosaic.version = 11 : i64} {
  func.func @_encoder_layer_kernel(%arg0: i32, %arg1: memref<1x9x128xf32, #tpu.memory_space<vmem>>, %arg2: memref<8x128x16xbf16, #tpu.memory_space<vmem>>, %arg3: memref<8x1x16xf32, #tpu.memory_space<vmem>>, %arg4: memref<8x128x16xbf16, #tpu.memory_space<vmem>>, %arg5: memref<8x1x16xf32, #tpu.memory_space<vmem>>, %arg6: memref<8x128x16xbf16, #tpu.memory_space<vmem>>, %arg7: memref<8x1x16xf32, #tpu.memory_space<vmem>>, %arg8: memref<8x16x128xbf16, #tpu.memory_space<vmem>>, %arg9: memref<1x128xf32, #tpu.memory_space<vmem>>, %arg10: memref<1x128xf32, #tpu.memory_space<vmem>>, %arg11: memref<1x128xf32, #tpu.memory_space<vmem>>, %arg12: memref<128x256xbf16, #tpu.memory_space<vmem>>, %arg13: memref<1x256xf32, #tpu.memory_space<vmem>>, %arg14: memref<256x128xbf16, #tpu.memory_space<vmem>>, %arg15: memref<1x128xf32, #tpu.memory_space<vmem>>, %arg16: memref<1x128xf32, #tpu.memory_space<vmem>>, %arg17: memref<1x128xf32, #tpu.memory_space<vmem>>, %arg18: memref<1x9x128xf32, #tpu.memory_space<vmem>>) attributes {dimension_semantics = [#tpu.dimension_semantics<parallel>], iteration_bounds = array<i64: 2>, scalar_prefetch = 0 : i64, scratch_operands = 0 : i64, tpu.core_type = #tpu.core_type<tc>, window_params = [{transform_indices = @transform_0, window_bounds = array<i64: 1, 9, 128>}, {pipeline_mode = #tpu.pipeline_mode<synchronous>, transform_indices = @transform_1, window_bounds = array<i64: 8, 128, 16>}, {pipeline_mode = #tpu.pipeline_mode<synchronous>, transform_indices = @transform_2, window_bounds = array<i64: 8, 1, 16>}, {pipeline_mode = #tpu.pipeline_mode<synchronous>, transform_indices = @transform_3, window_bounds = array<i64: 8, 128, 16>}, {pipeline_mode = #tpu.pipeline_mode<synchronous>, transform_indices = @transform_4, window_bounds = array<i64: 8, 1, 16>}, {pipeline_mode = #tpu.pipeline_mode<synchronous>, transform_indices = @transform_5, window_bounds = array<i64: 8, 128, 16>}, {pipeline_mode = #tpu.pipeline_mode<synchronous>, transform_indices = @transform_6, window_bounds = array<i64: 8, 1, 16>}, {pipeline_mode = #tpu.pipeline_mode<synchronous>, transform_indices = @transform_7, window_bounds = array<i64: 8, 16, 128>}, {pipeline_mode = #tpu.pipeline_mode<synchronous>, transform_indices = @transform_8, window_bounds = array<i64: 1, 128>}, {pipeline_mode = #tpu.pipeline_mode<synchronous>, transform_indices = @transform_9, window_bounds = array<i64: 1, 128>}, {pipeline_mode = #tpu.pipeline_mode<synchronous>, transform_indices = @transform_10, window_bounds = array<i64: 1, 128>}, {pipeline_mode = #tpu.pipeline_mode<synchronous>, transform_indices = @transform_11, window_bounds = array<i64: 128, 256>}, {pipeline_mode = #tpu.pipeline_mode<synchronous>, transform_indices = @transform_12, window_bounds = array<i64: 1, 256>}, {pipeline_mode = #tpu.pipeline_mode<synchronous>, transform_indices = @transform_13, window_bounds = array<i64: 256, 128>}, {pipeline_mode = #tpu.pipeline_mode<synchronous>, transform_indices = @transform_14, window_bounds = array<i64: 1, 128>}, {pipeline_mode = #tpu.pipeline_mode<synchronous>, transform_indices = @transform_15, window_bounds = array<i64: 1, 128>}, {pipeline_mode = #tpu.pipeline_mode<synchronous>, transform_indices = @transform_16, window_bounds = array<i64: 1, 128>}, {transform_indices = @transform_17, window_bounds = array<i64: 1, 9, 128>}]} {
    %c0 = arith.constant 0 : index
    %c0_0 = arith.constant 0 : index
    %c0_1 = arith.constant 0 : index
    %0 = vector.load %arg1[%c0, %c0_0, %c0_1] : memref<1x9x128xf32, #tpu.memory_space<vmem>>, vector<1x9x128xf32>
    %1 = vector.shape_cast %0 : vector<1x9x128xf32> to vector<9x128xf32>
    %2 = arith.truncf %1 : vector<9x128xf32> to vector<9x128xbf16>
    %cst = arith.constant 0.000000e+00 : f32
    %3 = vector.broadcast %cst : f32 to vector<9x128xf32>
    %c0_2 = arith.constant 0 : index
    %c0_3 = arith.constant 0 : index
    %c0_4 = arith.constant 0 : index
    %4 = vector.load %arg2[%c0_2, %c0_3, %c0_4] : memref<8x128x16xbf16, #tpu.memory_space<vmem>>, vector<1x128x16xbf16>
    %5 = vector.shape_cast %4 : vector<1x128x16xbf16> to vector<128x16xbf16>
    %cst_5 = arith.constant dense<0.000000e+00> : vector<9x16xf32>
    %6 = tpu.matmul %2, %5, %cst_5 {dimension_numbers = #tpu.dot_dimension_numbers<[1], [0], [0], [1], [0, 0, 1, 1], [], []>} : vector<9x128xbf16>, vector<128x16xbf16>, vector<9x16xf32> -> vector<9x16xf32>
    %c0_6 = arith.constant 0 : index
    %c0_7 = arith.constant 0 : index
    %c0_8 = arith.constant 0 : index
    %7 = vector.load %arg3[%c0_6, %c0_7, %c0_8] : memref<8x1x16xf32, #tpu.memory_space<vmem>>, vector<1x1x16xf32>
    %8 = vector.shape_cast %7 : vector<1x1x16xf32> to vector<1x16xf32>
    %9 = vector.broadcast %8 : vector<1x16xf32> to vector<9x16xf32>
    %10 = arith.addf %6, %9 : vector<9x16xf32>
    %c0_9 = arith.constant 0 : index
    %c0_10 = arith.constant 0 : index
    %c0_11 = arith.constant 0 : index
    %11 = vector.load %arg4[%c0_9, %c0_10, %c0_11] : memref<8x128x16xbf16, #tpu.memory_space<vmem>>, vector<1x128x16xbf16>
    %12 = vector.shape_cast %11 : vector<1x128x16xbf16> to vector<128x16xbf16>
    %cst_12 = arith.constant dense<0.000000e+00> : vector<9x16xf32>
    %13 = tpu.matmul %2, %12, %cst_12 {dimension_numbers = #tpu.dot_dimension_numbers<[1], [0], [0], [1], [0, 0, 1, 1], [], []>} : vector<9x128xbf16>, vector<128x16xbf16>, vector<9x16xf32> -> vector<9x16xf32>
    %c0_13 = arith.constant 0 : index
    %c0_14 = arith.constant 0 : index
    %c0_15 = arith.constant 0 : index
    %14 = vector.load %arg5[%c0_13, %c0_14, %c0_15] : memref<8x1x16xf32, #tpu.memory_space<vmem>>, vector<1x1x16xf32>
    %15 = vector.shape_cast %14 : vector<1x1x16xf32> to vector<1x16xf32>
    %16 = vector.broadcast %15 : vector<1x16xf32> to vector<9x16xf32>
    %17 = arith.addf %13, %16 : vector<9x16xf32>
    %c0_16 = arith.constant 0 : index
    %c0_17 = arith.constant 0 : index
    %c0_18 = arith.constant 0 : index
    %18 = vector.load %arg6[%c0_16, %c0_17, %c0_18] : memref<8x128x16xbf16, #tpu.memory_space<vmem>>, vector<1x128x16xbf16>
    %19 = vector.shape_cast %18 : vector<1x128x16xbf16> to vector<128x16xbf16>
    %cst_19 = arith.constant dense<0.000000e+00> : vector<9x16xf32>
    %20 = tpu.matmul %2, %19, %cst_19 {dimension_numbers = #tpu.dot_dimension_numbers<[1], [0], [0], [1], [0, 0, 1, 1], [], []>} : vector<9x128xbf16>, vector<128x16xbf16>, vector<9x16xf32> -> vector<9x16xf32>
    %c0_20 = arith.constant 0 : index
    %c0_21 = arith.constant 0 : index
    %c0_22 = arith.constant 0 : index
    %21 = vector.load %arg7[%c0_20, %c0_21, %c0_22] : memref<8x1x16xf32, #tpu.memory_space<vmem>>, vector<1x1x16xf32>
    %22 = vector.shape_cast %21 : vector<1x1x16xf32> to vector<1x16xf32>
    %23 = vector.broadcast %22 : vector<1x16xf32> to vector<9x16xf32>
    %24 = arith.addf %20, %23 : vector<9x16xf32>
    %25 = arith.truncf %10 : vector<9x16xf32> to vector<9x16xbf16>
    %26 = arith.truncf %17 : vector<9x16xf32> to vector<9x16xbf16>
    %cst_23 = arith.constant dense<0.000000e+00> : vector<9x9xf32>
    %27 = tpu.matmul %25, %26, %cst_23 {dimension_numbers = #tpu.dot_dimension_numbers<[1], [1], [0], [0], [0, 0, 1, 0], [], []>} : vector<9x16xbf16>, vector<9x16xbf16>, vector<9x9xf32> -> vector<9x9xf32>
    %cst_24 = arith.constant 2.500000e-01 : f32
    %28 = vector.broadcast %cst_24 : f32 to vector<9x9xf32>
    %29 = arith.mulf %27, %28 : vector<9x9xf32>
    %cst_25 = arith.constant dense<0xFF800000> : vector<9xf32>
    %30 = vector.multi_reduction <maximumf>, %29, %cst_25 [1] : vector<9x9xf32> to vector<9xf32>
    %31 = vector.shape_cast %30 : vector<9xf32> to vector<9x1xf32>
    %32 = vector.broadcast %31 : vector<9x1xf32> to vector<9x9xf32>
    %33 = arith.subf %29, %32 : vector<9x9xf32>
    %34 = math.exp %33 : vector<9x9xf32>
    %cst_26 = arith.constant dense<0.000000e+00> : vector<9xf32>
    %35 = vector.multi_reduction <add>, %34, %cst_26 [1] : vector<9x9xf32> to vector<9xf32>
    %36 = vector.shape_cast %35 : vector<9xf32> to vector<9x1xf32>
    %37 = tpu.reciprocal %36 {approx = true} : vector<9x1xf32> -> vector<9x1xf32>
    %38 = vector.broadcast %37 : vector<9x1xf32> to vector<9x9xf32>
    %39 = arith.mulf %34, %38 : vector<9x9xf32>
    %40 = arith.truncf %39 : vector<9x9xf32> to vector<9x9xbf16>
    %41 = arith.truncf %24 : vector<9x16xf32> to vector<9x16xbf16>
    %cst_27 = arith.constant dense<0.000000e+00> : vector<9x16xf32>
    %42 = tpu.matmul %40, %41, %cst_27 {dimension_numbers = #tpu.dot_dimension_numbers<[1], [0], [0], [1], [0, 0, 1, 1], [], []>} : vector<9x9xbf16>, vector<9x16xbf16>, vector<9x16xf32> -> vector<9x16xf32>
    %43 = arith.truncf %42 : vector<9x16xf32> to vector<9x16xbf16>
    %c0_28 = arith.constant 0 : index
    %c0_29 = arith.constant 0 : index
    %c0_30 = arith.constant 0 : index
    %44 = vector.load %arg8[%c0_28, %c0_29, %c0_30] : memref<8x16x128xbf16, #tpu.memory_space<vmem>>, vector<1x16x128xbf16>
    %45 = vector.shape_cast %44 : vector<1x16x128xbf16> to vector<16x128xbf16>
    %cst_31 = arith.constant dense<0.000000e+00> : vector<9x128xf32>
    %46 = tpu.matmul %43, %45, %cst_31 {dimension_numbers = #tpu.dot_dimension_numbers<[1], [0], [0], [1], [0, 0, 1, 1], [], []>} : vector<9x16xbf16>, vector<16x128xbf16>, vector<9x128xf32> -> vector<9x128xf32>
    %47 = arith.addf %3, %46 : vector<9x128xf32>
    %c1 = arith.constant 1 : index
    %c0_32 = arith.constant 0 : index
    %c0_33 = arith.constant 0 : index
    %48 = vector.load %arg2[%c1, %c0_32, %c0_33] : memref<8x128x16xbf16, #tpu.memory_space<vmem>>, vector<1x128x16xbf16>
    %49 = vector.shape_cast %48 : vector<1x128x16xbf16> to vector<128x16xbf16>
    %cst_34 = arith.constant dense<0.000000e+00> : vector<9x16xf32>
    %50 = tpu.matmul %2, %49, %cst_34 {dimension_numbers = #tpu.dot_dimension_numbers<[1], [0], [0], [1], [0, 0, 1, 1], [], []>} : vector<9x128xbf16>, vector<128x16xbf16>, vector<9x16xf32> -> vector<9x16xf32>
    %c1_35 = arith.constant 1 : index
    %c0_36 = arith.constant 0 : index
    %c0_37 = arith.constant 0 : index
    %51 = vector.load %arg3[%c1_35, %c0_36, %c0_37] : memref<8x1x16xf32, #tpu.memory_space<vmem>>, vector<1x1x16xf32>
    %52 = vector.shape_cast %51 : vector<1x1x16xf32> to vector<1x16xf32>
    %53 = vector.broadcast %52 : vector<1x16xf32> to vector<9x16xf32>
    %54 = arith.addf %50, %53 : vector<9x16xf32>
    %c1_38 = arith.constant 1 : index
    %c0_39 = arith.constant 0 : index
    %c0_40 = arith.constant 0 : index
    %55 = vector.load %arg4[%c1_38, %c0_39, %c0_40] : memref<8x128x16xbf16, #tpu.memory_space<vmem>>, vector<1x128x16xbf16>
    %56 = vector.shape_cast %55 : vector<1x128x16xbf16> to vector<128x16xbf16>
    %cst_41 = arith.constant dense<0.000000e+00> : vector<9x16xf32>
    %57 = tpu.matmul %2, %56, %cst_41 {dimension_numbers = #tpu.dot_dimension_numbers<[1], [0], [0], [1], [0, 0, 1, 1], [], []>} : vector<9x128xbf16>, vector<128x16xbf16>, vector<9x16xf32> -> vector<9x16xf32>
    %c1_42 = arith.constant 1 : index
    %c0_43 = arith.constant 0 : index
    %c0_44 = arith.constant 0 : index
    %58 = vector.load %arg5[%c1_42, %c0_43, %c0_44] : memref<8x1x16xf32, #tpu.memory_space<vmem>>, vector<1x1x16xf32>
    %59 = vector.shape_cast %58 : vector<1x1x16xf32> to vector<1x16xf32>
    %60 = vector.broadcast %59 : vector<1x16xf32> to vector<9x16xf32>
    %61 = arith.addf %57, %60 : vector<9x16xf32>
    %c1_45 = arith.constant 1 : index
    %c0_46 = arith.constant 0 : index
    %c0_47 = arith.constant 0 : index
    %62 = vector.load %arg6[%c1_45, %c0_46, %c0_47] : memref<8x128x16xbf16, #tpu.memory_space<vmem>>, vector<1x128x16xbf16>
    %63 = vector.shape_cast %62 : vector<1x128x16xbf16> to vector<128x16xbf16>
    %cst_48 = arith.constant dense<0.000000e+00> : vector<9x16xf32>
    %64 = tpu.matmul %2, %63, %cst_48 {dimension_numbers = #tpu.dot_dimension_numbers<[1], [0], [0], [1], [0, 0, 1, 1], [], []>} : vector<9x128xbf16>, vector<128x16xbf16>, vector<9x16xf32> -> vector<9x16xf32>
    %c1_49 = arith.constant 1 : index
    %c0_50 = arith.constant 0 : index
    %c0_51 = arith.constant 0 : index
    %65 = vector.load %arg7[%c1_49, %c0_50, %c0_51] : memref<8x1x16xf32, #tpu.memory_space<vmem>>, vector<1x1x16xf32>
    %66 = vector.shape_cast %65 : vector<1x1x16xf32> to vector<1x16xf32>
    %67 = vector.broadcast %66 : vector<1x16xf32> to vector<9x16xf32>
    %68 = arith.addf %64, %67 : vector<9x16xf32>
    %69 = arith.truncf %54 : vector<9x16xf32> to vector<9x16xbf16>
    %70 = arith.truncf %61 : vector<9x16xf32> to vector<9x16xbf16>
    %cst_52 = arith.constant dense<0.000000e+00> : vector<9x9xf32>
    %71 = tpu.matmul %69, %70, %cst_52 {dimension_numbers = #tpu.dot_dimension_numbers<[1], [1], [0], [0], [0, 0, 1, 0], [], []>} : vector<9x16xbf16>, vector<9x16xbf16>, vector<9x9xf32> -> vector<9x9xf32>
    %cst_53 = arith.constant 2.500000e-01 : f32
    %72 = vector.broadcast %cst_53 : f32 to vector<9x9xf32>
    %73 = arith.mulf %71, %72 : vector<9x9xf32>
    %cst_54 = arith.constant dense<0xFF800000> : vector<9xf32>
    %74 = vector.multi_reduction <maximumf>, %73, %cst_54 [1] : vector<9x9xf32> to vector<9xf32>
    %75 = vector.shape_cast %74 : vector<9xf32> to vector<9x1xf32>
    %76 = vector.broadcast %75 : vector<9x1xf32> to vector<9x9xf32>
    %77 = arith.subf %73, %76 : vector<9x9xf32>
    %78 = math.exp %77 : vector<9x9xf32>
    %cst_55 = arith.constant dense<0.000000e+00> : vector<9xf32>
    %79 = vector.multi_reduction <add>, %78, %cst_55 [1] : vector<9x9xf32> to vector<9xf32>
    %80 = vector.shape_cast %79 : vector<9xf32> to vector<9x1xf32>
    %81 = tpu.reciprocal %80 {approx = true} : vector<9x1xf32> -> vector<9x1xf32>
    %82 = vector.broadcast %81 : vector<9x1xf32> to vector<9x9xf32>
    %83 = arith.mulf %78, %82 : vector<9x9xf32>
    %84 = arith.truncf %83 : vector<9x9xf32> to vector<9x9xbf16>
    %85 = arith.truncf %68 : vector<9x16xf32> to vector<9x16xbf16>
    %cst_56 = arith.constant dense<0.000000e+00> : vector<9x16xf32>
    %86 = tpu.matmul %84, %85, %cst_56 {dimension_numbers = #tpu.dot_dimension_numbers<[1], [0], [0], [1], [0, 0, 1, 1], [], []>} : vector<9x9xbf16>, vector<9x16xbf16>, vector<9x16xf32> -> vector<9x16xf32>
    %87 = arith.truncf %86 : vector<9x16xf32> to vector<9x16xbf16>
    %c1_57 = arith.constant 1 : index
    %c0_58 = arith.constant 0 : index
    %c0_59 = arith.constant 0 : index
    %88 = vector.load %arg8[%c1_57, %c0_58, %c0_59] : memref<8x16x128xbf16, #tpu.memory_space<vmem>>, vector<1x16x128xbf16>
    %89 = vector.shape_cast %88 : vector<1x16x128xbf16> to vector<16x128xbf16>
    %cst_60 = arith.constant dense<0.000000e+00> : vector<9x128xf32>
    %90 = tpu.matmul %87, %89, %cst_60 {dimension_numbers = #tpu.dot_dimension_numbers<[1], [0], [0], [1], [0, 0, 1, 1], [], []>} : vector<9x16xbf16>, vector<16x128xbf16>, vector<9x128xf32> -> vector<9x128xf32>
    %91 = arith.addf %47, %90 : vector<9x128xf32>
    %c2 = arith.constant 2 : index
    %c0_61 = arith.constant 0 : index
    %c0_62 = arith.constant 0 : index
    %92 = vector.load %arg2[%c2, %c0_61, %c0_62] : memref<8x128x16xbf16, #tpu.memory_space<vmem>>, vector<1x128x16xbf16>
    %93 = vector.shape_cast %92 : vector<1x128x16xbf16> to vector<128x16xbf16>
    %cst_63 = arith.constant dense<0.000000e+00> : vector<9x16xf32>
    %94 = tpu.matmul %2, %93, %cst_63 {dimension_numbers = #tpu.dot_dimension_numbers<[1], [0], [0], [1], [0, 0, 1, 1], [], []>} : vector<9x128xbf16>, vector<128x16xbf16>, vector<9x16xf32> -> vector<9x16xf32>
    %c2_64 = arith.constant 2 : index
    %c0_65 = arith.constant 0 : index
    %c0_66 = arith.constant 0 : index
    %95 = vector.load %arg3[%c2_64, %c0_65, %c0_66] : memref<8x1x16xf32, #tpu.memory_space<vmem>>, vector<1x1x16xf32>
    %96 = vector.shape_cast %95 : vector<1x1x16xf32> to vector<1x16xf32>
    %97 = vector.broadcast %96 : vector<1x16xf32> to vector<9x16xf32>
    %98 = arith.addf %94, %97 : vector<9x16xf32>
    %c2_67 = arith.constant 2 : index
    %c0_68 = arith.constant 0 : index
    %c0_69 = arith.constant 0 : index
    %99 = vector.load %arg4[%c2_67, %c0_68, %c0_69] : memref<8x128x16xbf16, #tpu.memory_space<vmem>>, vector<1x128x16xbf16>
    %100 = vector.shape_cast %99 : vector<1x128x16xbf16> to vector<128x16xbf16>
    %cst_70 = arith.constant dense<0.000000e+00> : vector<9x16xf32>
    %101 = tpu.matmul %2, %100, %cst_70 {dimension_numbers = #tpu.dot_dimension_numbers<[1], [0], [0], [1], [0, 0, 1, 1], [], []>} : vector<9x128xbf16>, vector<128x16xbf16>, vector<9x16xf32> -> vector<9x16xf32>
    %c2_71 = arith.constant 2 : index
    %c0_72 = arith.constant 0 : index
    %c0_73 = arith.constant 0 : index
    %102 = vector.load %arg5[%c2_71, %c0_72, %c0_73] : memref<8x1x16xf32, #tpu.memory_space<vmem>>, vector<1x1x16xf32>
    %103 = vector.shape_cast %102 : vector<1x1x16xf32> to vector<1x16xf32>
    %104 = vector.broadcast %103 : vector<1x16xf32> to vector<9x16xf32>
    %105 = arith.addf %101, %104 : vector<9x16xf32>
    %c2_74 = arith.constant 2 : index
    %c0_75 = arith.constant 0 : index
    %c0_76 = arith.constant 0 : index
    %106 = vector.load %arg6[%c2_74, %c0_75, %c0_76] : memref<8x128x16xbf16, #tpu.memory_space<vmem>>, vector<1x128x16xbf16>
    %107 = vector.shape_cast %106 : vector<1x128x16xbf16> to vector<128x16xbf16>
    %cst_77 = arith.constant dense<0.000000e+00> : vector<9x16xf32>
    %108 = tpu.matmul %2, %107, %cst_77 {dimension_numbers = #tpu.dot_dimension_numbers<[1], [0], [0], [1], [0, 0, 1, 1], [], []>} : vector<9x128xbf16>, vector<128x16xbf16>, vector<9x16xf32> -> vector<9x16xf32>
    %c2_78 = arith.constant 2 : index
    %c0_79 = arith.constant 0 : index
    %c0_80 = arith.constant 0 : index
    %109 = vector.load %arg7[%c2_78, %c0_79, %c0_80] : memref<8x1x16xf32, #tpu.memory_space<vmem>>, vector<1x1x16xf32>
    %110 = vector.shape_cast %109 : vector<1x1x16xf32> to vector<1x16xf32>
    %111 = vector.broadcast %110 : vector<1x16xf32> to vector<9x16xf32>
    %112 = arith.addf %108, %111 : vector<9x16xf32>
    %113 = arith.truncf %98 : vector<9x16xf32> to vector<9x16xbf16>
    %114 = arith.truncf %105 : vector<9x16xf32> to vector<9x16xbf16>
    %cst_81 = arith.constant dense<0.000000e+00> : vector<9x9xf32>
    %115 = tpu.matmul %113, %114, %cst_81 {dimension_numbers = #tpu.dot_dimension_numbers<[1], [1], [0], [0], [0, 0, 1, 0], [], []>} : vector<9x16xbf16>, vector<9x16xbf16>, vector<9x9xf32> -> vector<9x9xf32>
    %cst_82 = arith.constant 2.500000e-01 : f32
    %116 = vector.broadcast %cst_82 : f32 to vector<9x9xf32>
    %117 = arith.mulf %115, %116 : vector<9x9xf32>
    %cst_83 = arith.constant dense<0xFF800000> : vector<9xf32>
    %118 = vector.multi_reduction <maximumf>, %117, %cst_83 [1] : vector<9x9xf32> to vector<9xf32>
    %119 = vector.shape_cast %118 : vector<9xf32> to vector<9x1xf32>
    %120 = vector.broadcast %119 : vector<9x1xf32> to vector<9x9xf32>
    %121 = arith.subf %117, %120 : vector<9x9xf32>
    %122 = math.exp %121 : vector<9x9xf32>
    %cst_84 = arith.constant dense<0.000000e+00> : vector<9xf32>
    %123 = vector.multi_reduction <add>, %122, %cst_84 [1] : vector<9x9xf32> to vector<9xf32>
    %124 = vector.shape_cast %123 : vector<9xf32> to vector<9x1xf32>
    %125 = tpu.reciprocal %124 {approx = true} : vector<9x1xf32> -> vector<9x1xf32>
    %126 = vector.broadcast %125 : vector<9x1xf32> to vector<9x9xf32>
    %127 = arith.mulf %122, %126 : vector<9x9xf32>
    %128 = arith.truncf %127 : vector<9x9xf32> to vector<9x9xbf16>
    %129 = arith.truncf %112 : vector<9x16xf32> to vector<9x16xbf16>
    %cst_85 = arith.constant dense<0.000000e+00> : vector<9x16xf32>
    %130 = tpu.matmul %128, %129, %cst_85 {dimension_numbers = #tpu.dot_dimension_numbers<[1], [0], [0], [1], [0, 0, 1, 1], [], []>} : vector<9x9xbf16>, vector<9x16xbf16>, vector<9x16xf32> -> vector<9x16xf32>
    %131 = arith.truncf %130 : vector<9x16xf32> to vector<9x16xbf16>
    %c2_86 = arith.constant 2 : index
    %c0_87 = arith.constant 0 : index
    %c0_88 = arith.constant 0 : index
    %132 = vector.load %arg8[%c2_86, %c0_87, %c0_88] : memref<8x16x128xbf16, #tpu.memory_space<vmem>>, vector<1x16x128xbf16>
    %133 = vector.shape_cast %132 : vector<1x16x128xbf16> to vector<16x128xbf16>
    %cst_89 = arith.constant dense<0.000000e+00> : vector<9x128xf32>
    %134 = tpu.matmul %131, %133, %cst_89 {dimension_numbers = #tpu.dot_dimension_numbers<[1], [0], [0], [1], [0, 0, 1, 1], [], []>} : vector<9x16xbf16>, vector<16x128xbf16>, vector<9x128xf32> -> vector<9x128xf32>
    %135 = arith.addf %91, %134 : vector<9x128xf32>
    %c3 = arith.constant 3 : index
    %c0_90 = arith.constant 0 : index
    %c0_91 = arith.constant 0 : index
    %136 = vector.load %arg2[%c3, %c0_90, %c0_91] : memref<8x128x16xbf16, #tpu.memory_space<vmem>>, vector<1x128x16xbf16>
    %137 = vector.shape_cast %136 : vector<1x128x16xbf16> to vector<128x16xbf16>
    %cst_92 = arith.constant dense<0.000000e+00> : vector<9x16xf32>
    %138 = tpu.matmul %2, %137, %cst_92 {dimension_numbers = #tpu.dot_dimension_numbers<[1], [0], [0], [1], [0, 0, 1, 1], [], []>} : vector<9x128xbf16>, vector<128x16xbf16>, vector<9x16xf32> -> vector<9x16xf32>
    %c3_93 = arith.constant 3 : index
    %c0_94 = arith.constant 0 : index
    %c0_95 = arith.constant 0 : index
    %139 = vector.load %arg3[%c3_93, %c0_94, %c0_95] : memref<8x1x16xf32, #tpu.memory_space<vmem>>, vector<1x1x16xf32>
    %140 = vector.shape_cast %139 : vector<1x1x16xf32> to vector<1x16xf32>
    %141 = vector.broadcast %140 : vector<1x16xf32> to vector<9x16xf32>
    %142 = arith.addf %138, %141 : vector<9x16xf32>
    %c3_96 = arith.constant 3 : index
    %c0_97 = arith.constant 0 : index
    %c0_98 = arith.constant 0 : index
    %143 = vector.load %arg4[%c3_96, %c0_97, %c0_98] : memref<8x128x16xbf16, #tpu.memory_space<vmem>>, vector<1x128x16xbf16>
    %144 = vector.shape_cast %143 : vector<1x128x16xbf16> to vector<128x16xbf16>
    %cst_99 = arith.constant dense<0.000000e+00> : vector<9x16xf32>
    %145 = tpu.matmul %2, %144, %cst_99 {dimension_numbers = #tpu.dot_dimension_numbers<[1], [0], [0], [1], [0, 0, 1, 1], [], []>} : vector<9x128xbf16>, vector<128x16xbf16>, vector<9x16xf32> -> vector<9x16xf32>
    %c3_100 = arith.constant 3 : index
    %c0_101 = arith.constant 0 : index
    %c0_102 = arith.constant 0 : index
    %146 = vector.load %arg5[%c3_100, %c0_101, %c0_102] : memref<8x1x16xf32, #tpu.memory_space<vmem>>, vector<1x1x16xf32>
    %147 = vector.shape_cast %146 : vector<1x1x16xf32> to vector<1x16xf32>
    %148 = vector.broadcast %147 : vector<1x16xf32> to vector<9x16xf32>
    %149 = arith.addf %145, %148 : vector<9x16xf32>
    %c3_103 = arith.constant 3 : index
    %c0_104 = arith.constant 0 : index
    %c0_105 = arith.constant 0 : index
    %150 = vector.load %arg6[%c3_103, %c0_104, %c0_105] : memref<8x128x16xbf16, #tpu.memory_space<vmem>>, vector<1x128x16xbf16>
    %151 = vector.shape_cast %150 : vector<1x128x16xbf16> to vector<128x16xbf16>
    %cst_106 = arith.constant dense<0.000000e+00> : vector<9x16xf32>
    %152 = tpu.matmul %2, %151, %cst_106 {dimension_numbers = #tpu.dot_dimension_numbers<[1], [0], [0], [1], [0, 0, 1, 1], [], []>} : vector<9x128xbf16>, vector<128x16xbf16>, vector<9x16xf32> -> vector<9x16xf32>
    %c3_107 = arith.constant 3 : index
    %c0_108 = arith.constant 0 : index
    %c0_109 = arith.constant 0 : index
    %153 = vector.load %arg7[%c3_107, %c0_108, %c0_109] : memref<8x1x16xf32, #tpu.memory_space<vmem>>, vector<1x1x16xf32>
    %154 = vector.shape_cast %153 : vector<1x1x16xf32> to vector<1x16xf32>
    %155 = vector.broadcast %154 : vector<1x16xf32> to vector<9x16xf32>
    %156 = arith.addf %152, %155 : vector<9x16xf32>
    %157 = arith.truncf %142 : vector<9x16xf32> to vector<9x16xbf16>
    %158 = arith.truncf %149 : vector<9x16xf32> to vector<9x16xbf16>
    %cst_110 = arith.constant dense<0.000000e+00> : vector<9x9xf32>
    %159 = tpu.matmul %157, %158, %cst_110 {dimension_numbers = #tpu.dot_dimension_numbers<[1], [1], [0], [0], [0, 0, 1, 0], [], []>} : vector<9x16xbf16>, vector<9x16xbf16>, vector<9x9xf32> -> vector<9x9xf32>
    %cst_111 = arith.constant 2.500000e-01 : f32
    %160 = vector.broadcast %cst_111 : f32 to vector<9x9xf32>
    %161 = arith.mulf %159, %160 : vector<9x9xf32>
    %cst_112 = arith.constant dense<0xFF800000> : vector<9xf32>
    %162 = vector.multi_reduction <maximumf>, %161, %cst_112 [1] : vector<9x9xf32> to vector<9xf32>
    %163 = vector.shape_cast %162 : vector<9xf32> to vector<9x1xf32>
    %164 = vector.broadcast %163 : vector<9x1xf32> to vector<9x9xf32>
    %165 = arith.subf %161, %164 : vector<9x9xf32>
    %166 = math.exp %165 : vector<9x9xf32>
    %cst_113 = arith.constant dense<0.000000e+00> : vector<9xf32>
    %167 = vector.multi_reduction <add>, %166, %cst_113 [1] : vector<9x9xf32> to vector<9xf32>
    %168 = vector.shape_cast %167 : vector<9xf32> to vector<9x1xf32>
    %169 = tpu.reciprocal %168 {approx = true} : vector<9x1xf32> -> vector<9x1xf32>
    %170 = vector.broadcast %169 : vector<9x1xf32> to vector<9x9xf32>
    %171 = arith.mulf %166, %170 : vector<9x9xf32>
    %172 = arith.truncf %171 : vector<9x9xf32> to vector<9x9xbf16>
    %173 = arith.truncf %156 : vector<9x16xf32> to vector<9x16xbf16>
    %cst_114 = arith.constant dense<0.000000e+00> : vector<9x16xf32>
    %174 = tpu.matmul %172, %173, %cst_114 {dimension_numbers = #tpu.dot_dimension_numbers<[1], [0], [0], [1], [0, 0, 1, 1], [], []>} : vector<9x9xbf16>, vector<9x16xbf16>, vector<9x16xf32> -> vector<9x16xf32>
    %175 = arith.truncf %174 : vector<9x16xf32> to vector<9x16xbf16>
    %c3_115 = arith.constant 3 : index
    %c0_116 = arith.constant 0 : index
    %c0_117 = arith.constant 0 : index
    %176 = vector.load %arg8[%c3_115, %c0_116, %c0_117] : memref<8x16x128xbf16, #tpu.memory_space<vmem>>, vector<1x16x128xbf16>
    %177 = vector.shape_cast %176 : vector<1x16x128xbf16> to vector<16x128xbf16>
    %cst_118 = arith.constant dense<0.000000e+00> : vector<9x128xf32>
    %178 = tpu.matmul %175, %177, %cst_118 {dimension_numbers = #tpu.dot_dimension_numbers<[1], [0], [0], [1], [0, 0, 1, 1], [], []>} : vector<9x16xbf16>, vector<16x128xbf16>, vector<9x128xf32> -> vector<9x128xf32>
    %179 = arith.addf %135, %178 : vector<9x128xf32>
    %c4 = arith.constant 4 : index
    %c0_119 = arith.constant 0 : index
    %c0_120 = arith.constant 0 : index
    %180 = vector.load %arg2[%c4, %c0_119, %c0_120] : memref<8x128x16xbf16, #tpu.memory_space<vmem>>, vector<1x128x16xbf16>
    %181 = vector.shape_cast %180 : vector<1x128x16xbf16> to vector<128x16xbf16>
    %cst_121 = arith.constant dense<0.000000e+00> : vector<9x16xf32>
    %182 = tpu.matmul %2, %181, %cst_121 {dimension_numbers = #tpu.dot_dimension_numbers<[1], [0], [0], [1], [0, 0, 1, 1], [], []>} : vector<9x128xbf16>, vector<128x16xbf16>, vector<9x16xf32> -> vector<9x16xf32>
    %c4_122 = arith.constant 4 : index
    %c0_123 = arith.constant 0 : index
    %c0_124 = arith.constant 0 : index
    %183 = vector.load %arg3[%c4_122, %c0_123, %c0_124] : memref<8x1x16xf32, #tpu.memory_space<vmem>>, vector<1x1x16xf32>
    %184 = vector.shape_cast %183 : vector<1x1x16xf32> to vector<1x16xf32>
    %185 = vector.broadcast %184 : vector<1x16xf32> to vector<9x16xf32>
    %186 = arith.addf %182, %185 : vector<9x16xf32>
    %c4_125 = arith.constant 4 : index
    %c0_126 = arith.constant 0 : index
    %c0_127 = arith.constant 0 : index
    %187 = vector.load %arg4[%c4_125, %c0_126, %c0_127] : memref<8x128x16xbf16, #tpu.memory_space<vmem>>, vector<1x128x16xbf16>
    %188 = vector.shape_cast %187 : vector<1x128x16xbf16> to vector<128x16xbf16>
    %cst_128 = arith.constant dense<0.000000e+00> : vector<9x16xf32>
    %189 = tpu.matmul %2, %188, %cst_128 {dimension_numbers = #tpu.dot_dimension_numbers<[1], [0], [0], [1], [0, 0, 1, 1], [], []>} : vector<9x128xbf16>, vector<128x16xbf16>, vector<9x16xf32> -> vector<9x16xf32>
    %c4_129 = arith.constant 4 : index
    %c0_130 = arith.constant 0 : index
    %c0_131 = arith.constant 0 : index
    %190 = vector.load %arg5[%c4_129, %c0_130, %c0_131] : memref<8x1x16xf32, #tpu.memory_space<vmem>>, vector<1x1x16xf32>
    %191 = vector.shape_cast %190 : vector<1x1x16xf32> to vector<1x16xf32>
    %192 = vector.broadcast %191 : vector<1x16xf32> to vector<9x16xf32>
    %193 = arith.addf %189, %192 : vector<9x16xf32>
    %c4_132 = arith.constant 4 : index
    %c0_133 = arith.constant 0 : index
    %c0_134 = arith.constant 0 : index
    %194 = vector.load %arg6[%c4_132, %c0_133, %c0_134] : memref<8x128x16xbf16, #tpu.memory_space<vmem>>, vector<1x128x16xbf16>
    %195 = vector.shape_cast %194 : vector<1x128x16xbf16> to vector<128x16xbf16>
    %cst_135 = arith.constant dense<0.000000e+00> : vector<9x16xf32>
    %196 = tpu.matmul %2, %195, %cst_135 {dimension_numbers = #tpu.dot_dimension_numbers<[1], [0], [0], [1], [0, 0, 1, 1], [], []>} : vector<9x128xbf16>, vector<128x16xbf16>, vector<9x16xf32> -> vector<9x16xf32>
    %c4_136 = arith.constant 4 : index
    %c0_137 = arith.constant 0 : index
    %c0_138 = arith.constant 0 : index
    %197 = vector.load %arg7[%c4_136, %c0_137, %c0_138] : memref<8x1x16xf32, #tpu.memory_space<vmem>>, vector<1x1x16xf32>
    %198 = vector.shape_cast %197 : vector<1x1x16xf32> to vector<1x16xf32>
    %199 = vector.broadcast %198 : vector<1x16xf32> to vector<9x16xf32>
    %200 = arith.addf %196, %199 : vector<9x16xf32>
    %201 = arith.truncf %186 : vector<9x16xf32> to vector<9x16xbf16>
    %202 = arith.truncf %193 : vector<9x16xf32> to vector<9x16xbf16>
    %cst_139 = arith.constant dense<0.000000e+00> : vector<9x9xf32>
    %203 = tpu.matmul %201, %202, %cst_139 {dimension_numbers = #tpu.dot_dimension_numbers<[1], [1], [0], [0], [0, 0, 1, 0], [], []>} : vector<9x16xbf16>, vector<9x16xbf16>, vector<9x9xf32> -> vector<9x9xf32>
    %cst_140 = arith.constant 2.500000e-01 : f32
    %204 = vector.broadcast %cst_140 : f32 to vector<9x9xf32>
    %205 = arith.mulf %203, %204 : vector<9x9xf32>
    %cst_141 = arith.constant dense<0xFF800000> : vector<9xf32>
    %206 = vector.multi_reduction <maximumf>, %205, %cst_141 [1] : vector<9x9xf32> to vector<9xf32>
    %207 = vector.shape_cast %206 : vector<9xf32> to vector<9x1xf32>
    %208 = vector.broadcast %207 : vector<9x1xf32> to vector<9x9xf32>
    %209 = arith.subf %205, %208 : vector<9x9xf32>
    %210 = math.exp %209 : vector<9x9xf32>
    %cst_142 = arith.constant dense<0.000000e+00> : vector<9xf32>
    %211 = vector.multi_reduction <add>, %210, %cst_142 [1] : vector<9x9xf32> to vector<9xf32>
    %212 = vector.shape_cast %211 : vector<9xf32> to vector<9x1xf32>
    %213 = tpu.reciprocal %212 {approx = true} : vector<9x1xf32> -> vector<9x1xf32>
    %214 = vector.broadcast %213 : vector<9x1xf32> to vector<9x9xf32>
    %215 = arith.mulf %210, %214 : vector<9x9xf32>
    %216 = arith.truncf %215 : vector<9x9xf32> to vector<9x9xbf16>
    %217 = arith.truncf %200 : vector<9x16xf32> to vector<9x16xbf16>
    %cst_143 = arith.constant dense<0.000000e+00> : vector<9x16xf32>
    %218 = tpu.matmul %216, %217, %cst_143 {dimension_numbers = #tpu.dot_dimension_numbers<[1], [0], [0], [1], [0, 0, 1, 1], [], []>} : vector<9x9xbf16>, vector<9x16xbf16>, vector<9x16xf32> -> vector<9x16xf32>
    %219 = arith.truncf %218 : vector<9x16xf32> to vector<9x16xbf16>
    %c4_144 = arith.constant 4 : index
    %c0_145 = arith.constant 0 : index
    %c0_146 = arith.constant 0 : index
    %220 = vector.load %arg8[%c4_144, %c0_145, %c0_146] : memref<8x16x128xbf16, #tpu.memory_space<vmem>>, vector<1x16x128xbf16>
    %221 = vector.shape_cast %220 : vector<1x16x128xbf16> to vector<16x128xbf16>
    %cst_147 = arith.constant dense<0.000000e+00> : vector<9x128xf32>
    %222 = tpu.matmul %219, %221, %cst_147 {dimension_numbers = #tpu.dot_dimension_numbers<[1], [0], [0], [1], [0, 0, 1, 1], [], []>} : vector<9x16xbf16>, vector<16x128xbf16>, vector<9x128xf32> -> vector<9x128xf32>
    %223 = arith.addf %179, %222 : vector<9x128xf32>
    %c5 = arith.constant 5 : index
    %c0_148 = arith.constant 0 : index
    %c0_149 = arith.constant 0 : index
    %224 = vector.load %arg2[%c5, %c0_148, %c0_149] : memref<8x128x16xbf16, #tpu.memory_space<vmem>>, vector<1x128x16xbf16>
    %225 = vector.shape_cast %224 : vector<1x128x16xbf16> to vector<128x16xbf16>
    %cst_150 = arith.constant dense<0.000000e+00> : vector<9x16xf32>
    %226 = tpu.matmul %2, %225, %cst_150 {dimension_numbers = #tpu.dot_dimension_numbers<[1], [0], [0], [1], [0, 0, 1, 1], [], []>} : vector<9x128xbf16>, vector<128x16xbf16>, vector<9x16xf32> -> vector<9x16xf32>
    %c5_151 = arith.constant 5 : index
    %c0_152 = arith.constant 0 : index
    %c0_153 = arith.constant 0 : index
    %227 = vector.load %arg3[%c5_151, %c0_152, %c0_153] : memref<8x1x16xf32, #tpu.memory_space<vmem>>, vector<1x1x16xf32>
    %228 = vector.shape_cast %227 : vector<1x1x16xf32> to vector<1x16xf32>
    %229 = vector.broadcast %228 : vector<1x16xf32> to vector<9x16xf32>
    %230 = arith.addf %226, %229 : vector<9x16xf32>
    %c5_154 = arith.constant 5 : index
    %c0_155 = arith.constant 0 : index
    %c0_156 = arith.constant 0 : index
    %231 = vector.load %arg4[%c5_154, %c0_155, %c0_156] : memref<8x128x16xbf16, #tpu.memory_space<vmem>>, vector<1x128x16xbf16>
    %232 = vector.shape_cast %231 : vector<1x128x16xbf16> to vector<128x16xbf16>
    %cst_157 = arith.constant dense<0.000000e+00> : vector<9x16xf32>
    %233 = tpu.matmul %2, %232, %cst_157 {dimension_numbers = #tpu.dot_dimension_numbers<[1], [0], [0], [1], [0, 0, 1, 1], [], []>} : vector<9x128xbf16>, vector<128x16xbf16>, vector<9x16xf32> -> vector<9x16xf32>
    %c5_158 = arith.constant 5 : index
    %c0_159 = arith.constant 0 : index
    %c0_160 = arith.constant 0 : index
    %234 = vector.load %arg5[%c5_158, %c0_159, %c0_160] : memref<8x1x16xf32, #tpu.memory_space<vmem>>, vector<1x1x16xf32>
    %235 = vector.shape_cast %234 : vector<1x1x16xf32> to vector<1x16xf32>
    %236 = vector.broadcast %235 : vector<1x16xf32> to vector<9x16xf32>
    %237 = arith.addf %233, %236 : vector<9x16xf32>
    %c5_161 = arith.constant 5 : index
    %c0_162 = arith.constant 0 : index
    %c0_163 = arith.constant 0 : index
    %238 = vector.load %arg6[%c5_161, %c0_162, %c0_163] : memref<8x128x16xbf16, #tpu.memory_space<vmem>>, vector<1x128x16xbf16>
    %239 = vector.shape_cast %238 : vector<1x128x16xbf16> to vector<128x16xbf16>
    %cst_164 = arith.constant dense<0.000000e+00> : vector<9x16xf32>
    %240 = tpu.matmul %2, %239, %cst_164 {dimension_numbers = #tpu.dot_dimension_numbers<[1], [0], [0], [1], [0, 0, 1, 1], [], []>} : vector<9x128xbf16>, vector<128x16xbf16>, vector<9x16xf32> -> vector<9x16xf32>
    %c5_165 = arith.constant 5 : index
    %c0_166 = arith.constant 0 : index
    %c0_167 = arith.constant 0 : index
    %241 = vector.load %arg7[%c5_165, %c0_166, %c0_167] : memref<8x1x16xf32, #tpu.memory_space<vmem>>, vector<1x1x16xf32>
    %242 = vector.shape_cast %241 : vector<1x1x16xf32> to vector<1x16xf32>
    %243 = vector.broadcast %242 : vector<1x16xf32> to vector<9x16xf32>
    %244 = arith.addf %240, %243 : vector<9x16xf32>
    %245 = arith.truncf %230 : vector<9x16xf32> to vector<9x16xbf16>
    %246 = arith.truncf %237 : vector<9x16xf32> to vector<9x16xbf16>
    %cst_168 = arith.constant dense<0.000000e+00> : vector<9x9xf32>
    %247 = tpu.matmul %245, %246, %cst_168 {dimension_numbers = #tpu.dot_dimension_numbers<[1], [1], [0], [0], [0, 0, 1, 0], [], []>} : vector<9x16xbf16>, vector<9x16xbf16>, vector<9x9xf32> -> vector<9x9xf32>
    %cst_169 = arith.constant 2.500000e-01 : f32
    %248 = vector.broadcast %cst_169 : f32 to vector<9x9xf32>
    %249 = arith.mulf %247, %248 : vector<9x9xf32>
    %cst_170 = arith.constant dense<0xFF800000> : vector<9xf32>
    %250 = vector.multi_reduction <maximumf>, %249, %cst_170 [1] : vector<9x9xf32> to vector<9xf32>
    %251 = vector.shape_cast %250 : vector<9xf32> to vector<9x1xf32>
    %252 = vector.broadcast %251 : vector<9x1xf32> to vector<9x9xf32>
    %253 = arith.subf %249, %252 : vector<9x9xf32>
    %254 = math.exp %253 : vector<9x9xf32>
    %cst_171 = arith.constant dense<0.000000e+00> : vector<9xf32>
    %255 = vector.multi_reduction <add>, %254, %cst_171 [1] : vector<9x9xf32> to vector<9xf32>
    %256 = vector.shape_cast %255 : vector<9xf32> to vector<9x1xf32>
    %257 = tpu.reciprocal %256 {approx = true} : vector<9x1xf32> -> vector<9x1xf32>
    %258 = vector.broadcast %257 : vector<9x1xf32> to vector<9x9xf32>
    %259 = arith.mulf %254, %258 : vector<9x9xf32>
    %260 = arith.truncf %259 : vector<9x9xf32> to vector<9x9xbf16>
    %261 = arith.truncf %244 : vector<9x16xf32> to vector<9x16xbf16>
    %cst_172 = arith.constant dense<0.000000e+00> : vector<9x16xf32>
    %262 = tpu.matmul %260, %261, %cst_172 {dimension_numbers = #tpu.dot_dimension_numbers<[1], [0], [0], [1], [0, 0, 1, 1], [], []>} : vector<9x9xbf16>, vector<9x16xbf16>, vector<9x16xf32> -> vector<9x16xf32>
    %263 = arith.truncf %262 : vector<9x16xf32> to vector<9x16xbf16>
    %c5_173 = arith.constant 5 : index
    %c0_174 = arith.constant 0 : index
    %c0_175 = arith.constant 0 : index
    %264 = vector.load %arg8[%c5_173, %c0_174, %c0_175] : memref<8x16x128xbf16, #tpu.memory_space<vmem>>, vector<1x16x128xbf16>
    %265 = vector.shape_cast %264 : vector<1x16x128xbf16> to vector<16x128xbf16>
    %cst_176 = arith.constant dense<0.000000e+00> : vector<9x128xf32>
    %266 = tpu.matmul %263, %265, %cst_176 {dimension_numbers = #tpu.dot_dimension_numbers<[1], [0], [0], [1], [0, 0, 1, 1], [], []>} : vector<9x16xbf16>, vector<16x128xbf16>, vector<9x128xf32> -> vector<9x128xf32>
    %267 = arith.addf %223, %266 : vector<9x128xf32>
    %c6 = arith.constant 6 : index
    %c0_177 = arith.constant 0 : index
    %c0_178 = arith.constant 0 : index
    %268 = vector.load %arg2[%c6, %c0_177, %c0_178] : memref<8x128x16xbf16, #tpu.memory_space<vmem>>, vector<1x128x16xbf16>
    %269 = vector.shape_cast %268 : vector<1x128x16xbf16> to vector<128x16xbf16>
    %cst_179 = arith.constant dense<0.000000e+00> : vector<9x16xf32>
    %270 = tpu.matmul %2, %269, %cst_179 {dimension_numbers = #tpu.dot_dimension_numbers<[1], [0], [0], [1], [0, 0, 1, 1], [], []>} : vector<9x128xbf16>, vector<128x16xbf16>, vector<9x16xf32> -> vector<9x16xf32>
    %c6_180 = arith.constant 6 : index
    %c0_181 = arith.constant 0 : index
    %c0_182 = arith.constant 0 : index
    %271 = vector.load %arg3[%c6_180, %c0_181, %c0_182] : memref<8x1x16xf32, #tpu.memory_space<vmem>>, vector<1x1x16xf32>
    %272 = vector.shape_cast %271 : vector<1x1x16xf32> to vector<1x16xf32>
    %273 = vector.broadcast %272 : vector<1x16xf32> to vector<9x16xf32>
    %274 = arith.addf %270, %273 : vector<9x16xf32>
    %c6_183 = arith.constant 6 : index
    %c0_184 = arith.constant 0 : index
    %c0_185 = arith.constant 0 : index
    %275 = vector.load %arg4[%c6_183, %c0_184, %c0_185] : memref<8x128x16xbf16, #tpu.memory_space<vmem>>, vector<1x128x16xbf16>
    %276 = vector.shape_cast %275 : vector<1x128x16xbf16> to vector<128x16xbf16>
    %cst_186 = arith.constant dense<0.000000e+00> : vector<9x16xf32>
    %277 = tpu.matmul %2, %276, %cst_186 {dimension_numbers = #tpu.dot_dimension_numbers<[1], [0], [0], [1], [0, 0, 1, 1], [], []>} : vector<9x128xbf16>, vector<128x16xbf16>, vector<9x16xf32> -> vector<9x16xf32>
    %c6_187 = arith.constant 6 : index
    %c0_188 = arith.constant 0 : index
    %c0_189 = arith.constant 0 : index
    %278 = vector.load %arg5[%c6_187, %c0_188, %c0_189] : memref<8x1x16xf32, #tpu.memory_space<vmem>>, vector<1x1x16xf32>
    %279 = vector.shape_cast %278 : vector<1x1x16xf32> to vector<1x16xf32>
    %280 = vector.broadcast %279 : vector<1x16xf32> to vector<9x16xf32>
    %281 = arith.addf %277, %280 : vector<9x16xf32>
    %c6_190 = arith.constant 6 : index
    %c0_191 = arith.constant 0 : index
    %c0_192 = arith.constant 0 : index
    %282 = vector.load %arg6[%c6_190, %c0_191, %c0_192] : memref<8x128x16xbf16, #tpu.memory_space<vmem>>, vector<1x128x16xbf16>
    %283 = vector.shape_cast %282 : vector<1x128x16xbf16> to vector<128x16xbf16>
    %cst_193 = arith.constant dense<0.000000e+00> : vector<9x16xf32>
    %284 = tpu.matmul %2, %283, %cst_193 {dimension_numbers = #tpu.dot_dimension_numbers<[1], [0], [0], [1], [0, 0, 1, 1], [], []>} : vector<9x128xbf16>, vector<128x16xbf16>, vector<9x16xf32> -> vector<9x16xf32>
    %c6_194 = arith.constant 6 : index
    %c0_195 = arith.constant 0 : index
    %c0_196 = arith.constant 0 : index
    %285 = vector.load %arg7[%c6_194, %c0_195, %c0_196] : memref<8x1x16xf32, #tpu.memory_space<vmem>>, vector<1x1x16xf32>
    %286 = vector.shape_cast %285 : vector<1x1x16xf32> to vector<1x16xf32>
    %287 = vector.broadcast %286 : vector<1x16xf32> to vector<9x16xf32>
    %288 = arith.addf %284, %287 : vector<9x16xf32>
    %289 = arith.truncf %274 : vector<9x16xf32> to vector<9x16xbf16>
    %290 = arith.truncf %281 : vector<9x16xf32> to vector<9x16xbf16>
    %cst_197 = arith.constant dense<0.000000e+00> : vector<9x9xf32>
    %291 = tpu.matmul %289, %290, %cst_197 {dimension_numbers = #tpu.dot_dimension_numbers<[1], [1], [0], [0], [0, 0, 1, 0], [], []>} : vector<9x16xbf16>, vector<9x16xbf16>, vector<9x9xf32> -> vector<9x9xf32>
    %cst_198 = arith.constant 2.500000e-01 : f32
    %292 = vector.broadcast %cst_198 : f32 to vector<9x9xf32>
    %293 = arith.mulf %291, %292 : vector<9x9xf32>
    %cst_199 = arith.constant dense<0xFF800000> : vector<9xf32>
    %294 = vector.multi_reduction <maximumf>, %293, %cst_199 [1] : vector<9x9xf32> to vector<9xf32>
    %295 = vector.shape_cast %294 : vector<9xf32> to vector<9x1xf32>
    %296 = vector.broadcast %295 : vector<9x1xf32> to vector<9x9xf32>
    %297 = arith.subf %293, %296 : vector<9x9xf32>
    %298 = math.exp %297 : vector<9x9xf32>
    %cst_200 = arith.constant dense<0.000000e+00> : vector<9xf32>
    %299 = vector.multi_reduction <add>, %298, %cst_200 [1] : vector<9x9xf32> to vector<9xf32>
    %300 = vector.shape_cast %299 : vector<9xf32> to vector<9x1xf32>
    %301 = tpu.reciprocal %300 {approx = true} : vector<9x1xf32> -> vector<9x1xf32>
    %302 = vector.broadcast %301 : vector<9x1xf32> to vector<9x9xf32>
    %303 = arith.mulf %298, %302 : vector<9x9xf32>
    %304 = arith.truncf %303 : vector<9x9xf32> to vector<9x9xbf16>
    %305 = arith.truncf %288 : vector<9x16xf32> to vector<9x16xbf16>
    %cst_201 = arith.constant dense<0.000000e+00> : vector<9x16xf32>
    %306 = tpu.matmul %304, %305, %cst_201 {dimension_numbers = #tpu.dot_dimension_numbers<[1], [0], [0], [1], [0, 0, 1, 1], [], []>} : vector<9x9xbf16>, vector<9x16xbf16>, vector<9x16xf32> -> vector<9x16xf32>
    %307 = arith.truncf %306 : vector<9x16xf32> to vector<9x16xbf16>
    %c6_202 = arith.constant 6 : index
    %c0_203 = arith.constant 0 : index
    %c0_204 = arith.constant 0 : index
    %308 = vector.load %arg8[%c6_202, %c0_203, %c0_204] : memref<8x16x128xbf16, #tpu.memory_space<vmem>>, vector<1x16x128xbf16>
    %309 = vector.shape_cast %308 : vector<1x16x128xbf16> to vector<16x128xbf16>
    %cst_205 = arith.constant dense<0.000000e+00> : vector<9x128xf32>
    %310 = tpu.matmul %307, %309, %cst_205 {dimension_numbers = #tpu.dot_dimension_numbers<[1], [0], [0], [1], [0, 0, 1, 1], [], []>} : vector<9x16xbf16>, vector<16x128xbf16>, vector<9x128xf32> -> vector<9x128xf32>
    %311 = arith.addf %267, %310 : vector<9x128xf32>
    %c7 = arith.constant 7 : index
    %c0_206 = arith.constant 0 : index
    %c0_207 = arith.constant 0 : index
    %312 = vector.load %arg2[%c7, %c0_206, %c0_207] : memref<8x128x16xbf16, #tpu.memory_space<vmem>>, vector<1x128x16xbf16>
    %313 = vector.shape_cast %312 : vector<1x128x16xbf16> to vector<128x16xbf16>
    %cst_208 = arith.constant dense<0.000000e+00> : vector<9x16xf32>
    %314 = tpu.matmul %2, %313, %cst_208 {dimension_numbers = #tpu.dot_dimension_numbers<[1], [0], [0], [1], [0, 0, 1, 1], [], []>} : vector<9x128xbf16>, vector<128x16xbf16>, vector<9x16xf32> -> vector<9x16xf32>
    %c7_209 = arith.constant 7 : index
    %c0_210 = arith.constant 0 : index
    %c0_211 = arith.constant 0 : index
    %315 = vector.load %arg3[%c7_209, %c0_210, %c0_211] : memref<8x1x16xf32, #tpu.memory_space<vmem>>, vector<1x1x16xf32>
    %316 = vector.shape_cast %315 : vector<1x1x16xf32> to vector<1x16xf32>
    %317 = vector.broadcast %316 : vector<1x16xf32> to vector<9x16xf32>
    %318 = arith.addf %314, %317 : vector<9x16xf32>
    %c7_212 = arith.constant 7 : index
    %c0_213 = arith.constant 0 : index
    %c0_214 = arith.constant 0 : index
    %319 = vector.load %arg4[%c7_212, %c0_213, %c0_214] : memref<8x128x16xbf16, #tpu.memory_space<vmem>>, vector<1x128x16xbf16>
    %320 = vector.shape_cast %319 : vector<1x128x16xbf16> to vector<128x16xbf16>
    %cst_215 = arith.constant dense<0.000000e+00> : vector<9x16xf32>
    %321 = tpu.matmul %2, %320, %cst_215 {dimension_numbers = #tpu.dot_dimension_numbers<[1], [0], [0], [1], [0, 0, 1, 1], [], []>} : vector<9x128xbf16>, vector<128x16xbf16>, vector<9x16xf32> -> vector<9x16xf32>
    %c7_216 = arith.constant 7 : index
    %c0_217 = arith.constant 0 : index
    %c0_218 = arith.constant 0 : index
    %322 = vector.load %arg5[%c7_216, %c0_217, %c0_218] : memref<8x1x16xf32, #tpu.memory_space<vmem>>, vector<1x1x16xf32>
    %323 = vector.shape_cast %322 : vector<1x1x16xf32> to vector<1x16xf32>
    %324 = vector.broadcast %323 : vector<1x16xf32> to vector<9x16xf32>
    %325 = arith.addf %321, %324 : vector<9x16xf32>
    %c7_219 = arith.constant 7 : index
    %c0_220 = arith.constant 0 : index
    %c0_221 = arith.constant 0 : index
    %326 = vector.load %arg6[%c7_219, %c0_220, %c0_221] : memref<8x128x16xbf16, #tpu.memory_space<vmem>>, vector<1x128x16xbf16>
    %327 = vector.shape_cast %326 : vector<1x128x16xbf16> to vector<128x16xbf16>
    %cst_222 = arith.constant dense<0.000000e+00> : vector<9x16xf32>
    %328 = tpu.matmul %2, %327, %cst_222 {dimension_numbers = #tpu.dot_dimension_numbers<[1], [0], [0], [1], [0, 0, 1, 1], [], []>} : vector<9x128xbf16>, vector<128x16xbf16>, vector<9x16xf32> -> vector<9x16xf32>
    %c7_223 = arith.constant 7 : index
    %c0_224 = arith.constant 0 : index
    %c0_225 = arith.constant 0 : index
    %329 = vector.load %arg7[%c7_223, %c0_224, %c0_225] : memref<8x1x16xf32, #tpu.memory_space<vmem>>, vector<1x1x16xf32>
    %330 = vector.shape_cast %329 : vector<1x1x16xf32> to vector<1x16xf32>
    %331 = vector.broadcast %330 : vector<1x16xf32> to vector<9x16xf32>
    %332 = arith.addf %328, %331 : vector<9x16xf32>
    %333 = arith.truncf %318 : vector<9x16xf32> to vector<9x16xbf16>
    %334 = arith.truncf %325 : vector<9x16xf32> to vector<9x16xbf16>
    %cst_226 = arith.constant dense<0.000000e+00> : vector<9x9xf32>
    %335 = tpu.matmul %333, %334, %cst_226 {dimension_numbers = #tpu.dot_dimension_numbers<[1], [1], [0], [0], [0, 0, 1, 0], [], []>} : vector<9x16xbf16>, vector<9x16xbf16>, vector<9x9xf32> -> vector<9x9xf32>
    %cst_227 = arith.constant 2.500000e-01 : f32
    %336 = vector.broadcast %cst_227 : f32 to vector<9x9xf32>
    %337 = arith.mulf %335, %336 : vector<9x9xf32>
    %cst_228 = arith.constant dense<0xFF800000> : vector<9xf32>
    %338 = vector.multi_reduction <maximumf>, %337, %cst_228 [1] : vector<9x9xf32> to vector<9xf32>
    %339 = vector.shape_cast %338 : vector<9xf32> to vector<9x1xf32>
    %340 = vector.broadcast %339 : vector<9x1xf32> to vector<9x9xf32>
    %341 = arith.subf %337, %340 : vector<9x9xf32>
    %342 = math.exp %341 : vector<9x9xf32>
    %cst_229 = arith.constant dense<0.000000e+00> : vector<9xf32>
    %343 = vector.multi_reduction <add>, %342, %cst_229 [1] : vector<9x9xf32> to vector<9xf32>
    %344 = vector.shape_cast %343 : vector<9xf32> to vector<9x1xf32>
    %345 = tpu.reciprocal %344 {approx = true} : vector<9x1xf32> -> vector<9x1xf32>
    %346 = vector.broadcast %345 : vector<9x1xf32> to vector<9x9xf32>
    %347 = arith.mulf %342, %346 : vector<9x9xf32>
    %348 = arith.truncf %347 : vector<9x9xf32> to vector<9x9xbf16>
    %349 = arith.truncf %332 : vector<9x16xf32> to vector<9x16xbf16>
    %cst_230 = arith.constant dense<0.000000e+00> : vector<9x16xf32>
    %350 = tpu.matmul %348, %349, %cst_230 {dimension_numbers = #tpu.dot_dimension_numbers<[1], [0], [0], [1], [0, 0, 1, 1], [], []>} : vector<9x9xbf16>, vector<9x16xbf16>, vector<9x16xf32> -> vector<9x16xf32>
    %351 = arith.truncf %350 : vector<9x16xf32> to vector<9x16xbf16>
    %c7_231 = arith.constant 7 : index
    %c0_232 = arith.constant 0 : index
    %c0_233 = arith.constant 0 : index
    %352 = vector.load %arg8[%c7_231, %c0_232, %c0_233] : memref<8x16x128xbf16, #tpu.memory_space<vmem>>, vector<1x16x128xbf16>
    %353 = vector.shape_cast %352 : vector<1x16x128xbf16> to vector<16x128xbf16>
    %cst_234 = arith.constant dense<0.000000e+00> : vector<9x128xf32>
    %354 = tpu.matmul %351, %353, %cst_234 {dimension_numbers = #tpu.dot_dimension_numbers<[1], [0], [0], [1], [0, 0, 1, 1], [], []>} : vector<9x16xbf16>, vector<16x128xbf16>, vector<9x128xf32> -> vector<9x128xf32>
    %355 = arith.addf %311, %354 : vector<9x128xf32>
    %356 = arith.addf %1, %355 : vector<9x128xf32>
    %c0_235 = arith.constant 0 : index
    %c0_236 = arith.constant 0 : index
    %357 = vector.load %arg9[%c0_235, %c0_236] : memref<1x128xf32, #tpu.memory_space<vmem>>, vector<1x128xf32>
    %358 = vector.broadcast %357 : vector<1x128xf32> to vector<9x128xf32>
    %359 = arith.addf %356, %358 : vector<9x128xf32>
    %c0_237 = arith.constant 0 : index
    %c0_238 = arith.constant 0 : index
    %360 = vector.load %arg10[%c0_237, %c0_238] : memref<1x128xf32, #tpu.memory_space<vmem>>, vector<1x128xf32>
    %c0_239 = arith.constant 0 : index
    %c0_240 = arith.constant 0 : index
    %361 = vector.load %arg11[%c0_239, %c0_240] : memref<1x128xf32, #tpu.memory_space<vmem>>, vector<1x128xf32>
    %cst_241 = arith.constant dense<0.000000e+00> : vector<9xf32>
    %362 = vector.multi_reduction <add>, %359, %cst_241 [1] : vector<9x128xf32> to vector<9xf32>
    %363 = vector.shape_cast %362 : vector<9xf32> to vector<9x1xf32>
    %cst_242 = arith.constant 1.280000e+02 : f32
    %364 = vector.broadcast %cst_242 : f32 to vector<9x1xf32>
    %365 = arith.divf %363, %364 : vector<9x1xf32>
    %366 = vector.broadcast %365 : vector<9x1xf32> to vector<9x128xf32>
    %367 = arith.subf %359, %366 : vector<9x128xf32>
    %368 = arith.mulf %367, %367 : vector<9x128xf32>
    %cst_243 = arith.constant dense<0.000000e+00> : vector<9xf32>
    %369 = vector.multi_reduction <add>, %368, %cst_243 [1] : vector<9x128xf32> to vector<9xf32>
    %370 = vector.shape_cast %369 : vector<9xf32> to vector<9x1xf32>
    %cst_244 = arith.constant 1.280000e+02 : f32
    %371 = vector.broadcast %cst_244 : f32 to vector<9x1xf32>
    %372 = arith.divf %370, %371 : vector<9x1xf32>
    %373 = vector.broadcast %365 : vector<9x1xf32> to vector<9x128xf32>
    %374 = arith.subf %359, %373 : vector<9x128xf32>
    %cst_245 = arith.constant 9.99999974E-6 : f32
    %375 = vector.broadcast %cst_245 : f32 to vector<9x1xf32>
    %376 = arith.addf %372, %375 : vector<9x1xf32>
    %377 = math.rsqrt %376 : vector<9x1xf32>
    %378 = vector.broadcast %377 : vector<9x1xf32> to vector<9x128xf32>
    %379 = arith.mulf %374, %378 : vector<9x128xf32>
    %380 = vector.broadcast %360 : vector<1x128xf32> to vector<9x128xf32>
    %381 = arith.mulf %379, %380 : vector<9x128xf32>
    %382 = vector.broadcast %361 : vector<1x128xf32> to vector<9x128xf32>
    %383 = arith.addf %381, %382 : vector<9x128xf32>
    %384 = arith.truncf %383 : vector<9x128xf32> to vector<9x128xbf16>
    %c0_246 = arith.constant 0 : index
    %c0_247 = arith.constant 0 : index
    %385 = vector.load %arg12[%c0_246, %c0_247] : memref<128x256xbf16, #tpu.memory_space<vmem>>, vector<128x256xbf16>
    %cst_248 = arith.constant dense<0.000000e+00> : vector<9x256xf32>
    %386 = tpu.matmul %384, %385, %cst_248 {dimension_numbers = #tpu.dot_dimension_numbers<[1], [0], [0], [1], [0, 0, 1, 1], [], []>} : vector<9x128xbf16>, vector<128x256xbf16>, vector<9x256xf32> -> vector<9x256xf32>
    %c0_249 = arith.constant 0 : index
    %c0_250 = arith.constant 0 : index
    %387 = vector.load %arg13[%c0_249, %c0_250] : memref<1x256xf32, #tpu.memory_space<vmem>>, vector<1x256xf32>
    %388 = vector.broadcast %387 : vector<1x256xf32> to vector<9x256xf32>
    %389 = arith.addf %386, %388 : vector<9x256xf32>
    %cst_251 = arith.constant 0.000000e+00 : f32
    %390 = vector.broadcast %cst_251 : f32 to vector<9x256xf32>
    %391 = arith.maximumf %389, %390 : vector<9x256xf32>
    %392 = arith.truncf %391 : vector<9x256xf32> to vector<9x256xbf16>
    %c0_252 = arith.constant 0 : index
    %c0_253 = arith.constant 0 : index
    %393 = vector.load %arg14[%c0_252, %c0_253] : memref<256x128xbf16, #tpu.memory_space<vmem>>, vector<256x128xbf16>
    %cst_254 = arith.constant dense<0.000000e+00> : vector<9x128xf32>
    %394 = tpu.matmul %392, %393, %cst_254 {dimension_numbers = #tpu.dot_dimension_numbers<[1], [0], [0], [1], [0, 0, 1, 1], [], []>} : vector<9x256xbf16>, vector<256x128xbf16>, vector<9x128xf32> -> vector<9x128xf32>
    %c0_255 = arith.constant 0 : index
    %c0_256 = arith.constant 0 : index
    %395 = vector.load %arg15[%c0_255, %c0_256] : memref<1x128xf32, #tpu.memory_space<vmem>>, vector<1x128xf32>
    %396 = vector.broadcast %395 : vector<1x128xf32> to vector<9x128xf32>
    %397 = arith.addf %394, %396 : vector<9x128xf32>
    %398 = arith.addf %383, %397 : vector<9x128xf32>
    %c0_257 = arith.constant 0 : index
    %c0_258 = arith.constant 0 : index
    %399 = vector.load %arg16[%c0_257, %c0_258] : memref<1x128xf32, #tpu.memory_space<vmem>>, vector<1x128xf32>
    %c0_259 = arith.constant 0 : index
    %c0_260 = arith.constant 0 : index
    %400 = vector.load %arg17[%c0_259, %c0_260] : memref<1x128xf32, #tpu.memory_space<vmem>>, vector<1x128xf32>
    %cst_261 = arith.constant dense<0.000000e+00> : vector<9xf32>
    %401 = vector.multi_reduction <add>, %398, %cst_261 [1] : vector<9x128xf32> to vector<9xf32>
    %402 = vector.shape_cast %401 : vector<9xf32> to vector<9x1xf32>
    %cst_262 = arith.constant 1.280000e+02 : f32
    %403 = vector.broadcast %cst_262 : f32 to vector<9x1xf32>
    %404 = arith.divf %402, %403 : vector<9x1xf32>
    %405 = vector.broadcast %404 : vector<9x1xf32> to vector<9x128xf32>
    %406 = arith.subf %398, %405 : vector<9x128xf32>
    %407 = arith.mulf %406, %406 : vector<9x128xf32>
    %cst_263 = arith.constant dense<0.000000e+00> : vector<9xf32>
    %408 = vector.multi_reduction <add>, %407, %cst_263 [1] : vector<9x128xf32> to vector<9xf32>
    %409 = vector.shape_cast %408 : vector<9xf32> to vector<9x1xf32>
    %cst_264 = arith.constant 1.280000e+02 : f32
    %410 = vector.broadcast %cst_264 : f32 to vector<9x1xf32>
    %411 = arith.divf %409, %410 : vector<9x1xf32>
    %412 = vector.broadcast %404 : vector<9x1xf32> to vector<9x128xf32>
    %413 = arith.subf %398, %412 : vector<9x128xf32>
    %cst_265 = arith.constant 9.99999974E-6 : f32
    %414 = vector.broadcast %cst_265 : f32 to vector<9x1xf32>
    %415 = arith.addf %411, %414 : vector<9x1xf32>
    %416 = math.rsqrt %415 : vector<9x1xf32>
    %417 = vector.broadcast %416 : vector<9x1xf32> to vector<9x128xf32>
    %418 = arith.mulf %413, %417 : vector<9x128xf32>
    %419 = vector.broadcast %399 : vector<1x128xf32> to vector<9x128xf32>
    %420 = arith.mulf %418, %419 : vector<9x128xf32>
    %421 = vector.broadcast %400 : vector<1x128xf32> to vector<9x128xf32>
    %422 = arith.addf %420, %421 : vector<9x128xf32>
    %c0_266 = arith.constant 0 : index
    %c0_267 = arith.constant 0 : index
    %c0_268 = arith.constant 0 : index
    %423 = vector.load %arg18[%c0_266, %c0_267, %c0_268] : memref<1x9x128xf32, #tpu.memory_space<vmem>>, vector<1x9x128xf32>
    %424 = vector.shape_cast %423 : vector<1x9x128xf32> to vector<9x128xf32>
    %425 = vector.shape_cast %422 : vector<9x128xf32> to vector<1x9x128xf32>
    tpu.vector_store %arg18[%c0_266, %c0_267, %c0_268], %425 {strides = array<i32>} : memref<1x9x128xf32, #tpu.memory_space<vmem>>, vector<1x9x128xf32>,
    return
  }
  func.func @transform_0(%arg0: i32) -> (i32, i32, i32) {
    %c0_i32 = arith.constant 0 : i32
    %c0_i32_0 = arith.constant 0 : i32
    %c0_i32_1 = arith.constant 0 : i32
    return %arg0, %c0_i32, %c0_i32_0 : i32, i32, i32
  }
  func.func @transform_1(%arg0: i32) -> (i32, i32, i32) {
    %c0_i32 = arith.constant 0 : i32
    %c0_i32_0 = arith.constant 0 : i32
    %c0_i32_1 = arith.constant 0 : i32
    %c0_i32_2 = arith.constant 0 : i32
    return %c0_i32, %c0_i32_0, %c0_i32_1 : i32, i32, i32
  }
  func.func @transform_2(%arg0: i32) -> (i32, i32, i32) {
    %c0_i32 = arith.constant 0 : i32
    %c0_i32_0 = arith.constant 0 : i32
    %c0_i32_1 = arith.constant 0 : i32
    %c0_i32_2 = arith.constant 0 : i32
    return %c0_i32, %c0_i32_0, %c0_i32_1 : i32, i32, i32
  }
  func.func @transform_3(%arg0: i32) -> (i32, i32, i32) {
    %c0_i32 = arith.constant 0 : i32
    %c0_i32_0 = arith.constant 0 : i32
    %c0_i32_1 = arith.constant 0 : i32
    %c0_i32_2 = arith.constant 0 : i32
    return %c0_i32, %c0_i32_0, %c0_i32_1 : i32, i32, i32
  }
  func.func @transform_4(%arg0: i32) -> (i32, i32, i32) {
    %c0_i32 = arith.constant 0 : i32
    %c0_i32_0 = arith.constant 0 : i32
    %c0_i32_1 = arith.constant 0 : i32
    %c0_i32_2 = arith.constant 0 : i32
    return %c0_i32, %c0_i32_0, %c0_i32_1 : i32, i32, i32
  }
  func.func @transform_5(%arg0: i32) -> (i32, i32, i32) {
    %c0_i32 = arith.constant 0 : i32
    %c0_i32_0 = arith.constant 0 : i32
    %c0_i32_1 = arith.constant 0 : i32
    %c0_i32_2 = arith.constant 0 : i32
    return %c0_i32, %c0_i32_0, %c0_i32_1 : i32, i32, i32
  }
  func.func @transform_6(%arg0: i32) -> (i32, i32, i32) {
    %c0_i32 = arith.constant 0 : i32
    %c0_i32_0 = arith.constant 0 : i32
    %c0_i32_1 = arith.constant 0 : i32
    %c0_i32_2 = arith.constant 0 : i32
    return %c0_i32, %c0_i32_0, %c0_i32_1 : i32, i32, i32
  }
  func.func @transform_7(%arg0: i32) -> (i32, i32, i32) {
    %c0_i32 = arith.constant 0 : i32
    %c0_i32_0 = arith.constant 0 : i32
    %c0_i32_1 = arith.constant 0 : i32
    %c0_i32_2 = arith.constant 0 : i32
    return %c0_i32, %c0_i32_0, %c0_i32_1 : i32, i32, i32
  }
  func.func @transform_8(%arg0: i32) -> (i32, i32) {
    %c0_i32 = arith.constant 0 : i32
    %c0_i32_0 = arith.constant 0 : i32
    %c0_i32_1 = arith.constant 0 : i32
    return %c0_i32, %c0_i32_0 : i32, i32
  }
  func.func @transform_9(%arg0: i32) -> (i32, i32) {
    %c0_i32 = arith.constant 0 : i32
    %c0_i32_0 = arith.constant 0 : i32
    %c0_i32_1 = arith.constant 0 : i32
    return %c0_i32, %c0_i32_0 : i32, i32
  }
  func.func @transform_10(%arg0: i32) -> (i32, i32) {
    %c0_i32 = arith.constant 0 : i32
    %c0_i32_0 = arith.constant 0 : i32
    %c0_i32_1 = arith.constant 0 : i32
    return %c0_i32, %c0_i32_0 : i32, i32
  }
  func.func @transform_11(%arg0: i32) -> (i32, i32) {
    %c0_i32 = arith.constant 0 : i32
    %c0_i32_0 = arith.constant 0 : i32
    %c0_i32_1 = arith.constant 0 : i32
    return %c0_i32, %c0_i32_0 : i32, i32
  }
  func.func @transform_12(%arg0: i32) -> (i32, i32) {
    %c0_i32 = arith.constant 0 : i32
    %c0_i32_0 = arith.constant 0 : i32
    %c0_i32_1 = arith.constant 0 : i32
    return %c0_i32, %c0_i32_0 : i32, i32
  }
  func.func @transform_13(%arg0: i32) -> (i32, i32) {
    %c0_i32 = arith.constant 0 : i32
    %c0_i32_0 = arith.constant 0 : i32
    %c0_i32_1 = arith.constant 0 : i32
    return %c0_i32, %c0_i32_0 : i32, i32
  }
  func.func @transform_14(%arg0: i32) -> (i32, i32) {
    %c0_i32 = arith.constant 0 : i32
    %c0_i32_0 = arith.constant 0 : i32
    %c0_i32_1 = arith.constant 0 : i32
    return %c0_i32, %c0_i32_0 : i32, i32
  }
  func.func @transform_15(%arg0: i32) -> (i32, i32) {
    %c0_i32 = arith.constant 0 : i32
    %c0_i32_0 = arith.constant 0 : i32
    %c0_i32_1 = arith.constant 0 : i32
    return %c0_i32, %c0_i32_0 : i32, i32
  }
  func.func @transform_16(%arg0: i32) -> (i32, i32) {
    %c0_i32 = arith.constant 0 : i32
    %c0_i32_0 = arith.constant 0 : i32
    %c0_i32_1 = arith.constant 0 : i32
    return %c0_i32, %c0_i32_0 : i32, i32
  }
  func.func @transform_17(%arg0: i32) -> (i32, i32, i32) {
    %c0_i32 = arith.constant 0 : i32
    %c0_i32_0 = arith.constant 0 : i32
    %c0_i32_1 = arith.constant 0 : i32
    return %arg0, %c0_i32, %c0_i32_0 : i32, i32, i32
  }
}

module attributes {stable_mosaic.version = 11 : i64} {
  func.func @_head_kernel(%arg0: i32, %arg1: memref<2x128xf32, #tpu.memory_space<vmem>>, %arg2: memref<1x128xf32, #tpu.memory_space<vmem>>, %arg3: memref<1x128xf32, #tpu.memory_space<vmem>>, %arg4: memref<128x5xbf16, #tpu.memory_space<vmem>>, %arg5: memref<1x5xf32, #tpu.memory_space<vmem>>, %arg6: memref<2x5xf32, #tpu.memory_space<vmem>>) attributes {dimension_semantics = [#tpu.dimension_semantics<arbitrary>], iteration_bounds = array<i64: 1>, scalar_prefetch = 0 : i64, scratch_operands = 0 : i64, tpu.core_type = #tpu.core_type<tc>, window_params = [{pipeline_mode = #tpu.pipeline_mode<synchronous>, transform_indices = @transform_0, window_bounds = array<i64: 2, 128>}, {pipeline_mode = #tpu.pipeline_mode<synchronous>, transform_indices = @transform_1, window_bounds = array<i64: 1, 128>}, {pipeline_mode = #tpu.pipeline_mode<synchronous>, transform_indices = @transform_2, window_bounds = array<i64: 1, 128>}, {pipeline_mode = #tpu.pipeline_mode<synchronous>, transform_indices = @transform_3, window_bounds = array<i64: 128, 5>}, {pipeline_mode = #tpu.pipeline_mode<synchronous>, transform_indices = @transform_4, window_bounds = array<i64: 1, 5>}, {pipeline_mode = #tpu.pipeline_mode<synchronous>, transform_indices = @transform_5, window_bounds = array<i64: 2, 5>}]} {
    %c0 = arith.constant 0 : index
    %c0_0 = arith.constant 0 : index
    %0 = vector.load %arg1[%c0, %c0_0] : memref<2x128xf32, #tpu.memory_space<vmem>>, vector<2x128xf32>
    %c0_1 = arith.constant 0 : index
    %c0_2 = arith.constant 0 : index
    %1 = vector.load %arg2[%c0_1, %c0_2] : memref<1x128xf32, #tpu.memory_space<vmem>>, vector<1x128xf32>
    %c0_3 = arith.constant 0 : index
    %c0_4 = arith.constant 0 : index
    %2 = vector.load %arg3[%c0_3, %c0_4] : memref<1x128xf32, #tpu.memory_space<vmem>>, vector<1x128xf32>
    %cst = arith.constant dense<0.000000e+00> : vector<2xf32>
    %3 = vector.multi_reduction <add>, %0, %cst [1] : vector<2x128xf32> to vector<2xf32>
    %4 = vector.shape_cast %3 : vector<2xf32> to vector<2x1xf32>
    %cst_5 = arith.constant 1.280000e+02 : f32
    %5 = vector.broadcast %cst_5 : f32 to vector<2x1xf32>
    %6 = arith.divf %4, %5 : vector<2x1xf32>
    %7 = vector.broadcast %6 : vector<2x1xf32> to vector<2x128xf32>
    %8 = arith.subf %0, %7 : vector<2x128xf32>
    %9 = arith.mulf %8, %8 : vector<2x128xf32>
    %cst_6 = arith.constant dense<0.000000e+00> : vector<2xf32>
    %10 = vector.multi_reduction <add>, %9, %cst_6 [1] : vector<2x128xf32> to vector<2xf32>
    %11 = vector.shape_cast %10 : vector<2xf32> to vector<2x1xf32>
    %cst_7 = arith.constant 1.280000e+02 : f32
    %12 = vector.broadcast %cst_7 : f32 to vector<2x1xf32>
    %13 = arith.divf %11, %12 : vector<2x1xf32>
    %14 = vector.broadcast %6 : vector<2x1xf32> to vector<2x128xf32>
    %15 = arith.subf %0, %14 : vector<2x128xf32>
    %cst_8 = arith.constant 9.99999974E-6 : f32
    %16 = vector.broadcast %cst_8 : f32 to vector<2x1xf32>
    %17 = arith.addf %13, %16 : vector<2x1xf32>
    %18 = math.rsqrt %17 : vector<2x1xf32>
    %19 = vector.broadcast %18 : vector<2x1xf32> to vector<2x128xf32>
    %20 = arith.mulf %15, %19 : vector<2x128xf32>
    %21 = vector.broadcast %1 : vector<1x128xf32> to vector<2x128xf32>
    %22 = arith.mulf %20, %21 : vector<2x128xf32>
    %23 = vector.broadcast %2 : vector<1x128xf32> to vector<2x128xf32>
    %24 = arith.addf %22, %23 : vector<2x128xf32>
    %25 = arith.truncf %24 : vector<2x128xf32> to vector<2x128xbf16>
    %c0_9 = arith.constant 0 : index
    %c0_10 = arith.constant 0 : index
    %26 = vector.load %arg4[%c0_9, %c0_10] : memref<128x5xbf16, #tpu.memory_space<vmem>>, vector<128x5xbf16>
    %cst_11 = arith.constant dense<0.000000e+00> : vector<2x5xf32>
    %27 = tpu.matmul %25, %26, %cst_11 {dimension_numbers = #tpu.dot_dimension_numbers<[1], [0], [0], [1], [0, 0, 1, 1], [], []>} : vector<2x128xbf16>, vector<128x5xbf16>, vector<2x5xf32> -> vector<2x5xf32>
    %c0_12 = arith.constant 0 : index
    %c0_13 = arith.constant 0 : index
    %28 = vector.load %arg5[%c0_12, %c0_13] : memref<1x5xf32, #tpu.memory_space<vmem>>, vector<1x5xf32>
    %29 = vector.broadcast %28 : vector<1x5xf32> to vector<2x5xf32>
    %30 = arith.addf %27, %29 : vector<2x5xf32>
    %c0_14 = arith.constant 0 : index
    %c0_15 = arith.constant 0 : index
    %31 = vector.load %arg6[%c0_14, %c0_15] : memref<2x5xf32, #tpu.memory_space<vmem>>, vector<2x5xf32>
    tpu.vector_store %arg6[%c0_14, %c0_15], %30 {strides = array<i32>} : memref<2x5xf32, #tpu.memory_space<vmem>>, vector<2x5xf32>,
    return
  }
  func.func @transform_0(%arg0: i32) -> (i32, i32) {
    %c0_i32 = arith.constant 0 : i32
    %c0_i32_0 = arith.constant 0 : i32
    %c0_i32_1 = arith.constant 0 : i32
    return %c0_i32, %c0_i32_0 : i32, i32
  }
  func.func @transform_1(%arg0: i32) -> (i32, i32) {
    %c0_i32 = arith.constant 0 : i32
    %c0_i32_0 = arith.constant 0 : i32
    %c0_i32_1 = arith.constant 0 : i32
    return %c0_i32, %c0_i32_0 : i32, i32
  }
  func.func @transform_2(%arg0: i32) -> (i32, i32) {
    %c0_i32 = arith.constant 0 : i32
    %c0_i32_0 = arith.constant 0 : i32
    %c0_i32_1 = arith.constant 0 : i32
    return %c0_i32, %c0_i32_0 : i32, i32
  }
  func.func @transform_3(%arg0: i32) -> (i32, i32) {
    %c0_i32 = arith.constant 0 : i32
    %c0_i32_0 = arith.constant 0 : i32
    %c0_i32_1 = arith.constant 0 : i32
    return %c0_i32, %c0_i32_0 : i32, i32
  }
  func.func @transform_4(%arg0: i32) -> (i32, i32) {
    %c0_i32 = arith.constant 0 : i32
    %c0_i32_0 = arith.constant 0 : i32
    %c0_i32_1 = arith.constant 0 : i32
    return %c0_i32, %c0_i32_0 : i32, i32
  }
  func.func @transform_5(%arg0: i32) -> (i32, i32) {
    %c0_i32 = arith.constant 0 : i32
    %c0_i32_0 = arith.constant 0 : i32
    %c0_i32_1 = arith.constant 0 : i32
    return %c0_i32, %c0_i32_0 : i32, i32
  }
}

</mosaic_0001>

<bundles_post_ra>
// kernel: vivit_forward.6
= control target key start
LH: loop header
LB: loop body
LE: loop exit
PB: predicated region body
PF: predicated region fallthrough
CT: control target
= control target key end

     0   :  { %s966_s12 = smov 0   ;;  %s1155_s0 = inlined_call_operand.vmem [shape: f32[2,9,768], index: 0, kind: input, shape index: {}]   ;;  %s1156_s1 = inlined_call_operand.vmem [shape: bf16[768,128], index: 1, kind: input, shape index: {}]   ;;  %s1157_s2 = inlined_call_operand.vmem [shape: f32[9,128], index: 2, kind: input, shape index: {}]   ;;  %s1158_s3 = inlined_call_operand.vmem [shape: f32[2,9,128], index: 3, kind: output, shape index: {}]  }
   0x1 LB: > { %s756_s13 = sadd.s32 4294967295, %s944_s12   ;;  %p760_p0 = scmp.ge.s32.totalorder %s944_s12, 1  ;;  %s944_s12 = sphi %s966_s12, %s13_s12  }
   0x2   : > { %p137_p1 = scmp.lt.s32.totalorder %s944_s12, 3 }
   0x4   : > { %p138_p2 = pnand %p760_p0, %p137_p1 }
   0x5   : > { %v890_v0 = vld [vmem:[%s1156_s1 + $0x40] sm:$0xff] (!%p138_p2)   ;;  %v894_v4 = vld [vmem:[%s1156_s1 + $0x48] sm:$0xff] (!%p138_p2)   ;;  %v898_v8 = vld [vmem:[%s1156_s1 + $0x50] sm:$0xff] (!%p138_p2)   ;;  %p161_p3 = scmp.lt.s32.totalorder (!%p138_p2), %s756_s13, 1 }
   0x6   : > { %141 = sbr.rel (%p138_p2) target bundleno = 290 (0x122), region = 32  ;;  %v891_v1 = vld [vmem:[%s1156_s1] sm:$0xff] (!%p138_p2)   ;;  %815 = vmatprep.subr.bf16.mxu0 (!%p138_p2), %v890_v0  ;;  %v895_v5 = vld [vmem:[%s1156_s1 + $0x8] sm:$0xff] (!%p138_p2)   ;;  %v899_v9 = vld [vmem:[%s1156_s1 + $0x10] sm:$0xff] (!%p138_p2)  }
   0x7   : > { %v892_v2 = vld [vmem:[%s1156_s1 + $0xc0] sm:$0xff] (!%p138_p2)   ;;  %816 = vmatpush3.bf16.msra.mxu0 (!%p138_p2), %v891_v1  ;;  %v896_v6 = vld [vmem:[%s1156_s1 + $0xc8] sm:$0xff] (!%p138_p2)   ;;  %v900_v10 = vld [vmem:[%s1156_s1 + $0xd0] sm:$0xff] (!%p138_p2)  }
   0x8   : > { %v893_v3 = vld [vmem:[%s1156_s1 + $0x80] sm:$0xff] (!%p138_p2)   ;;  %837 = vmatprep.subr.bf16.mxu1 (!%p138_p2), %v892_v2  ;;  %817 = vmatprep.subr.bf16.mxu0 (!%p138_p2), %v894_v4  ;;  %v897_v7 = vld [vmem:[%s1156_s1 + $0x88] sm:$0xff] (!%p138_p2)   ;;  %v901_v11 = vld [vmem:[%s1156_s1 + $0x90] sm:$0xff] (!%p138_p2)  }
   0x9   : > { %838 = vmatpush3.bf16.msra.mxu1 (!%p138_p2), %v893_v3  ;;  %v902_v12 = vld [vmem:[%s1156_s1 + $0x58] sm:$0xff] (!%p138_p2)   ;;  %v906_v16 = vld [vmem:[%s1156_s1 + $0x60] sm:$0xff] (!%p138_p2)   ;;  %v910_v20 = vld [vmem:[%s1156_s1 + $0x68] sm:$0xff] (!%p138_p2)  }
   0xa   : > { %839 = vmatprep.subr.bf16.mxu1 (!%p138_p2), %v896_v6  ;;  %v903_v13 = vld [vmem:[%s1156_s1 + $0x18] sm:$0xff] (!%p138_p2)   ;;  %v907_v17 = vld [vmem:[%s1156_s1 + $0x20] sm:$0xff] (!%p138_p2)   ;;  %v911_v21 = vld [vmem:[%s1156_s1 + $0x28] sm:$0xff] (!%p138_p2)  }
   0xb   : > { %818 = vmatpush3.bf16.msra.mxu0 (!%p138_p2), %v895_v5  ;;  %v904_v14 = vld [vmem:[%s1156_s1 + $0xd8] sm:$0xff] (!%p138_p2)   ;;  %v908_v18 = vld [vmem:[%s1156_s1 + $0xe0] sm:$0xff] (!%p138_p2)   ;;  %v912_v22 = vld [vmem:[%s1156_s1 + $0xe8] sm:$0xff] (!%p138_p2)  }
   0xc   : > { %819 = vmatprep.subr.bf16.mxu0 (!%p138_p2), %v898_v8  ;;  %v905_v15 = vld [vmem:[%s1156_s1 + $0x98] sm:$0xff] (!%p138_p2)   ;;  %v909_v19 = vld [vmem:[%s1156_s1 + $0xa0] sm:$0xff] (!%p138_p2)   ;;  %v913_v23 = vld [vmem:[%s1156_s1 + $0xa8] sm:$0xff] (!%p138_p2)  }
   0xd   : > { %840 = vmatpush3.bf16.msra.mxu1 %v897_v7  ;;  %s1160_s13 = smov (!%p161_p3, %s756_s13), 1  ;;  %v914_v24 = vld [vmem:[%s1156_s1 + $0x70] sm:$0xff]   ;;  %v918_v28 = vld [vmem:[%s1156_s1 + $0x78] sm:$0xff]   ;;  %v922_v38 = vld [vmem:[%s1156_s1 + $0x140] sm:$0xff]  }
   0xe   : > { %841 = vmatprep.subr.bf16.mxu1 %v900_v10  ;;  %s881_s14 = smul.u32 96, %s1160_s13  ;;  %v915_v25 = vld [vmem:[%s1156_s1 + $0x30] sm:$0xff]   ;;  %v919_v29 = vld [vmem:[%s1156_s1 + $0x38] sm:$0xff]   ;;  %v923_v42 = vld [vmem:[%s1156_s1 + $0x100] sm:$0xff]  }
   0xf   : > { %820 = vmatpush3.bf16.msra.mxu0 %v899_v9  ;;  %v916_v26 = vld [vmem:[%s1156_s1 + $0xf0] sm:$0xff]   ;;  %v920_v30 = vld [vmem:[%s1156_s1 + $0xf8] sm:$0xff]   ;;  %v924_v46 = vld [vmem:[%s1156_s1 + $0x148] sm:$0xff]  }
  0x10   : > { %821 = vmatprep.subr.bf16.mxu0 %v902_v12  ;;  %v917_v27 = vld [vmem:[%s1156_s1 + $0xb0] sm:$0xff]   ;;  %s1071_s25 = scalar_lea.vmem %s1155_s0, %s881_s14  ;;  %v921_v34 = vld [vmem:[%s1156_s1 + $0xb8] sm:$0xff]   ;;  %v925_v47 = vld [vmem:[%s1156_s1 + $0x108] sm:$0xff]  }
  0x11   : > { %842 = vmatpush3.bf16.msra.mxu1 %v901_v11  ;;  %v173_v31 = vld [vmem:[%s1071_s25 + $0x8] sm:$0xff]  ;;  %v179_v32 = vld [vmem:[%s1071_s25 + $0x38] sm:$0x1]  ;;  %v172_v35 = vld [vmem:[%s1071_s25] sm:$0xff] }
  0x12   : > { %843 = vmatprep.subr.bf16.mxu1 %v904_v14  ;;  %v185_v33 = vpack.c.bf16 %v179_v32, %v173_v31  ;;  %v178_v36 = vld [vmem:[%s1071_s25 + $0x30] sm:$0x1]  ;;  %v175_v39 = vld [vmem:[%s1071_s25 + $0x18] sm:$0xff]  ;;  %v181_v40 = vld [vmem:[%s1071_s25 + $0x48] sm:$0x1] }
  0x13   : > { %822 = vmatpush3.bf16.msra.mxu0 %v903_v13  ;;  %v184_v37 = vpack.c.bf16 %v178_v36, %v172_v35  ;;  %v187_v41 = vpack.c.bf16 %v181_v40, %v175_v39  ;;  %v174_v43 = vld [vmem:[%s1071_s25 + $0x10] sm:$0xff]  ;;  %v180_v44 = vld [vmem:[%s1071_s25 + $0x40] sm:$0x1]  ;;  %v928_v50 = vld [vmem:[%s1156_s1 + $0x158] sm:$0xff]  }
  0x14   : > { %823 = vmatprep.subr.bf16.mxu0 %v906_v16  ;;  %608 = vmatprep.mubr.bf16.mxu0 %v185_v33  ;;  %v186_v45 = vpack.c.bf16 %v180_v44, %v174_v43  ;;  %v926_v48 = vld [vmem:[%s1156_s1 + $0x150] sm:$0xff]   ;;  %v929_v51 = vld [vmem:[%s1156_s1 + $0x118] sm:$0xff]   ;;  %v930_v52 = vld [vmem:[%s1156_s1 + $0x160] sm:$0xff]  }
  0x15   : > { %844 = vmatpush3.bf16.msra.mxu1 %v905_v15  ;;  %649 = vmatprep.mubr.bf16.mxu1 %v187_v41  ;;  %v927_v49 = vld [vmem:[%s1156_s1 + $0x110] sm:$0xff]   ;;  %v931_v53 = vld [vmem:[%s1156_s1 + $0x120] sm:$0xff]   ;;  %v932_v54 = vld [vmem:[%s1156_s1 + $0x168] sm:$0xff]  }
  0x16   : > { %845 = vmatprep.subr.bf16.mxu1 %v908_v18  ;;  %v177_v55 = vld [vmem:[%s1071_s25 + $0x28] sm:$0xff]  ;;  %v183_v56 = vld [vmem:[%s1071_s25 + $0x58] sm:$0x1]  ;;  %v934_v59 = vld [vmem:[%s1156_s1 + $0x170] sm:$0xff]  }
  0x17   : > { %824 = vmatpush3.bf16.msra.mxu0 %v907_v17  ;;  %v189_v57 = vpack.c.bf16 %v183_v56, %v177_v55  ;;  %v933_v58 = vld [vmem:[%s1156_s1 + $0x128] sm:$0xff]   ;;  %v935_v60 = vld [vmem:[%s1156_s1 + $0x130] sm:$0xff]   ;;  %v936_v61 = vld [vmem:[%s1156_s1 + $0x178] sm:$0xff]  }
  0x18   : > { %825 = vmatprep.subr.bf16.mxu0 %v910_v20  ;;  %v937_v62 = vld [vmem:[%s1156_s1 + $0x138] sm:$0xff]   ;;  %v176_v63 = vld [vmem:[%s1071_s25 + $0x20] sm:$0xff]  ;;  %v182_v0 = vld [vmem:[%s1071_s25 + $0x50] sm:$0x1]  ;;  %s814_s25 = sshll.u32 %s1160_s13, 4 }
  0x19   : > { %846 = vmatpush3.bf16.msra.mxu1 %v909_v19  ;;  %v188_v1 = vpack.c.bf16 %v182_v0, %v176_v63  ;;  %v286_v3 = vld [vmem:[%s1157_s2] sm:$0xff]  ;;  %v287_v8 = vld [vmem:[%s1157_s2 + $0x8] sm:$0x1]  ;;  %s170_s21 = scalar_lea.vmem %s1158_s3, %s814_s25 }
  0x1a   : > { %847 = vmatprep.subr.bf16.mxu1 %v912_v22 }
  0x1b   : > { %826 = vmatpush3.bf16.msra.mxu0 %v911_v21 }
  0x1c   : > { %827 = vmatprep.subr.bf16.mxu0 %v914_v24 }
  0x1d   : > { %848 = vmatpush3.bf16.msra.mxu1 %v913_v23 }
  0x1e   : > { %849 = vmatprep.subr.bf16.mxu1 %v916_v26 }
  0x1f   : > { %828 = vmatpush3.bf16.msra.mxu0 %v915_v25 }
  0x20   : > { %829 = vmatprep.subr.bf16.mxu0 %v918_v28 }
  0x21   : > { %850 = vmatpush3.bf16.msra.mxu1 %v917_v27 }
  0x22   : > { %851 = vmatprep.subr.bf16.mxu1 %v920_v30 }
  0x23   : > { %830 = vmatpush3.bf16.msra.mxu0 %v919_v29 }
  0x24   : > { %859 = vmatprep.subr.bf16.mxu0 %v922_v38 }
  0x25   : > { %852 = vmatpush3.bf16.msra.mxu1 %v921_v34 }
  0x26   : > { %609 = vmatmul.mubr.bf16.vlgmr.msra.gmra.mrb[0].mxu0 %v184_v37 }
  0x27   : > { %860 = vmatpush3.bf16.msra.mxu0 %v923_v42  ;;  %690 = vmatprep.mubr.bf16.mxu0 %v189_v57 }
  0x28   : > { %650 = vmatmul.mubr.bf16.vlgmr.msra.gmra.mrb[0].mxu1 %v186_v45  ;;  %861 = vmatprep.subr.bf16.mxu0 %v924_v46 }
  0x2b   : > { %862 = vmatpush3.bf16.msra.mxu0 %v925_v47 }
  0x2c   : > { %863 = vmatprep.subr.bf16.mxu0 %v926_v48 }
  0x2f   : > { %864 = vmatpush3.bf16.msra.mxu0 %v927_v49 }
  0x30   : > { %865 = vmatprep.subr.bf16.mxu0 %v928_v50 }
  0x33   : > { %866 = vmatpush3.bf16.msra.mxu0 %v929_v51 }
  0x34   : > { %867 = vmatprep.subr.bf16.mxu0 %v930_v52 }
  0x37   : > { %868 = vmatpush3.bf16.msra.mxu0 %v931_v53 }
  0x38   : > { %869 = vmatprep.subr.bf16.mxu0 %v932_v54 }
  0x3b   : > { %870 = vmatpush3.bf16.msra.mxu0 %v933_v58 }
  0x3c   : > { %871 = vmatprep.subr.bf16.mxu0 %v934_v59 }
  0x3f   : > { %872 = vmatpush3.bf16.msra.mxu0 %v935_v60 }
  0x40   : > { %873 = vmatprep.subr.bf16.mxu0 %v936_v61 }
  0x43   : > { %874 = vmatpush3.bf16.msra.mxu0 %v937_v62 }
  0x46   : > { %691 = vmatmul.mubr.bf16.vlgmr.msra.gmra.mrb[4].mxu0 %v188_v1 }
  0xf9   : > { %v831_v2 = vpop.f32.mrb[0].mxu0 }
  0xfa   : > { %v832_v4 = vpop.f32.mrb[1].mxu0 }
  0xfb   : > { %v833_v5 = vadd.f32 %v832_v4, %v831_v2  ;;  %v834_v6 = vpop.f32.mrb[2].mxu0  ;;  %v853_v7 = vpop.f32.mrb[0].mxu1 }
  0xfc   : > { %v835_v9 = vpop.f32.mrb[3].mxu0  ;;  %v854_v12 = vpop.f32.mrb[1].mxu1 }
  0xfd   : > { %v611_v10 = vadd.f32 %v833_v5, %v286_v3  ;;  %v836_v11 = vadd.f32 %v835_v9, %v834_v6  ;;  %v855_v13 = vadd.f32 %v854_v12, %v853_v7  ;;  %v856_v14 = vpop.f32.mrb[2].mxu1 }
  0xfe   : > { %v857_v16 = vpop.f32.mrb[3].mxu1 }
  0xff   : > { %v614_v15 = vadd.f32 %v836_v11, %v287_v8  ;;  %v652_v17 = vadd.f32 %v855_v13, %v611_v10  ;;  %v858_v18 = vadd.f32 %v857_v16, %v856_v14 }
 0x101   : > { %v655_v19 = vadd.f32 %v858_v18, %v614_v15 }
 0x119   : > { %v875_v20 = vpop.f32.mrb[4].mxu0 }
 0x11a   : > { %v876_v21 = vpop.f32.mrb[5].mxu0 }
 0x11b   : > { %v877_v22 = vadd.f32 %v876_v21, %v875_v20  ;;  %v878_v23 = vpop.f32.mrb[6].mxu0 }
 0x11c   : > { %v879_v24 = vpop.f32.mrb[7].mxu0 }
 0x11d   : > { %v693_v25 = vadd.f32 %v877_v22, %v652_v17  ;;  %v880_v26 = vadd.f32 %v879_v24, %v878_v23 }
 0x11f   : > { %699 = vst [vmem:[%s170_s21] sm:$0xff] %v693_v25  ;;  %v696_v27 = vadd.f32 %v880_v26, %v655_v19 }
 0x121   : > { %700 = vst [vmem:[%s170_s21 + $0x8] sm:$0x1] %v696_v27 }
 0x122 PF: > { %s13_s12 = sadd.s32 1, %s944_s12  }
 0x123   : > { %p10_p4 = scmp.ge.s32.totalorder %s13_s12, 4  }
 0x125   :  { %12 = sbr.rel (!%p10_p4) target bundleno = 1 (0x1), region = 62 }

// kernel: vivit_forward.11
= control target key start
LH: loop header
LB: loop body
LE: loop exit
PB: predicated region body
PF: predicated region fallthrough
CT: control target
= control target key end

     0   :  { %vm25_vm0 = vcmask 1041408   ;;  %s342_s0 = inlined_call_operand.vmem [shape: f32[2,128], index: 0, kind: input, shape index: {}]   ;;  %s343_s1 = inlined_call_operand.vmem [shape: f32[1,128], index: 1, kind: input, shape index: {}]   ;;  %s344_s2 = inlined_call_operand.vmem [shape: f32[1,128], index: 2, kind: input, shape index: {}]   ;;  %s345_s3 = inlined_call_operand.vmem [shape: bf16[128,5], index: 3, kind: input, shape index: {}]   ;;  %s346_s4 = inlined_call_operand.vmem [shape: f32[1,5], index: 4, kind: input, shape index: {}]   ;;  %s347_s5 = inlined_call_operand.hbm [shape: f32[2,5], index: 5, kind: output, shape index: {}]  }
   0x1   :  { %v22_v0 = vld [vmem:[%s342_s0] sm:$0x3] }
   0x2   :  { %v26_v1 = vsel %vm25_vm0, %v22_v0, 0.0 }
   0x3   :  { %27 = vadd.xlane.f32.xlu0 %v26_v1 }
   0x4   :  { %10 = vsyncpa [#allocation3], 0  ;;  %v225_v2 = vld [vmem:[%s345_s3] sm:$0xff]   ;;  %v259_v3 = vmov 0.0   ;;  %v226_v4 = vld [vmem:[%s345_s3 + $0x8] sm:$0xff]   ;;  %vm260_vm1 = vmmov 0  }
   0x5   :  { %202 = vmatprep.subr.bf16.mxu0 %v259_v3  ;;  %v227_v10 = vld [vmem:[%s345_s3 + $0x10] sm:$0xff]   ;;  %v228_v11 = vld [vmem:[%s345_s3 + $0x18] sm:$0xff]   ;;  %v229_v12 = vld [vmem:[%s345_s3 + $0x20] sm:$0xff]   ;;  %218 = vmatprep.mubr.msk.bf16.mxu0 %vm260_vm1, %v259_v3  ;;  %s261_s15 = smov [#allocation2]   ;;  %vm166_vm2 = vcmask 33792  }
   0x6   :  { %203 = vmatpush3.bf16.msra.mxu0 %v225_v2  ;;  %v230_v13 = vld [vmem:[%s345_s3 + $0x28] sm:$0xff]   ;;  %v231_v14 = vld [vmem:[%s345_s3 + $0x30] sm:$0xff]   ;;  %v232_v15 = vld [vmem:[%s345_s3 + $0x38] sm:$0xff]   ;;  %s174_s16 = sshll.u32 %s261_s15, 4  ;;  %s175_s16 = int_to_ptr.vmem [resolvable:$true] %s174_s16 }
   0x7   :  { %204 = vmatprep.subr.bf16.mxu0 %v259_v3  ;;  %v182_v20 = vld [vmem:[%s343_s1] ss:$0 sm:$0xff]  ;;  %s235_s1 = scalar_lea.vmem %s175_s16, 32  ;;  %p240_p1 = scmp.lt.s32.totalorder %s175_s16, %s175_s16 }
   0x8   :  { %v183_v22 = vld [vmem:[%s344_s2] ss:$0 sm:$0xff]  ;;  %p236_p0 = scmp.ne.s32.totalorder %s175_s16, %s235_s1  ;;  %p241_p2 = scmp.lt.s32.totalorder %s235_s1, %s235_s1 }
   0x9   :  { %v184_v26 = vld [vmem:[%s346_s4] ss:$0 sm:$0xff] }
   0xa   :  { %205 = vmatpush3.bf16.msra.mxu0 %v226_v4  ;;  %p242_p3 = por %p241_p2, %p240_p1 }
   0xb   :  { %206 = vmatprep.subr.bf16.mxu0 %v259_v3 }
   0xc   :  { %p243_p4 = pnand %p242_p3, %p236_p0 }
   0xe   :  { %207 = vmatpush3.bf16.msra.mxu0 %v227_v10 }
   0xf   :  { %208 = vmatprep.subr.bf16.mxu0 %v259_v3 }
  0x12   :  { %209 = vmatpush3.bf16.msra.mxu0 %v228_v11 }
  0x13   :  { %210 = vmatprep.subr.bf16.mxu0 %v259_v3 }
  0x16   :  { %211 = vmatpush3.bf16.msra.mxu0 %v229_v12 }
  0x17   :  { %212 = vmatprep.subr.bf16.mxu0 %v259_v3 }
  0x1a   :  { %213 = vmatpush3.bf16.msra.mxu0 %v230_v13 }
  0x1b   :  { %214 = vmatprep.subr.bf16.mxu0 %v259_v3 }
  0x1e   :  { %215 = vmatpush3.bf16.msra.mxu0 %v231_v14 }
  0x1f   :  { %216 = vmatprep.subr.bf16.mxu0 %v259_v3 }
  0x22   :  { %217 = vmatpush3.bf16.msra.mxu0 %v232_v15 }
  0x90   :  { %v28_v5 = vpop.xlane.xlu0 %27 }
  0x91   :  { %v30_v6 = vmul.f32 0.0078125, %v28_v5 }
  0x93   :  { %v31_v7 = vsub.f32 %v22_v0, %v30_v6 }
  0x95   :  { %v32_v8 = vmul.f32 %v31_v7, %v31_v7 }
  0x97   :  { %v33_v9 = vsel %vm25_vm0, %v32_v8, 0.0 }
  0x98   :  { %34 = vadd.xlane.f32.xlu0 %v33_v9 }
 0x125   :  { %v35_v16 = vpop.xlane.xlu0 %34 }
 0x126   :  { %v36_v17 = vmul.f32 0.0078125, %v35_v16 }
 0x128   :  { %v37_v18 = vadd.f32 1e-05, %v36_v17 }
 0x12a   :  { %233 = vrsqrt.f32 %v37_v18 }
 0x134   :  { %v234_v19 = vpop.eup %233 }
 0x135   :  { %v39_v21 = vmul.f32 %v234_v19, %v31_v7 }
 0x137   :  { %v46_v23 = vmul.f32 %v182_v20, %v39_v21 }
 0x139   :  { %v53_v24 = vadd.f32 %v183_v22, %v46_v23 }
 0x13b   :  { %v54_v25 = vpack.c.bf16 %v53_v24, %v53_v24 }
 0x13d   :  { %219 = vmatmul.mubr.bf16.vlgmr.msra.gmra.mrb[0].mxu0 %v54_v25 }
 0x210   :  { %v160_v27 = vpop.f32.mrb[0].mxu0 }
 0x211   :  { %v161_v28 = vadd.f32 %v184_v26, %v160_v27  ;;  %v220_v29 = vpop.f32.mrb[1].mxu0 }
 0x212   :  { %v163_v30 = vpop.f32.mrb[2].mxu0 }
 0x213   :  { %v221_v31 = vpop.f32.mrb[3].mxu0  ;;  %167 = vst.msk [vmem:[#allocation2] sm:$0x3] %vm166_vm2, %v161_v28 }
 0x214   :  { %246 = shalt.err (!%p243_p4)
}
 0x215   :  { %s247_s4 = scalar_lea.hbm %s347_s5, 32 }
 0x216   :  { %p248_p5 = scmp.ne.s32.totalorder %s347_s5, %s247_s4  ;;  %p251_p6 = scmp.lt.u32.totalorder %s247_s4, %s347_s5 }
 0x218   :  { %p253_p7 = pnand %p251_p6, %p248_p5 }
 0x21a   :  { %256 = shalt.err (!%p253_p7)
}
 0x21b   :  { %177 = dma.vmem_to_hbm [thread:$0]  %s175_s16, 32, %s347_s5, [#allocation3]  }
 0x21c   :  { %257 = dma.done.wait [#allocation3], 32  }
 0x21d   :  { %258 = vsyncadd [#allocation3], 4294967264 }
 0x21e   :  { %181 = vsyncpa [#allocation3], 1 }

// kernel: vivit_forward.7
= control target key start
LH: loop header
LB: loop body
LE: loop exit
PB: predicated region body
PF: predicated region fallthrough
CT: control target
= control target key end

     0   :  { %s7207_s24 = smov 0   ;;  %s8498_s0 = inlined_call_operand.vmem [shape: f32[2,9,128], index: 0, kind: input, shape index: {}]   ;;  %s8499_s1 = inlined_call_operand.vmem [shape: bf16[8,128,16], index: 1, kind: input, shape index: {}]   ;;  %s8500_s2 = inlined_call_operand.vmem [shape: f32[8,1,16], index: 2, kind: input, shape index: {}]   ;;  %s8501_s3 = inlined_call_operand.vmem [shape: bf16[8,128,16], index: 3, kind: input, shape index: {}]   ;;  %s8502_s4 = inlined_call_operand.vmem [shape: f32[8,1,16], index: 4, kind: input, shape index: {}]   ;;  %s8503_s5 = inlined_call_operand.vmem [shape: bf16[8,128,16], index: 5, kind: input, shape index: {}]   ;;  %s8504_s6 = inlined_call_operand.vmem [shape: f32[8,1,16], index: 6, kind: input, shape index: {}]   ;;  %s8505_s7 = inlined_call_operand.vmem [shape: bf16[8,16,128], index: 7, kind: input, shape index: {}]   ;;  %s8506_s8 = inlined_call_operand.vmem [shape: f32[1,128], index: 8, kind: input, shape index: {}]   ;;  %s8507_s9 = inlined_call_operand.vmem [shape: f32[1,128], index: 9, kind: input, shape index: {}]   ;;  %s8508_s10 = inlined_call_operand.vmem [shape: f32[1,128], index: 10, kind: input, shape index: {}]   ;;  %s8509_s11 = inlined_call_operand.vmem [shape: bf16[128,256], index: 11, kind: input, shape index: {}]   ;;  %s8510_s12 = inlined_call_operand.vmem [shape: f32[1,256], index: 12, kind: input, shape index: {}]   ;;  %s8511_s13 = inlined_call_operand.vmem [shape: bf16[256,128], index: 13, kind: input, shape index: {}]   ;;  %s8512_s14 = inlined_call_operand.vmem [shape: f32[1,128], index: 14, kind: input, shape index: {}]   ;;  %s8513_s15 = inlined_call_operand.vmem [shape: f32[1,128], index: 15, kind: input, shape index: {}]   ;;  %s8514_s16 = inlined_call_operand.vmem [shape: f32[1,128], index: 16, kind: input, shape index: {}]   ;;  %s8515_s17 = inlined_call_operand.vmem [shape: f32[2,9,128], index: 17, kind: output, shape index: {}]  }
   0x1   :  { %8517 = sst [smem:[#allocation2_spill]] %s8498_s0 }
   0x2   :  { %8518 = sst [smem:[#allocation3_spill]] %s8499_s1 }
   0x3 LB: > { %s5199_s25 = sadd.s32 4294967295, %s7111_s24   ;;  %p5203_p0 = scmp.ge.s32.totalorder %s7111_s24, 1  ;;  %s7111_s24 = sphi %s7207_s24, %s27_s24  }
   0x4   : > { %p487_p1 = scmp.lt.s32.totalorder %s7111_s24, 3 }
   0x6   : > { %p488_p2 = pnand %p5203_p0, %p487_p1 }
   0x7   : > { %v6791_v0 = vld [vmem:[%s8501_s3] sm:$0xff] (!%p488_p2)   ;;  %v7113_v1 = vmov (!%p488_p2), 0.0   ;;  %v6792_v2 = vld [vmem:[%s8501_s3 + $0x8] sm:$0xff] (!%p488_p2)   ;;  %s8519_s18 = sld [smem:[#allocation3_spill]] (!%p488_p2)  ;;  %vm7114_vm0 = vmmov (!%p488_p2), 0   ;;  %v6794_v5 = vld [vmem:[%s8501_s3 + $0x10] sm:$0xff] (!%p488_p2)  }
   0x8   : > { %491 = sbr.rel (%p488_p2) target bundleno = 9078 (0x2376), region = 88  ;;  %6175 = vmatprep.subr.bf16.mxu1 (!%p488_p2), %v7113_v1  ;;  %6155 = vmatprep.subr.bf16.mxu0 (!%p488_p2), %v7113_v1  ;;  %p539_p3 = scmp.lt.s32.totalorder (!%p488_p2), %s5199_s25, 1  ;;  %v6796_v7 = vld [vmem:[%s8501_s3 + $0x18] sm:$0xff] (!%p488_p2)   ;;  %v6798_v9 = vld [vmem:[%s8501_s3 + $0x20] sm:$0xff] (!%p488_p2)   ;;  %v6800_v10 = vld [vmem:[%s8501_s3 + $0x28] sm:$0xff] (!%p488_p2)   ;;  %vm891_vm1 = vcmask (!%p488_p2), 130048  }
   0x9   : > { %6176 = vmatpush3.bf16.msra.mxu1 (!%p488_p2), %v6791_v0  ;;  %6191 = vmatprep.mubr.msk.bf16.mxu1 (!%p488_p2), %vm7114_vm0, %v7113_v1  ;;  %v6802_v13 = vld [vmem:[%s8501_s3 + $0x30] sm:$0xff] (!%p488_p2)   ;;  %s8520_s30 = sld [smem:[#allocation2_spill]] (!%p488_p2)  ;;  %v6804_v15 = vld [vmem:[%s8501_s3 + $0x38] sm:$0xff] (!%p488_p2)   ;;  %v5217_v20 = vld [vmem:[%s8502_s4] ss:$0 sm:$0xff] (!%p488_p2)  ;;  %vm941_vm2 = vcmask (!%p488_p2), 72704  }
   0xa   : > { %6177 = vmatprep.subr.bf16.mxu1 (!%p488_p2), %v7113_v1  ;;  %6171 = vmatprep.mubr.msk.bf16.mxu0 (!%p488_p2), %vm7114_vm0, %v7113_v1  ;;  %v5208_v22 = vld [vmem:[%s8500_s2] ss:$0 sm:$0xff] (!%p488_p2)  ;;  %v6808_v38 = vld [vmem:[%s8503_s5 + $0x8] sm:$0xff] (!%p488_p2)   ;;  %v6809_v39 = vld [vmem:[%s8503_s5 + $0x10] sm:$0xff] (!%p488_p2)   ;;  %vm945_vm3 = vcmask (!%p488_p2), 65536   ;;  %vm970_vm4 = vcmask (!%p488_p2), 1043456  }
   0xb   : > { %v6807_v37 = vld [vmem:[%s8503_s5] sm:$0xff] (!%p488_p2)   ;;  %v6810_v40 = vld [vmem:[%s8503_s5 + $0x18] sm:$0xff] (!%p488_p2)   ;;  %v6812_v42 = vld [vmem:[%s8503_s5 + $0x28] sm:$0xff] (!%p488_p2)   ;;  %vm971_vm5 = vcmask (!%p488_p2), 1044480   ;;  %vm4724_vm6 = vcmask (!%p488_p2), 1040384  }
   0xc   : > { %v6811_v41 = vld [vmem:[%s8503_s5 + $0x20] sm:$0xff] (!%p488_p2)   ;;  %v6813_v43 = vld [vmem:[%s8503_s5 + $0x30] sm:$0xff] (!%p488_p2)   ;;  %v6814_v44 = vld [vmem:[%s8503_s5 + $0x38] sm:$0xff] (!%p488_p2)  }
   0xd   : > { %v6793_v3 = vld [vmem:[%s8519_s18] sm:$0xff] (!%p488_p2)   ;;  %v6795_v4 = vld [vmem:[%s8519_s18 + $0x8] sm:$0xff] (!%p488_p2)   ;;  %6178 = vmatpush3.bf16.msra.mxu1 (!%p488_p2), %v6792_v2  ;;  %v6797_v6 = vld [vmem:[%s8519_s18 + $0x10] sm:$0xff] (!%p488_p2)  }
   0xe   : > { %6156 = vmatpush3.bf16.msra.mxu0 (!%p488_p2), %v6793_v3  ;;  %6179 = vmatprep.subr.bf16.mxu1 (!%p488_p2), %v7113_v1  ;;  %v6799_v8 = vld [vmem:[%s8519_s18 + $0x18] sm:$0xff] (!%p488_p2)   ;;  %v6801_v11 = vld [vmem:[%s8519_s18 + $0x20] sm:$0xff] (!%p488_p2)   ;;  %v6803_v12 = vld [vmem:[%s8519_s18 + $0x28] sm:$0xff] (!%p488_p2)  }
   0xf   : > { %6157 = vmatprep.subr.bf16.mxu0 %v7113_v1  ;;  %s8522_s25 = smov (!%p539_p3, %s5199_s25), 1  ;;  %v6805_v14 = vld [vmem:[%s8519_s18 + $0x30] sm:$0xff]   ;;  %v6806_v18 = vld [vmem:[%s8519_s18 + $0x38] sm:$0xff]   ;;  %v5226_v3 = vld [vmem:[%s8504_s6] ss:$0 sm:$0xff] }
  0x10   : > { %s5867_s22 = sshll.u32 %s8522_s25, 4 }
  0x11   : > { %6180 = vmatpush3.bf16.msra.mxu1 %v6794_v5  ;;  %s7282_s19 = scalar_lea.vmem %s8520_s30, %s5867_s22  ;;  %v6815_v5 = vld [vmem:[%s8501_s3 + $0x40] sm:$0xff]   ;;  %s548_s27 = scalar_lea.vmem %s8515_s17, %s5867_s22 }
  0x12   : > { %6158 = vmatpush3.bf16.msra.mxu0 %v6795_v4  ;;  %6181 = vmatprep.subr.bf16.mxu1 %v7113_v1  ;;  %v550_v16 = vld [vmem:[%s7282_s19] sm:$0xff]  ;;  %v551_v17 = vld [vmem:[%s7282_s19 + $0x8] sm:$0x1] }
  0x13   : > { %6159 = vmatprep.subr.bf16.mxu0 %v7113_v1  ;;  %v7298_v19 = vpack.c.bf16 %v551_v17, %v550_v16  ;;  %v6821_v16 = vld [vmem:[%s8501_s3 + $0x60] sm:$0xff]   ;;  %v6823_v17 = vld [vmem:[%s8501_s3 + $0x68] sm:$0xff]  }
  0x15   : > { %6182 = vmatpush3.bf16.msra.mxu1 %v6796_v7 }
  0x16   : > { %6160 = vmatpush3.bf16.msra.mxu0 %v6797_v6  ;;  %6183 = vmatprep.subr.bf16.mxu1 %v7113_v1 }
  0x17   : > { %6161 = vmatprep.subr.bf16.mxu0 %v7113_v1 }
  0x19   : > { %6184 = vmatpush3.bf16.msra.mxu1 %v6798_v9  ;;  %v7115_v9 = vmov 65535  }
  0x1a   : > { %6162 = vmatpush3.bf16.msra.mxu0 %v6799_v8  ;;  %6185 = vmatprep.subr.bf16.mxu1 %v7113_v1 }
  0x1b   : > { %6163 = vmatprep.subr.bf16.mxu0 %v7113_v1 }
  0x1d   : > { %6186 = vmatpush3.bf16.msra.mxu1 %v6800_v10  ;;  %v972_v10 = vsel %vm970_vm4, 4294967295, %v7115_v9 }
  0x1e   : > { %6164 = vmatpush3.bf16.msra.mxu0 %v6801_v11  ;;  %6187 = vmatprep.subr.bf16.mxu1 %v7113_v1  ;;  %v7366_v11 = vsel %vm971_vm5, %v972_v10, 0 }
  0x1f   : > { %6165 = vmatprep.subr.bf16.mxu0 %v7113_v1 }
  0x21   : > { %6188 = vmatpush3.bf16.msra.mxu1 %v6802_v13 }
  0x22   : > { %6166 = vmatpush3.bf16.msra.mxu0 %v6803_v12  ;;  %6189 = vmatprep.subr.bf16.mxu1 %v7113_v1  ;;  %v6816_v12 = vld [vmem:[%s8501_s3 + $0x48] sm:$0xff]  }
  0x23   : > { %6167 = vmatprep.subr.bf16.mxu0 %v7113_v1 }
  0x25   : > { %6190 = vmatpush3.bf16.msra.mxu1 %v6804_v15  ;;  %v6819_v15 = vld [vmem:[%s8501_s3 + $0x58] sm:$0xff]  }
  0x26   : > { %6168 = vmatpush3.bf16.msra.mxu0 %v6805_v14  ;;  %6215 = vmatprep.subr.bf16.mxu1 %v7113_v1  ;;  %v6817_v14 = vld [vmem:[%s8501_s3 + $0x50] sm:$0xff]  }
  0x27   : > { %6169 = vmatprep.subr.bf16.mxu0 %v7113_v1 }
  0x28   : > { %6192 = vmatmul.mubr.bf16.vlgmr.msra.gmra.mrb[0].mxu1 %v7298_v19 }
  0x29   : > { %6217 = vmatprep.mubr.msk.bf16.mxu1 %vm7114_vm0, %v7113_v1 }
  0x2a   : > { %6170 = vmatpush3.bf16.msra.mxu0 %v6806_v18  ;;  %v6825_v18 = vld [vmem:[%s8501_s3 + $0x70] sm:$0xff]  }
  0x2b   : > { %6195 = vmatprep.subr.bf16.mxu0 %v7113_v1 }
  0x2d   : > { %6172 = vmatmul.mubr.bf16.vlgmr.msra.gmra.mrb[0].mxu0 %v7298_v19 }
  0x2e   : > { %6211 = vmatprep.mubr.msk.bf16.mxu0 %vm7114_vm0, %v7113_v1  ;;  %6196 = vmatpush3.bf16.msra.mxu0 %v6807_v37  ;;  %v6832_v37 = vld [vmem:[%s8503_s5 + $0x48] sm:$0xff]  }
  0x2f   : > { %6197 = vmatprep.subr.bf16.mxu0 %v7113_v1 }
  0x32   : > { %6198 = vmatpush3.bf16.msra.mxu0 %v6808_v38  ;;  %v6833_v38 = vld [vmem:[%s8503_s5 + $0x50] sm:$0xff]  }
  0x33   : > { %6199 = vmatprep.subr.bf16.mxu0 %v7113_v1 }
  0x36   : > { %6200 = vmatpush3.bf16.msra.mxu0 %v6809_v39  ;;  %v6834_v39 = vld [vmem:[%s8503_s5 + $0x58] sm:$0xff]  }
  0x37   : > { %6201 = vmatprep.subr.bf16.mxu0 %v7113_v1 }
  0x3a   : > { %6202 = vmatpush3.bf16.msra.mxu0 %v6810_v40  ;;  %v6835_v40 = vld [vmem:[%s8503_s5 + $0x60] sm:$0xff]  }
  0x3b   : > { %6203 = vmatprep.subr.bf16.mxu0 %v7113_v1 }
  0x3e   : > { %6204 = vmatpush3.bf16.msra.mxu0 %v6811_v41  ;;  %v6836_v41 = vld [vmem:[%s8503_s5 + $0x68] sm:$0xff]  }
  0x3f   : > { %6205 = vmatprep.subr.bf16.mxu0 %v7113_v1 }
  0x42   : > { %6206 = vmatpush3.bf16.msra.mxu0 %v6812_v42  ;;  %v6837_v42 = vld [vmem:[%s8503_s5 + $0x70] sm:$0xff]  }
  0x43   : > { %6207 = vmatprep.subr.bf16.mxu0 %v7113_v1 }
  0x46   : > { %6208 = vmatpush3.bf16.msra.mxu0 %v6813_v43  ;;  %v6838_v43 = vld [vmem:[%s8503_s5 + $0x78] sm:$0xff]  }
  0x47   : > { %6209 = vmatprep.subr.bf16.mxu0 %v7113_v1 }
  0x4a   : > { %6210 = vmatpush3.bf16.msra.mxu0 %v6814_v44  ;;  %v6839_v44 = vld [vmem:[%s8505_s7] sm:$0xff]  }
  0x4b   : > { %6247 = vmatprep.subr.bf16.mxu0 %v7113_v1 }
  0x4d   : > { %6212 = vmatmul.mubr.bf16.vlgmr.msra.gmra.mrb[4].mxu0 %v7298_v19 }
  0x4e   : > { %6263 = vmatprep.mubr.msk.bf16.mxu0 %vm7114_vm0, %v7113_v1  ;;  %6248 = vmatpush3.bf16.msra.mxu0 %v6815_v5 }
  0x4f   : > { %6249 = vmatprep.subr.bf16.mxu0 %v7113_v1 }
  0x52   : > { %6250 = vmatpush3.bf16.msra.mxu0 %v6816_v12 }
  0x53   : > { %6251 = vmatprep.subr.bf16.mxu0 %v7113_v1 }
  0x56   : > { %6252 = vmatpush3.bf16.msra.mxu0 %v6817_v14 }
  0x57   : > { %6253 = vmatprep.subr.bf16.mxu0 %v7113_v1 }
  0x5a   : > { %6254 = vmatpush3.bf16.msra.mxu0 %v6819_v15 }
  0x5b   : > { %6255 = vmatprep.subr.bf16.mxu0 %v7113_v1 }
  0x5e   : > { %6256 = vmatpush3.bf16.msra.mxu0 %v6821_v16 }
  0x5f   : > { %6257 = vmatprep.subr.bf16.mxu0 %v7113_v1 }
  0x62   : > { %6258 = vmatpush3.bf16.msra.mxu0 %v6823_v17 }
  0x63   : > { %6259 = vmatprep.subr.bf16.mxu0 %v7113_v1 }
  0x66   : > { %6260 = vmatpush3.bf16.msra.mxu0 %v6825_v18 }
  0x67   : > { %6261 = vmatprep.subr.bf16.mxu0 %v7113_v1 }
  0xfb   : > { %v770_v21 = vpop.f32.mrb[0].mxu1 }
  0xfc   : > { %v6193_v23 = vpop.f32.mrb[1].mxu1  ;;  %v771_v26 = vadd.f32 %v5217_v20, %v770_v21 }
  0xfd   : > { %v773_v24 = vpop.f32.mrb[2].mxu1 }
  0xfe   : > { %v774_v27 = vadd.f32 %v5217_v20, %v773_v24  ;;  %v6194_v28 = vpop.f32.mrb[3].mxu1  ;;  %v6827_v20 = vld [vmem:[%s8501_s3 + $0x78] sm:$0xff]  }
  0xff   : > { %6262 = vmatpush3.bf16.msra.mxu0 %v6827_v20 }
 0x100   : > { %v658_v25 = vpop.f32.mrb[0].mxu0  ;;  %v890_v32 = vpack.c.bf16 %v774_v27, %v771_v26  ;;  %6287 = vmatprep.subr.bf16.mxu0 %v7113_v1  ;;  %v6818_v27 = vld [vmem:[%s8519_s18 + $0x40] sm:$0xff]  }
 0x101   : > { %v659_v29 = vadd.f32 %v5208_v22, %v658_v25  ;;  %v6173_v30 = vpop.f32.mrb[1].mxu0 }
 0x102   : > { %v661_v31 = vpop.f32.mrb[2].mxu0  ;;  %v896_v36 = vsel %vm891_vm1, %v890_v32, 0  ;;  %6264 = vmatmul.mubr.bf16.vlgmr.msra.gmra.mrb[8].mxu0 %v7298_v19  ;;  %v6822_v30 = vld [vmem:[%s8519_s18 + $0x50] sm:$0xff]   ;;  %v6826_v32 = vld [vmem:[%s8519_s18 + $0x60] sm:$0xff]  }
 0x103   : > { %v662_v33 = vadd.f32 %v5208_v22, %v661_v31  ;;  %v6174_v34 = vpop.f32.mrb[3].mxu0  ;;  %6216 = vmatpush3.bf16.xpose.msra.mxu1 %v896_v36  ;;  %6289 = vmatprep.mubr.msk.bf16.mxu0 %vm7114_vm0, %v7113_v1  ;;  %v6824_v31 = vld [vmem:[%s8519_s18 + $0x58] sm:$0xff]   ;;  %v6831_v36 = vld [vmem:[%s8503_s5 + $0x40] sm:$0xff]  }
 0x104   : > { %6221 = vmatprep.subr.bf16.mxu1 %v7113_v1  ;;  %v6829_v34 = vld [vmem:[%s8519_s18 + $0x70] sm:$0xff]  }
 0x105   : > { %v889_v35 = vpack.c.bf16 %v662_v33, %v659_v29  ;;  %v6820_v29 = vld [vmem:[%s8519_s18 + $0x48] sm:$0xff]  }
 0x106   : > { %v6828_v33 = vld [vmem:[%s8519_s18 + $0x68] sm:$0xff]  }
 0x10a   : > { %6218 = vmatmul.mubr.msk.bf16.vlgmr.msra.gmra.mrb[4].mxu1 %vm891_vm1, %v889_v35  ;;  %v6830_v35 = vld [vmem:[%s8519_s18 + $0x78] sm:$0xff]  }
 0x10b   : > { %6223 = vmatprep.mubr.msk.bf16.mxu1 %vm7114_vm0, %v7113_v1 }
 0x120   : > { %v882_v63 = vpop.f32.mrb[4].mxu0 }
 0x121   : > { %v6213_v0 = vpop.f32.mrb[5].mxu0  ;;  %v883_v6 = vadd.f32 %v5226_v3, %v882_v63 }
 0x122   : > { %v885_v2 = vpop.f32.mrb[6].mxu0 }
 0x123   : > { %v6214_v4 = vpop.f32.mrb[7].mxu0  ;;  %v886_v7 = vadd.f32 %v5226_v3, %v885_v2 }
 0x124   : > { %v5306_v4 = vld [vmem:[%s8504_s6 + $0x1] ss:$0 sm:$0xff] }
 0x125   : > { %v966_v8 = vpack.c.bf16 %v886_v7, %v883_v6 }
 0x127   : > { %v975_v13 = vand.u32 %v7366_v11, %v966_v8 }
 0x129   : > { %6222 = vmatpush3.bf16.msra.mxu1 %v975_v13 }
 0x12a   : > { %6227 = vmatprep.subr.bf16.mxu1 %v7113_v1 }
 0x1dd   : > { %v932_v45 = vpop.f32.mrb[4].mxu1 }
 0x1de   : > { %v939_v46 = vmul.f32 0.25, %v932_v45  ;;  %v6219_v47 = vpop.f32.mrb[5].mxu1  ;;  %v5280_v45 = vld [vmem:[%s8502_s4 + $0x1] ss:$0 sm:$0xff] }
 0x1df   : > { %v935_v48 = vpop.f32.mrb[6].mxu1 }
 0x1e0   : > { %v940_v49 = vmul.f32 0.25, %v935_v48  ;;  %v6220_v50 = vpop.f32.mrb[7].mxu1  ;;  %v942_v51 = vsel %vm941_vm2, %v939_v46, -inf }
 0x1e1   : > { %943 = vmax.xlane.f32.xlu0 %v942_v51 }
 0x1e2   : > { %v946_v52 = vsel %vm945_vm3, %v940_v49, -inf }
 0x1e5   : > { %947 = vmax.xlane.f32.xlu0 %v946_v52 }
 0x26e   : > { %v944_v53 = vpop.xlane.xlu0 %943 }
 0x26f   : > { %v949_v54 = vsub.f32 %v939_v46, %v944_v53  ;;  %v1242_v46 = vpop.f32.mrb[8].mxu0 }
 0x270   : > { %v1243_v47 = vadd.f32 %v5280_v45, %v1242_v46  ;;  %v6265_v48 = vpop.f32.mrb[9].mxu0 }
 0x271   : > { %v951_v55 = vmul.f32 1.442695, %v949_v54  ;;  %v6845_v48 = vld [vmem:[%s8501_s3 + $0x98] sm:$0xff]  }
 0x272   : > { %v948_v56 = vpop.xlane.xlu0 %947 }
 0x273   : > { %7031 = vpow2.f32 %v951_v55  ;;  %v950_v57 = vsub.f32 %v940_v49, %v948_v56  ;;  %v1245_v49 = vpop.f32.mrb[10].mxu0 }
 0x274   : > { %v1246_v50 = vadd.f32 %v5280_v45, %v1245_v49  ;;  %v6266_v51 = vpop.f32.mrb[11].mxu0  ;;  %v6841_v45 = vld [vmem:[%s8505_s7 + $0x8] sm:$0xff]   ;;  %v6847_v49 = vld [vmem:[%s8501_s3 + $0xa0] sm:$0xff]  }
 0x275   : > { %v953_v58 = vmul.f32 1.442695, %v950_v57  ;;  %v6851_v51 = vld [vmem:[%s8501_s3 + $0xb0] sm:$0xff]  }
 0x276   : > { %v1364_v52 = vpack.c.bf16 %v1246_v50, %v1243_v47  ;;  %v6843_v47 = vld [vmem:[%s8501_s3 + $0x90] sm:$0xff]   ;;  %v6849_v50 = vld [vmem:[%s8501_s3 + $0xa8] sm:$0xff]  }
 0x277   : > { %7033 = vpow2.f32 %v953_v58 }
 0x278   : > { %v1369_v53 = vsel %vm891_vm1, %v1364_v52, 0  ;;  %v6853_v52 = vld [vmem:[%s8501_s3 + $0xb8] sm:$0xff]  }
 0x279   : > { %6288 = vmatpush3.bf16.xpose.msra.mxu0 %v1369_v53 }
 0x27a   : > { %6293 = vmatprep.subr.bf16.mxu0 %v7113_v1 }
 0x27d   : > { %v7032_v59 = vpop.eup %7031 }
 0x27e   : > { %v955_v60 = vsel %vm941_vm2, %v7032_v59, 0.0 }
 0x27f   : > { %956 = vadd.xlane.f32.xlu1 %v955_v60 }
 0x281   : > { %v7034_v61 = vpop.eup %7033 }
 0x282   : > { %v958_v62 = vsel %vm945_vm3, %v7034_v61, 0.0 }
 0x283   : > { %959 = vadd.xlane.f32.xlu1 %v958_v62 }
 0x30c   : > { %v957_v21 = vpop.xlane.xlu1 %956 }
 0x30d   : > { %7035 = vrcp.f32 %v957_v21 }
 0x310   : > { %v960_v22 = vpop.xlane.xlu1 %959 }
 0x311   : > { %7037 = vrcp.f32 %v960_v22 }
 0x317   : > { %v7036_v23 = vpop.eup %7035 }
 0x318   : > { %v963_v25 = vmul.f32 %v7036_v23, %v7032_v59  ;;  %v5254_v59 = vld [vmem:[%s8500_s2 + $0x1] ss:$0 sm:$0xff] }
 0x31b   : > { %v7038_v24 = vpop.eup %7037 }
 0x31c   : > { %v964_v26 = vmul.f32 %v7038_v24, %v7034_v61 }
 0x31e   : > { %v965_v28 = vpack.c.bf16 %v964_v26, %v963_v25 }
 0x320   : > { %6224 = vmatmul.mubr.msk.bf16.vlgmr.msra.gmra.mrb[8].mxu1 %vm941_vm2, %v965_v28 }
 0x321   : > { %6228 = vmatpush3.bf16.msra.mxu1 %v6818_v27  ;;  %6243 = vmatprep.mubr.msk.bf16.mxu1 %vm7114_vm0, %v7113_v1 }
 0x322   : > { %6229 = vmatprep.subr.bf16.mxu1 %v7113_v1 }
 0x325   : > { %6230 = vmatpush3.bf16.msra.mxu1 %v6820_v29 }
 0x326   : > { %6231 = vmatprep.subr.bf16.mxu1 %v7113_v1 }
 0x329   : > { %6232 = vmatpush3.bf16.msra.mxu1 %v6822_v30 }
 0x32a   : > { %6233 = vmatprep.subr.bf16.mxu1 %v7113_v1 }
 0x32d   : > { %6234 = vmatpush3.bf16.msra.mxu1 %v6824_v31 }
 0x32e   : > { %6235 = vmatprep.subr.bf16.mxu1 %v7113_v1 }
 0x331   : > { %6236 = vmatpush3.bf16.msra.mxu1 %v6826_v32 }
 0x332   : > { %6237 = vmatprep.subr.bf16.mxu1 %v7113_v1 }
 0x335   : > { %6238 = vmatpush3.bf16.msra.mxu1 %v6828_v33 }
 0x336   : > { %6239 = vmatprep.subr.bf16.mxu1 %v7113_v1 }
 0x339   : > { %6240 = vmatpush3.bf16.msra.mxu1 %v6829_v34 }
 0x33a   : > { %6241 = vmatprep.subr.bf16.mxu1 %v7113_v1 }
 0x33d   : > { %6242 = vmatpush3.bf16.msra.mxu1 %v6830_v35 }
 0x33e   : > { %6267 = vmatprep.subr.bf16.mxu1 %v7113_v1 }
 0x340   : > { %6244 = vmatmul.mubr.bf16.vlgmr.msra.gmra.mrb[12].mxu1 %v7298_v19 }
 0x341   : > { %6268 = vmatpush3.bf16.msra.mxu1 %v6831_v36  ;;  %6283 = vmatprep.mubr.msk.bf16.mxu1 %vm7114_vm0, %v7113_v1 }
 0x342   : > { %6269 = vmatprep.subr.bf16.mxu1 %v7113_v1 }
 0x345   : > { %6270 = vmatpush3.bf16.msra.mxu1 %v6832_v37  ;;  %v6840_v37 = vld [vmem:[%s8501_s3 + $0x80] sm:$0xff]  }
 0x346   : > { %6271 = vmatprep.subr.bf16.mxu1 %v7113_v1 }
 0x349   : > { %6272 = vmatpush3.bf16.msra.mxu1 %v6833_v38  ;;  %v6842_v38 = vld [vmem:[%s8501_s3 + $0x88] sm:$0xff]  }
 0x34a   : > { %6273 = vmatprep.subr.bf16.mxu1 %v7113_v1 }
 0x34d   : > { %6274 = vmatpush3.bf16.msra.mxu1 %v6834_v39 }
 0x34e   : > { %6275 = vmatprep.subr.bf16.mxu1 %v7113_v1 }
 0x351   : > { %6276 = vmatpush3.bf16.msra.mxu1 %v6835_v40 }
 0x352   : > { %6277 = vmatprep.subr.bf16.mxu1 %v7113_v1 }
 0x355   : > { %6278 = vmatpush3.bf16.msra.mxu1 %v6836_v41 }
 0x356   : > { %6279 = vmatprep.subr.bf16.mxu1 %v7113_v1 }
 0x359   : > { %6280 = vmatpush3.bf16.msra.mxu1 %v6837_v42 }
 0x35a   : > { %6281 = vmatprep.subr.bf16.mxu1 %v7113_v1 }
 0x35d   : > { %6282 = vmatpush3.bf16.msra.mxu1 %v6838_v43 }
 0x35e   : > { %6305 = vmatprep.subr.bf16.mxu1 %v7113_v1 }
 0x360   : > { %6284 = vmatmul.mubr.bf16.vlgmr.msra.gmra.mrb[16].mxu1 %v7298_v19 }
 0x361   : > { %6307 = vmatprep.mubr.msk.bf16.mxu1 %vm7114_vm0, %v7113_v1  ;;  %6306 = vmatpush3.bf16.msra.mxu1 %v6839_v44 }
 0x362   : > { %6331 = vmatprep.subr.bf16.mxu1 %v7113_v1 }
 0x3f3   : > { %v1011_v54 = vpop.f32.mrb[8].mxu1 }
 0x3f4   : > { %v6225_v55 = vpop.f32.mrb[9].mxu1 }
 0x3f5   : > { %v1014_v56 = vpop.f32.mrb[10].mxu1 }
 0x3f6   : > { %v1018_v57 = vpack.c.bf16 %v1014_v56, %v1011_v54  ;;  %v6226_v58 = vpop.f32.mrb[11].mxu1  ;;  %v6844_v56 = vld [vmem:[%s8519_s18 + $0x80] sm:$0xff]  }
 0x3f8   : > { %6308 = vmatmul.mubr.msk.bf16.vlgmr.msra.gmra.mrb[20].mxu1 %vm891_vm1, %v1018_v57 }
 0x3f9   : > { %6347 = vmatprep.mubr.msk.bf16.mxu1 %vm7114_vm0, %v7113_v1  ;;  %6332 = vmatpush3.bf16.msra.mxu1 %v6840_v37 }
 0x3fa   : > { %6333 = vmatprep.subr.bf16.mxu1 %v7113_v1 }
 0x3fd   : > { %6334 = vmatpush3.bf16.msra.mxu1 %v6842_v38 }
 0x3fe   : > { %6335 = vmatprep.subr.bf16.mxu1 %v7113_v1 }
 0x401   : > { %6336 = vmatpush3.bf16.msra.mxu1 %v6843_v47 }
 0x402   : > { %6337 = vmatprep.subr.bf16.mxu1 %v7113_v1 }
 0x405   : > { %6338 = vmatpush3.bf16.msra.mxu1 %v6845_v48 }
 0x406   : > { %6339 = vmatprep.subr.bf16.mxu1 %v7113_v1 }
 0x409   : > { %6340 = vmatpush3.bf16.msra.mxu1 %v6847_v49 }
 0x40a   : > { %6341 = vmatprep.subr.bf16.mxu1 %v7113_v1 }
 0x40d   : > { %6342 = vmatpush3.bf16.msra.mxu1 %v6849_v50 }
 0x40e   : > { %6343 = vmatprep.subr.bf16.mxu1 %v7113_v1 }
 0x411   : > { %6344 = vmatpush3.bf16.msra.mxu1 %v6851_v51 }
 0x412   : > { %6345 = vmatprep.subr.bf16.mxu1 %v7113_v1 }
 0x413   : > { %v1128_v60 = vpop.f32.mrb[12].mxu1 }
 0x414   : > { %v6245_v61 = vpop.f32.mrb[13].mxu1  ;;  %v1129_v63 = vadd.f32 %v5254_v59, %v1128_v60  ;;  %v6848_v60 = vld [vmem:[%s8519_s18 + $0x90] sm:$0xff]  }
 0x415   : > { %v1131_v62 = vpop.f32.mrb[14].mxu1  ;;  %6346 = vmatpush3.bf16.msra.mxu1 %v6853_v52  ;;  %v6850_v61 = vld [vmem:[%s8519_s18 + $0x98] sm:$0xff]  }
 0x416   : > { %v1132_v0 = vadd.f32 %v5254_v59, %v1131_v62  ;;  %v6246_v2 = vpop.f32.mrb[15].mxu1  ;;  %6371 = vmatprep.subr.bf16.mxu1 %v7113_v1  ;;  %v6846_v59 = vld [vmem:[%s8519_s18 + $0x88] sm:$0xff]   ;;  %v6852_v62 = vld [vmem:[%s8519_s18 + $0xa0] sm:$0xff]  }
 0x417   : > { %v6856_v2 = vld [vmem:[%s8519_s18 + $0xb8] sm:$0xff]  }
 0x418   : > { %v1363_v3 = vpack.c.bf16 %v1132_v0, %v1129_v63  ;;  %6348 = vmatmul.mubr.bf16.vlgmr.msra.gmra.mrb[24].mxu1 %v7298_v19  ;;  %v6854_v63 = vld [vmem:[%s8519_s18 + $0xa8] sm:$0xff]   ;;  %v6855_v0 = vld [vmem:[%s8519_s18 + $0xb0] sm:$0xff]  }
 0x419   : > { %6373 = vmatprep.mubr.msk.bf16.mxu1 %vm7114_vm0, %v7113_v1 }
 0x41a   : > { %6290 = vmatmul.mubr.msk.bf16.vlgmr.msra.gmra.mrb[12].mxu0 %vm891_vm1, %v1363_v3  ;;  %v5366_v3 = vld [vmem:[%s8502_s4 + $0x2] ss:$0 sm:$0xff] }
 0x41b   : > { %6295 = vmatprep.mubr.msk.bf16.mxu0 %vm7114_vm0, %v7113_v1 }
 0x433   : > { %v1356_v5 = vpop.f32.mrb[16].mxu1 }
 0x434   : > { %v1357_v6 = vadd.f32 %v5306_v4, %v1356_v5  ;;  %v6285_v7 = vpop.f32.mrb[17].mxu1 }
 0x435   : > { %v1359_v8 = vpop.f32.mrb[18].mxu1 }
 0x436   : > { %v1360_v9 = vadd.f32 %v5306_v4, %v1359_v8  ;;  %v6286_v10 = vpop.f32.mrb[19].mxu1 }
 0x438   : > { %v1437_v12 = vpack.c.bf16 %v1360_v9, %v1357_v6 }
 0x43a   : > { %v1442_v13 = vand.u32 %v1437_v12, %v7366_v11 }
 0x43c   : > { %6294 = vmatpush3.bf16.msra.mxu0 %v1442_v13 }
 0x43d   : > { %6299 = vmatprep.subr.bf16.mxu0 %v7113_v1 }
 0x4cb   : > { %v7497_v14 = vpop.f32.mrb[20].mxu1 }
 0x4cc   : > { %v6309_v15 = vpop.f32.mrb[21].mxu1 }
 0x4cd   : > { %v7499_v16 = vpop.f32.mrb[22].mxu1 }
 0x4ce   : > { %v6310_v17 = vpop.f32.mrb[23].mxu1 }
 0x4eb   : > { %v1810_v4 = vpop.f32.mrb[24].mxu1 }
 0x4ec   : > { %v1811_v5 = vadd.f32 %v5366_v3, %v1810_v4  ;;  %v6349_v6 = vpop.f32.mrb[25].mxu1 }
 0x4ed   : > { %v1405_v18 = vpop.f32.mrb[12].mxu0  ;;  %v1813_v7 = vpop.f32.mrb[26].mxu1 }
 0x4ee   : > { %v1412_v20 = vmul.f32 0.25, %v1405_v18  ;;  %v6291_v21 = vpop.f32.mrb[13].mxu0  ;;  %v1814_v8 = vadd.f32 %v5366_v3, %v1813_v7  ;;  %v6350_v9 = vpop.f32.mrb[27].mxu1 }
 0x4ef   : > { %v1408_v22 = vpop.f32.mrb[14].mxu0 }
 0x4f0   : > { %v1413_v23 = vmul.f32 0.25, %v1408_v22  ;;  %v6292_v24 = vpop.f32.mrb[15].mxu0  ;;  %v1414_v25 = vsel %vm941_vm2, %v1412_v20, -inf  ;;  %v1932_v10 = vpack.c.bf16 %v1814_v8, %v1811_v5  ;;  %v5340_v22 = vld [vmem:[%s8500_s2 + $0x2] ss:$0 sm:$0xff]  ;;  %v6866_v8 = vld [vmem:[%s8505_s7 + $0x10] sm:$0xff]  }
 0x4f1   : > { %1415 = vmax.xlane.f32.xlu0 %v1414_v25 }
 0x4f2   : > { %v1417_v26 = vsel %vm945_vm3, %v1413_v23, -inf  ;;  %v1937_v12 = vsel %vm891_vm1, %v1932_v10, 0  ;;  %v6868_v10 = vld [vmem:[%s8501_s3 + $0xd0] sm:$0xff]  }
 0x4f3   : > { %1418 = vmax.xlane.f32.xlu1 %v1417_v26  ;;  %6372 = vmatpush3.bf16.xpose.msra.mxu1 %v1937_v12  ;;  %v6870_v12 = vld [vmem:[%s8501_s3 + $0xd8] sm:$0xff]  }
 0x4f4   : > { %6377 = vmatprep.subr.bf16.mxu1 %v7113_v1 }
 0x57e   : > { %v1416_v27 = vpop.xlane.xlu0 %1415 }
 0x57f   : > { %v1420_v28 = vsub.f32 %v1412_v20, %v1416_v27 }
 0x580   : > { %v1419_v29 = vpop.xlane.xlu1 %1418 }
 0x581   : > { %v1422_v30 = vmul.f32 1.442695, %v1420_v28  ;;  %v1421_v31 = vsub.f32 %v1413_v23, %v1419_v29 }
 0x583   : > { %7039 = vpow2.f32 %v1422_v30  ;;  %v1424_v32 = vmul.f32 1.442695, %v1421_v31  ;;  %v6859_v30 = vld [vmem:[%s8503_s5 + $0x90] sm:$0xff]   ;;  %v6860_v31 = vld [vmem:[%s8503_s5 + $0x98] sm:$0xff]  }
 0x585   : > { %7041 = vpow2.f32 %v1424_v32  ;;  %v6861_v32 = vld [vmem:[%s8503_s5 + $0xa0] sm:$0xff]  }
 0x58d   : > { %v7040_v33 = vpop.eup %7039 }
 0x58e   : > { %v1426_v34 = vsel %vm941_vm2, %v7040_v33, 0.0 }
 0x58f   : > { %v7042_v35 = vpop.eup %7041  ;;  %1427 = vadd.xlane.f32.xlu0 %v1426_v34  ;;  %v6863_v34 = vld [vmem:[%s8503_s5 + $0xb0] sm:$0xff]  }
 0x590   : > { %v1429_v36 = vsel %vm945_vm3, %v7042_v35, 0.0 }
 0x591   : > { %1430 = vadd.xlane.f32.xlu1 %v1429_v36 }
 0x61c   : > { %v1428_v39 = vpop.xlane.xlu0 %1427 }
 0x61d   : > { %7043 = vrcp.f32 %v1428_v39 }
 0x61e   : > { %v1431_v40 = vpop.xlane.xlu1 %1430 }
 0x61f   : > { %7045 = vrcp.f32 %v1431_v40 }
 0x627   : > { %v7044_v41 = vpop.eup %7043 }
 0x628   : > { %v1434_v43 = vmul.f32 %v7044_v41, %v7040_v33  ;;  %v6862_v33 = vld [vmem:[%s8503_s5 + $0xa8] sm:$0xff]  }
 0x629   : > { %v7046_v42 = vpop.eup %7045 }
 0x62a   : > { %v1435_v44 = vmul.f32 %v7046_v42, %v7042_v35  ;;  %v6864_v35 = vld [vmem:[%s8503_s5 + $0xb8] sm:$0xff]  }
 0x62c   : > { %v1436_v46 = vpack.c.bf16 %v1435_v44, %v1434_v43 }
 0x62e   : > { %6296 = vmatmul.mubr.msk.bf16.vlgmr.msra.gmra.mrb[16].mxu0 %vm941_vm2, %v1436_v46 }
 0x62f   : > { %6300 = vmatpush3.bf16.msra.mxu0 %v6841_v45  ;;  %6301 = vmatprep.mubr.msk.bf16.mxu0 %vm7114_vm0, %v7113_v1 }
 0x630   : > { %6311 = vmatprep.subr.bf16.mxu0 %v7113_v1 }
 0x701   : > { %v1478_v53 = vpop.f32.mrb[16].mxu0 }
 0x702   : > { %v6297_v54 = vpop.f32.mrb[17].mxu0 }
 0x703   : > { %v1481_v55 = vpop.f32.mrb[18].mxu0 }
 0x704   : > { %v1485_v57 = vpack.c.bf16 %v1481_v55, %v1478_v53  ;;  %v6298_v58 = vpop.f32.mrb[19].mxu0 }
 0x706   : > { %6302 = vmatmul.mubr.msk.bf16.vlgmr.msra.gmra.mrb[20].mxu0 %vm891_vm1, %v1485_v57 }
 0x707   : > { %6312 = vmatpush3.bf16.msra.mxu0 %v6844_v56  ;;  %6327 = vmatprep.mubr.msk.bf16.mxu0 %vm7114_vm0, %v7113_v1  ;;  %v5392_v56 = vld [vmem:[%s8504_s6 + $0x2] ss:$0 sm:$0xff] }
 0x708   : > { %6313 = vmatprep.subr.bf16.mxu0 %v7113_v1 }
 0x70b   : > { %6314 = vmatpush3.bf16.msra.mxu0 %v6846_v59 }
 0x70c   : > { %6315 = vmatprep.subr.bf16.mxu0 %v7113_v1 }
 0x70f   : > { %6316 = vmatpush3.bf16.msra.mxu0 %v6848_v60 }
 0x710   : > { %6317 = vmatprep.subr.bf16.mxu0 %v7113_v1 }
 0x713   : > { %6318 = vmatpush3.bf16.msra.mxu0 %v6850_v61 }
 0x714   : > { %6319 = vmatprep.subr.bf16.mxu0 %v7113_v1 }
 0x717   : > { %6320 = vmatpush3.bf16.msra.mxu0 %v6852_v62 }
 0x718   : > { %6321 = vmatprep.subr.bf16.mxu0 %v7113_v1 }
 0x71b   : > { %6322 = vmatpush3.bf16.msra.mxu0 %v6854_v63  ;;  %v6865_v63 = vld [vmem:[%s8501_s3 + $0xc0] sm:$0xff]  }
 0x71c   : > { %6323 = vmatprep.subr.bf16.mxu0 %v7113_v1 }
 0x71f   : > { %6324 = vmatpush3.bf16.msra.mxu0 %v6855_v0  ;;  %v6867_v0 = vld [vmem:[%s8501_s3 + $0xc8] sm:$0xff]  }
 0x720   : > { %6325 = vmatprep.subr.bf16.mxu0 %v7113_v1 }
 0x723   : > { %6326 = vmatpush3.bf16.msra.mxu0 %v6856_v2 }
 0x724   : > { %6351 = vmatprep.subr.bf16.mxu0 %v7113_v1 }
 0x726   : > { %6328 = vmatmul.mubr.bf16.vlgmr.msra.gmra.mrb[24].mxu0 %v7298_v19 }
 0x727   : > { %6367 = vmatprep.mubr.msk.bf16.mxu0 %vm7114_vm0, %v7113_v1 }
 0x7d9   : > { %v1532_v13 = vpop.f32.mrb[20].mxu0 }
 0x7da   : > { %v7591_v15 = vadd.f32 %v7497_v14, %v1532_v13  ;;  %v6303_v17 = vpop.f32.mrb[21].mxu0  ;;  %v6857_v14 = vld [vmem:[%s8503_s5 + $0x80] sm:$0xff]  }
 0x7db   : > { %v1535_v18 = vpop.f32.mrb[22].mxu0  ;;  %6352 = vmatpush3.bf16.msra.mxu0 %v6857_v14  ;;  %v6872_v13 = vld [vmem:[%s8501_s3 + $0xe0] sm:$0xff]   ;;  %v6874_v17 = vld [vmem:[%s8501_s3 + $0xe8] sm:$0xff]   ;;  %v6875_v14 = vld [vmem:[%s8519_s18 + $0xd8] sm:$0xff]  }
 0x7dc   : > { %v7594_v20 = vadd.f32 %v7499_v16, %v1535_v18  ;;  %v6304_v21 = vpop.f32.mrb[23].mxu0  ;;  %v6858_v16 = vld [vmem:[%s8503_s5 + $0x88] sm:$0xff]   ;;  %6353 = vmatprep.subr.bf16.mxu0 %v7113_v1  ;;  %v6876_v18 = vld [vmem:[%s8501_s3 + $0xf0] sm:$0xff]  }
 0x7dd   : > { %v6878_v21 = vld [vmem:[%s8501_s3 + $0xf8] sm:$0xff]  }
 0x7df   : > { %6354 = vmatpush3.bf16.msra.mxu0 %v6858_v16  ;;  %v6877_v16 = vld [vmem:[%s8519_s18 + $0xe0] sm:$0xff]  }
 0x7e0   : > { %6355 = vmatprep.subr.bf16.mxu0 %v7113_v1 }
 0x7e3   : > { %6356 = vmatpush3.bf16.msra.mxu0 %v6859_v30  ;;  %v6879_v30 = vld [vmem:[%s8519_s18 + $0xe8] sm:$0xff]  }
 0x7e4   : > { %6357 = vmatprep.subr.bf16.mxu0 %v7113_v1 }
 0x7e7   : > { %6358 = vmatpush3.bf16.msra.mxu0 %v6860_v31  ;;  %v6880_v31 = vld [vmem:[%s8519_s18 + $0xf0] sm:$0xff]  }
 0x7e8   : > { %6359 = vmatprep.subr.bf16.mxu0 %v7113_v1 }
 0x7eb   : > { %6360 = vmatpush3.bf16.msra.mxu0 %v6861_v32  ;;  %v6881_v32 = vld [vmem:[%s8519_s18 + $0xf8] sm:$0xff]  }
 0x7ec   : > { %6361 = vmatprep.subr.bf16.mxu0 %v7113_v1 }
 0x7ef   : > { %6362 = vmatpush3.bf16.msra.mxu0 %v6862_v33  ;;  %v5450_v33 = vld [vmem:[%s8502_s4 + $0x3] ss:$0 sm:$0xff] }
 0x7f0   : > { %6363 = vmatprep.subr.bf16.mxu0 %v7113_v1 }
 0x7f3   : > { %6364 = vmatpush3.bf16.msra.mxu0 %v6863_v34 }
 0x7f4   : > { %6365 = vmatprep.subr.bf16.mxu0 %v7113_v1 }
 0x7f7   : > { %6366 = vmatpush3.bf16.msra.mxu0 %v6864_v35 }
 0x7f8   : > { %6409 = vmatprep.subr.bf16.mxu0 %v7113_v1 }
 0x7f9   : > { %v1696_v23 = vpop.f32.mrb[24].mxu0 }
 0x7fa   : > { %v6329_v24 = vpop.f32.mrb[25].mxu0  ;;  %v1697_v26 = vadd.f32 %v5340_v22, %v1696_v23  ;;  %6368 = vmatmul.mubr.bf16.vlgmr.msra.gmra.mrb[28].mxu0 %v7298_v19 }
 0x7fb   : > { %v1699_v25 = vpop.f32.mrb[26].mxu0  ;;  %6425 = vmatprep.mubr.msk.bf16.mxu0 %vm7114_vm0, %v7113_v1  ;;  %6410 = vmatpush3.bf16.msra.mxu0 %v6865_v63 }
 0x7fc   : > { %v1700_v27 = vadd.f32 %v5340_v22, %v1699_v25  ;;  %v6330_v28 = vpop.f32.mrb[27].mxu0  ;;  %6411 = vmatprep.subr.bf16.mxu0 %v7113_v1  ;;  %v6869_v25 = vld [vmem:[%s8519_s18 + $0xc0] sm:$0xff]  }
 0x7fd   : > { %v6871_v28 = vld [vmem:[%s8519_s18 + $0xc8] sm:$0xff]  }
 0x7fe   : > { %v1931_v29 = vpack.c.bf16 %v1700_v27, %v1697_v26 }
 0x7ff   : > { %6412 = vmatpush3.bf16.msra.mxu0 %v6867_v0 }
 0x800   : > { %6374 = vmatmul.mubr.msk.bf16.vlgmr.msra.gmra.mrb[28].mxu1 %vm891_vm1, %v1931_v29  ;;  %6413 = vmatprep.subr.bf16.mxu0 %v7113_v1  ;;  %v6873_v29 = vld [vmem:[%s8519_s18 + $0xd0] sm:$0xff]  }
 0x801   : > { %6379 = vmatprep.mubr.msk.bf16.mxu1 %vm7114_vm0, %v7113_v1 }
 0x803   : > { %6414 = vmatpush3.bf16.msra.mxu0 %v6868_v10 }
 0x804   : > { %6415 = vmatprep.subr.bf16.mxu0 %v7113_v1 }
 0x807   : > { %6416 = vmatpush3.bf16.msra.mxu0 %v6870_v12 }
 0x808   : > { %6417 = vmatprep.subr.bf16.mxu0 %v7113_v1 }
 0x80b   : > { %6418 = vmatpush3.bf16.msra.mxu0 %v6872_v13 }
 0x80c   : > { %6419 = vmatprep.subr.bf16.mxu0 %v7113_v1 }
 0x80f   : > { %6420 = vmatpush3.bf16.msra.mxu0 %v6874_v17 }
 0x810   : > { %6421 = vmatprep.subr.bf16.mxu0 %v7113_v1 }
 0x813   : > { %6422 = vmatpush3.bf16.msra.mxu0 %v6876_v18 }
 0x814   : > { %6423 = vmatprep.subr.bf16.mxu0 %v7113_v1 }
 0x817   : > { %6424 = vmatpush3.bf16.msra.mxu0 %v6878_v21 }
 0x818   : > { %6449 = vmatprep.subr.bf16.mxu0 %v7113_v1 }
 0x81a   : > { %6426 = vmatmul.mubr.bf16.vlgmr.msra.gmra.mrb[32].mxu0 %v7298_v19 }
 0x81b   : > { %6451 = vmatprep.mubr.msk.bf16.mxu0 %vm7114_vm0, %v7113_v1 }
 0x8cd   : > { %v1924_v44 = vpop.f32.mrb[28].mxu0 }
 0x8ce   : > { %v6369_v45 = vpop.f32.mrb[29].mxu0  ;;  %v1925_v57 = vadd.f32 %v5392_v56, %v1924_v44 }
 0x8cf   : > { %v1927_v58 = vpop.f32.mrb[30].mxu0 }
 0x8d0   : > { %v6370_v59 = vpop.f32.mrb[31].mxu0  ;;  %v1928_v60 = vadd.f32 %v5392_v56, %v1927_v58  ;;  %v6884_v56 = vld [vmem:[%s8503_s5 + $0xd0] sm:$0xff]   ;;  %v6886_v58 = vld [vmem:[%s8503_s5 + $0xe0] sm:$0xff]  }
 0x8d1   : > { %v6887_v59 = vld [vmem:[%s8503_s5 + $0xe8] sm:$0xff]  }
 0x8d2   : > { %v2005_v61 = vpack.c.bf16 %v1928_v60, %v1925_v57  ;;  %v6885_v57 = vld [vmem:[%s8503_s5 + $0xd8] sm:$0xff]   ;;  %v6888_v60 = vld [vmem:[%s8503_s5 + $0xf0] sm:$0xff]  }
 0x8d3   : > { %v1973_v36 = vpop.f32.mrb[28].mxu1 }
 0x8d4   : > { %v1980_v37 = vmul.f32 0.25, %v1973_v36  ;;  %v6375_v38 = vpop.f32.mrb[29].mxu1  ;;  %v2010_v62 = vand.u32 %v2005_v61, %v7366_v11  ;;  %v6889_v61 = vld [vmem:[%s8503_s5 + $0xf8] sm:$0xff]  }
 0x8d5   : > { %v1976_v39 = vpop.f32.mrb[30].mxu1 }
 0x8d6   : > { %v1981_v40 = vmul.f32 0.25, %v1976_v39  ;;  %v6376_v41 = vpop.f32.mrb[31].mxu1  ;;  %v1982_v42 = vsel %vm941_vm2, %v1980_v37, -inf  ;;  %6378 = vmatpush3.bf16.msra.mxu1 %v2010_v62 }
 0x8d7   : > { %1983 = vmax.xlane.f32.xlu0 %v1982_v42  ;;  %6383 = vmatprep.subr.bf16.mxu1 %v7113_v1 }
 0x8d8   : > { %v1985_v43 = vsel %vm945_vm3, %v1981_v40, -inf }
 0x8d9   : > { %1986 = vmax.xlane.f32.xlu1 %v1985_v43 }
 0x8ed   : > { %v2330_v34 = vpop.f32.mrb[32].mxu0 }
 0x8ee   : > { %v2331_v35 = vadd.f32 %v5450_v33, %v2330_v34  ;;  %v6427_v36 = vpop.f32.mrb[33].mxu0 }
 0x964   : > { %v1984_v46 = vpop.xlane.xlu0 %1983 }
 0x965   : > { %v1988_v47 = vsub.f32 %v1980_v37, %v1984_v46  ;;  %v2333_v37 = vpop.f32.mrb[34].mxu0 }
 0x966   : > { %v1987_v48 = vpop.xlane.xlu1 %1986  ;;  %v2334_v38 = vadd.f32 %v5450_v33, %v2333_v37  ;;  %v6428_v39 = vpop.f32.mrb[35].mxu0 }
 0x967   : > { %v1990_v49 = vmul.f32 1.442695, %v1988_v47  ;;  %v1989_v50 = vsub.f32 %v1981_v40, %v1987_v48  ;;  %v5424_v48 = vld [vmem:[%s8500_s2 + $0x3] ss:$0 sm:$0xff] }
 0x968   : > { %v2452_v40 = vpack.c.bf16 %v2334_v38, %v2331_v35  ;;  %v6891_v38 = vld [vmem:[%s8505_s7 + $0x18] sm:$0xff]  }
 0x969   : > { %7047 = vpow2.f32 %v1990_v49  ;;  %v1992_v51 = vmul.f32 1.442695, %v1989_v50 }
 0x96a   : > { %v2457_v41 = vsel %vm891_vm1, %v2452_v40, 0  ;;  %v6893_v40 = vld [vmem:[%s8501_s3 + $0x110] sm:$0xff]  }
 0x96b   : > { %7049 = vpow2.f32 %v1992_v51  ;;  %6450 = vmatpush3.bf16.xpose.msra.mxu0 %v2457_v41  ;;  %v6895_v41 = vld [vmem:[%s8501_s3 + $0x118] sm:$0xff]  }
 0x96c   : > { %6455 = vmatprep.subr.bf16.mxu0 %v7113_v1 }
 0x973   : > { %v7048_v52 = vpop.eup %7047 }
 0x974   : > { %v1994_v53 = vsel %vm941_vm2, %v7048_v52, 0.0 }
 0x975   : > { %v7050_v54 = vpop.eup %7049  ;;  %1995 = vadd.xlane.f32.xlu0 %v1994_v53 }
 0x976   : > { %v1997_v55 = vsel %vm945_vm3, %v7050_v54, 0.0 }
 0x977   : > { %1998 = vadd.xlane.f32.xlu1 %v1997_v55 }
 0xa02   : > { %v1996_v2 = vpop.xlane.xlu0 %1995 }
 0xa03   : > { %7051 = vrcp.f32 %v1996_v2 }
 0xa04   : > { %v1999_v3 = vpop.xlane.xlu1 %1998 }
 0xa05   : > { %7053 = vrcp.f32 %v1999_v3 }
 0xa0d   : > { %v7052_v4 = vpop.eup %7051 }
 0xa0e   : > { %v2002_v6 = vmul.f32 %v7052_v4, %v7048_v52 }
 0xa0f   : > { %v7054_v5 = vpop.eup %7053 }
 0xa10   : > { %v2003_v7 = vmul.f32 %v7054_v5, %v7050_v54 }
 0xa12   : > { %v2004_v9 = vpack.c.bf16 %v2003_v7, %v2002_v6 }
 0xa14   : > { %6380 = vmatmul.mubr.msk.bf16.vlgmr.msra.gmra.mrb[32].mxu1 %vm941_vm2, %v2004_v9 }
 0xa15   : > { %6384 = vmatpush3.bf16.msra.mxu1 %v6866_v8  ;;  %6385 = vmatprep.mubr.msk.bf16.mxu1 %vm7114_vm0, %v7113_v1 }
 0xa16   : > { %6389 = vmatprep.subr.bf16.mxu1 %v7113_v1 }
 0xae7   : > { %v2046_v22 = vpop.f32.mrb[32].mxu1 }
 0xae8   : > { %v6381_v23 = vpop.f32.mrb[33].mxu1 }
 0xae9   : > { %v2049_v24 = vpop.f32.mrb[34].mxu1 }
 0xaea   : > { %v2053_v26 = vpack.c.bf16 %v2049_v24, %v2046_v22  ;;  %v6382_v27 = vpop.f32.mrb[35].mxu1 }
 0xaec   : > { %6386 = vmatmul.mubr.msk.bf16.vlgmr.msra.gmra.mrb[36].mxu1 %vm891_vm1, %v2053_v26 }
 0xaed   : > { %6390 = vmatpush3.bf16.msra.mxu1 %v6869_v25  ;;  %6405 = vmatprep.mubr.msk.bf16.mxu1 %vm7114_vm0, %v7113_v1  ;;  %v5476_v25 = vld [vmem:[%s8504_s6 + $0x3] ss:$0 sm:$0xff] }
 0xaee   : > { %6391 = vmatprep.subr.bf16.mxu1 %v7113_v1 }
 0xaf1   : > { %6392 = vmatpush3.bf16.msra.mxu1 %v6871_v28 }
 0xaf2   : > { %6393 = vmatprep.subr.bf16.mxu1 %v7113_v1 }
 0xaf5   : > { %6394 = vmatpush3.bf16.msra.mxu1 %v6873_v29 }
 0xaf6   : > { %6395 = vmatprep.subr.bf16.mxu1 %v7113_v1 }
 0xaf9   : > { %6396 = vmatpush3.bf16.msra.mxu1 %v6875_v14 }
 0xafa   : > { %6397 = vmatprep.subr.bf16.mxu1 %v7113_v1 }
 0xafd   : > { %6398 = vmatpush3.bf16.msra.mxu1 %v6877_v16 }
 0xafe   : > { %6399 = vmatprep.subr.bf16.mxu1 %v7113_v1 }
 0xb01   : > { %6400 = vmatpush3.bf16.msra.mxu1 %v6879_v30  ;;  %v6890_v30 = vld [vmem:[%s8501_s3 + $0x100] sm:$0xff]  }
 0xb02   : > { %6401 = vmatprep.subr.bf16.mxu1 %v7113_v1 }
 0xb05   : > { %6402 = vmatpush3.bf16.msra.mxu1 %v6880_v31  ;;  %v6892_v31 = vld [vmem:[%s8501_s3 + $0x108] sm:$0xff]  }
 0xb06   : > { %6403 = vmatprep.subr.bf16.mxu1 %v7113_v1 }
 0xb09   : > { %6404 = vmatpush3.bf16.msra.mxu1 %v6881_v32 }
 0xb0a   : > { %6429 = vmatprep.subr.bf16.mxu1 %v7113_v1 }
 0xb0c   : > { %6406 = vmatmul.mubr.bf16.vlgmr.msra.gmra.mrb[40].mxu1 %v7298_v19 }
 0xb0d   : > { %6445 = vmatprep.mubr.msk.bf16.mxu1 %vm7114_vm0, %v7113_v1 }
 0xbbf   : > { %v2100_v42 = vpop.f32.mrb[36].mxu1 }
 0xbc0   : > { %v7732_v43 = vadd.f32 %v2100_v42, %v7591_v15  ;;  %v6387_v44 = vpop.f32.mrb[37].mxu1  ;;  %v6882_v15 = vld [vmem:[%s8503_s5 + $0xc0] sm:$0xff]  }
 0xbc1   : > { %v2103_v45 = vpop.f32.mrb[38].mxu1  ;;  %6430 = vmatpush3.bf16.msra.mxu1 %v6882_v15  ;;  %v6897_v42 = vld [vmem:[%s8501_s3 + $0x120] sm:$0xff]   ;;  %v6899_v44 = vld [vmem:[%s8501_s3 + $0x128] sm:$0xff]   ;;  %v6900_v15 = vld [vmem:[%s8519_s18 + $0x118] sm:$0xff]  }
 0xbc2   : > { %v7735_v46 = vadd.f32 %v2103_v45, %v7594_v20  ;;  %v6388_v47 = vpop.f32.mrb[39].mxu1  ;;  %v6883_v20 = vld [vmem:[%s8503_s5 + $0xc8] sm:$0xff]   ;;  %6431 = vmatprep.subr.bf16.mxu1 %v7113_v1  ;;  %v6901_v45 = vld [vmem:[%s8501_s3 + $0x130] sm:$0xff]  }
 0xbc3   : > { %v6903_v47 = vld [vmem:[%s8501_s3 + $0x138] sm:$0xff]  }
 0xbc5   : > { %6432 = vmatpush3.bf16.msra.mxu1 %v6883_v20  ;;  %v6902_v20 = vld [vmem:[%s8519_s18 + $0x120] sm:$0xff]  }
 0xbc6   : > { %6433 = vmatprep.subr.bf16.mxu1 %v7113_v1 }
 0xbc9   : > { %6434 = vmatpush3.bf16.msra.mxu1 %v6884_v56  ;;  %v6904_v56 = vld [vmem:[%s8519_s18 + $0x128] sm:$0xff]  }
 0xbca   : > { %6435 = vmatprep.subr.bf16.mxu1 %v7113_v1 }
 0xbcd   : > { %6436 = vmatpush3.bf16.msra.mxu1 %v6885_v57  ;;  %v6905_v57 = vld [vmem:[%s8519_s18 + $0x130] sm:$0xff]  }
 0xbce   : > { %6437 = vmatprep.subr.bf16.mxu1 %v7113_v1 }
 0xbd1   : > { %6438 = vmatpush3.bf16.msra.mxu1 %v6886_v58  ;;  %v6906_v58 = vld [vmem:[%s8519_s18 + $0x138] sm:$0xff]  }
 0xbd2   : > { %6439 = vmatprep.subr.bf16.mxu1 %v7113_v1 }
 0xbd5   : > { %6440 = vmatpush3.bf16.msra.mxu1 %v6887_v59  ;;  %v5534_v59 = vld [vmem:[%s8502_s4 + $0x4] ss:$0 sm:$0xff] }
 0xbd6   : > { %6441 = vmatprep.subr.bf16.mxu1 %v7113_v1 }
 0xbd9   : > { %6442 = vmatpush3.bf16.msra.mxu1 %v6888_v60 }
 0xbda   : > { %6443 = vmatprep.subr.bf16.mxu1 %v7113_v1 }
 0xbdd   : > { %6444 = vmatpush3.bf16.msra.mxu1 %v6889_v61 }
 0xbde   : > { %6487 = vmatprep.subr.bf16.mxu1 %v7113_v1 }
 0xbdf   : > { %v2216_v49 = vpop.f32.mrb[40].mxu1 }
 0xbe0   : > { %v6407_v50 = vpop.f32.mrb[41].mxu1  ;;  %v2217_v52 = vadd.f32 %v5424_v48, %v2216_v49  ;;  %6446 = vmatmul.mubr.bf16.vlgmr.msra.gmra.mrb[44].mxu1 %v7298_v19 }
 0xbe1   : > { %v2219_v51 = vpop.f32.mrb[42].mxu1  ;;  %6503 = vmatprep.mubr.msk.bf16.mxu1 %vm7114_vm0, %v7113_v1  ;;  %6488 = vmatpush3.bf16.msra.mxu1 %v6890_v30 }
 0xbe2   : > { %v2220_v53 = vadd.f32 %v5424_v48, %v2219_v51  ;;  %v6408_v54 = vpop.f32.mrb[43].mxu1  ;;  %6489 = vmatprep.subr.bf16.mxu1 %v7113_v1  ;;  %v6894_v51 = vld [vmem:[%s8519_s18 + $0x100] sm:$0xff]  }
 0xbe3   : > { %v6896_v54 = vld [vmem:[%s8519_s18 + $0x108] sm:$0xff]  }
 0xbe4   : > { %v2451_v55 = vpack.c.bf16 %v2220_v53, %v2217_v52 }
 0xbe5   : > { %6490 = vmatpush3.bf16.msra.mxu1 %v6892_v31 }
 0xbe6   : > { %6452 = vmatmul.mubr.msk.bf16.vlgmr.msra.gmra.mrb[36].mxu0 %vm891_vm1, %v2451_v55  ;;  %6491 = vmatprep.subr.bf16.mxu1 %v7113_v1  ;;  %v6898_v55 = vld [vmem:[%s8519_s18 + $0x110] sm:$0xff]  }
 0xbe7   : > { %6457 = vmatprep.mubr.msk.bf16.mxu0 %vm7114_vm0, %v7113_v1 }
 0xbe9   : > { %6492 = vmatpush3.bf16.msra.mxu1 %v6893_v40 }
 0xbea   : > { %6493 = vmatprep.subr.bf16.mxu1 %v7113_v1 }
 0xbed   : > { %6494 = vmatpush3.bf16.msra.mxu1 %v6895_v41 }
 0xbee   : > { %6495 = vmatprep.subr.bf16.mxu1 %v7113_v1 }
 0xbf1   : > { %6496 = vmatpush3.bf16.msra.mxu1 %v6897_v42 }
 0xbf2   : > { %6497 = vmatprep.subr.bf16.mxu1 %v7113_v1 }
 0xbf5   : > { %6498 = vmatpush3.bf16.msra.mxu1 %v6899_v44 }
 0xbf6   : > { %6499 = vmatprep.subr.bf16.mxu1 %v7113_v1 }
 0xbf9   : > { %6500 = vmatpush3.bf16.msra.mxu1 %v6901_v45 }
 0xbfa   : > { %6501 = vmatprep.subr.bf16.mxu1 %v7113_v1 }
 0xbfd   : > { %6502 = vmatpush3.bf16.msra.mxu1 %v6903_v47 }
 0xbfe   : > { %6527 = vmatprep.subr.bf16.mxu1 %v7113_v1 }
 0xc00   : > { %6504 = vmatmul.mubr.bf16.vlgmr.msra.gmra.mrb[48].mxu1 %v7298_v19 }
 0xc01   : > { %6529 = vmatprep.mubr.msk.bf16.mxu1 %vm7114_vm0, %v7113_v1 }
 0xcb3   : > { %v2444_v7 = vpop.f32.mrb[44].mxu1 }
 0xcb4   : > { %v6447_v8 = vpop.f32.mrb[45].mxu1  ;;  %v2445_v26 = vadd.f32 %v5476_v25, %v2444_v7 }
 0xcb5   : > { %v2447_v27 = vpop.f32.mrb[46].mxu1 }
 0xcb6   : > { %v6448_v28 = vpop.f32.mrb[47].mxu1  ;;  %v2448_v29 = vadd.f32 %v5476_v25, %v2447_v27  ;;  %v6909_v25 = vld [vmem:[%s8503_s5 + $0x110] sm:$0xff]   ;;  %v6911_v27 = vld [vmem:[%s8503_s5 + $0x120] sm:$0xff]  }
 0xcb7   : > { %v6912_v28 = vld [vmem:[%s8503_s5 + $0x128] sm:$0xff]  }
 0xcb8   : > { %v2525_v14 = vpack.c.bf16 %v2448_v29, %v2445_v26  ;;  %v6910_v26 = vld [vmem:[%s8503_s5 + $0x118] sm:$0xff]   ;;  %v6913_v29 = vld [vmem:[%s8503_s5 + $0x130] sm:$0xff]  }
 0xcb9   : > { %v2493_v62 = vpop.f32.mrb[36].mxu0 }
 0xcba   : > { %v2500_v63 = vmul.f32 0.25, %v2493_v62  ;;  %v6453_v0 = vpop.f32.mrb[37].mxu0  ;;  %v2530_v16 = vand.u32 %v2525_v14, %v7366_v11  ;;  %v6914_v14 = vld [vmem:[%s8503_s5 + $0x138] sm:$0xff]  }
 0xcbb   : > { %v2496_v2 = vpop.f32.mrb[38].mxu0 }
 0xcbc   : > { %v2501_v3 = vmul.f32 0.25, %v2496_v2  ;;  %v6454_v4 = vpop.f32.mrb[39].mxu0  ;;  %v2502_v5 = vsel %vm941_vm2, %v2500_v63, -inf  ;;  %6456 = vmatpush3.bf16.msra.mxu0 %v2530_v16 }
 0xcbd   : > { %2503 = vmax.xlane.f32.xlu0 %v2502_v5  ;;  %6461 = vmatprep.subr.bf16.mxu0 %v7113_v1 }
 0xcbe   : > { %v2505_v6 = vsel %vm945_vm3, %v2501_v3, -inf }
 0xcbf   : > { %2506 = vmax.xlane.f32.xlu1 %v2505_v6 }
 0xcd3   : > { %v2850_v60 = vpop.f32.mrb[48].mxu1 }
 0xcd4   : > { %v2851_v61 = vadd.f32 %v5534_v59, %v2850_v60  ;;  %v6505_v62 = vpop.f32.mrb[49].mxu1 }
 0xd4a   : > { %v2504_v9 = vpop.xlane.xlu0 %2503 }
 0xd4b   : > { %v2508_v10 = vsub.f32 %v2500_v63, %v2504_v9  ;;  %v2853_v63 = vpop.f32.mrb[50].mxu1 }
 0xd4c   : > { %v2507_v12 = vpop.xlane.xlu1 %2506  ;;  %v2854_v0 = vadd.f32 %v5534_v59, %v2853_v63  ;;  %v6506_v2 = vpop.f32.mrb[51].mxu1 }
 0xd4d   : > { %v2510_v13 = vmul.f32 1.442695, %v2508_v10  ;;  %v2509_v17 = vsub.f32 %v2501_v3, %v2507_v12  ;;  %v5508_v12 = vld [vmem:[%s8500_s2 + $0x4] ss:$0 sm:$0xff] }
 0xd4e   : > { %v2972_v3 = vpack.c.bf16 %v2854_v0, %v2851_v61  ;;  %v6916_v0 = vld [vmem:[%s8505_s7 + $0x20] sm:$0xff]  }
 0xd4f   : > { %7055 = vpow2.f32 %v2510_v13  ;;  %v2512_v18 = vmul.f32 1.442695, %v2509_v17 }
 0xd50   : > { %v2977_v4 = vsel %vm891_vm1, %v2972_v3, 0  ;;  %v6918_v3 = vld [vmem:[%s8501_s3 + $0x150] sm:$0xff]  }
 0xd51   : > { %7057 = vpow2.f32 %v2512_v18  ;;  %6528 = vmatpush3.bf16.xpose.msra.mxu1 %v2977_v4  ;;  %v6920_v4 = vld [vmem:[%s8501_s3 + $0x158] sm:$0xff]  }
 0xd52   : > { %6533 = vmatprep.subr.bf16.mxu1 %v7113_v1 }
 0xd59   : > { %v7056_v21 = vpop.eup %7055 }
 0xd5a   : > { %v2514_v22 = vsel %vm941_vm2, %v7056_v21, 0.0 }
 0xd5b   : > { %v7058_v23 = vpop.eup %7057  ;;  %2515 = vadd.xlane.f32.xlu0 %v2514_v22 }
 0xd5c   : > { %v2517_v24 = vsel %vm945_vm3, %v7058_v23, 0.0 }
 0xd5d   : > { %2518 = vadd.xlane.f32.xlu1 %v2517_v24 }
 0xde8   : > { %v2516_v32 = vpop.xlane.xlu0 %2515 }
 0xde9   : > { %7059 = vrcp.f32 %v2516_v32 }
 0xdea   : > { %v2519_v33 = vpop.xlane.xlu1 %2518 }
 0xdeb   : > { %7061 = vrcp.f32 %v2519_v33 }
 0xdf3   : > { %v7060_v34 = vpop.eup %7059 }
 0xdf4   : > { %v2522_v36 = vmul.f32 %v7060_v34, %v7056_v21 }
 0xdf5   : > { %v7062_v35 = vpop.eup %7061 }
 0xdf6   : > { %v2523_v37 = vmul.f32 %v7062_v35, %v7058_v23 }
 0xdf8   : > { %v2524_v39 = vpack.c.bf16 %v2523_v37, %v2522_v36 }
 0xdfa   : > { %6458 = vmatmul.mubr.msk.bf16.vlgmr.msra.gmra.mrb[40].mxu0 %vm941_vm2, %v2524_v39 }
 0xdfb   : > { %6462 = vmatpush3.bf16.msra.mxu0 %v6891_v38  ;;  %6463 = vmatprep.mubr.msk.bf16.mxu0 %vm7114_vm0, %v7113_v1 }
 0xdfc   : > { %6467 = vmatprep.subr.bf16.mxu0 %v7113_v1 }
 0xecd   : > { %v2566_v48 = vpop.f32.mrb[40].mxu0 }
 0xece   : > { %v6459_v49 = vpop.f32.mrb[41].mxu0 }
 0xecf   : > { %v2569_v50 = vpop.f32.mrb[42].mxu0 }
 0xed0   : > { %v2573_v52 = vpack.c.bf16 %v2569_v50, %v2566_v48  ;;  %v6460_v53 = vpop.f32.mrb[43].mxu0 }
 0xed2   : > { %6464 = vmatmul.mubr.msk.bf16.vlgmr.msra.gmra.mrb[44].mxu0 %vm891_vm1, %v2573_v52 }
 0xed3   : > { %6468 = vmatpush3.bf16.msra.mxu0 %v6894_v51  ;;  %6483 = vmatprep.mubr.msk.bf16.mxu0 %vm7114_vm0, %v7113_v1  ;;  %v5560_v51 = vld [vmem:[%s8504_s6 + $0x4] ss:$0 sm:$0xff] }
 0xed4   : > { %6469 = vmatprep.subr.bf16.mxu0 %v7113_v1 }
 0xed7   : > { %6470 = vmatpush3.bf16.msra.mxu0 %v6896_v54 }
 0xed8   : > { %6471 = vmatprep.subr.bf16.mxu0 %v7113_v1 }
 0xedb   : > { %6472 = vmatpush3.bf16.msra.mxu0 %v6898_v55 }
 0xedc   : > { %6473 = vmatprep.subr.bf16.mxu0 %v7113_v1 }
 0xedf   : > { %6474 = vmatpush3.bf16.msra.mxu0 %v6900_v15 }
 0xee0   : > { %6475 = vmatprep.subr.bf16.mxu0 %v7113_v1 }
 0xee3   : > { %6476 = vmatpush3.bf16.msra.mxu0 %v6902_v20 }
 0xee4   : > { %6477 = vmatprep.subr.bf16.mxu0 %v7113_v1 }
 0xee7   : > { %6478 = vmatpush3.bf16.msra.mxu0 %v6904_v56  ;;  %v6915_v56 = vld [vmem:[%s8501_s3 + $0x140] sm:$0xff]  }
 0xee8   : > { %6479 = vmatprep.subr.bf16.mxu0 %v7113_v1 }
 0xeeb   : > { %6480 = vmatpush3.bf16.msra.mxu0 %v6905_v57  ;;  %v6917_v57 = vld [vmem:[%s8501_s3 + $0x148] sm:$0xff]  }
 0xeec   : > { %6481 = vmatprep.subr.bf16.mxu0 %v7113_v1 }
 0xeef   : > { %6482 = vmatpush3.bf16.msra.mxu0 %v6906_v58 }
 0xef0   : > { %6507 = vmatprep.subr.bf16.mxu0 %v7113_v1 }
 0xef2   : > { %6484 = vmatmul.mubr.bf16.vlgmr.msra.gmra.mrb[48].mxu0 %v7298_v19 }
 0xef3   : > { %6523 = vmatprep.mubr.msk.bf16.mxu0 %vm7114_vm0, %v7113_v1 }
 0xfa5   : > { %v2620_v5 = vpop.f32.mrb[44].mxu0 }
 0xfa6   : > { %v7873_v6 = vadd.f32 %v2620_v5, %v7732_v43  ;;  %v6465_v7 = vpop.f32.mrb[45].mxu0  ;;  %v6907_v43 = vld [vmem:[%s8503_s5 + $0x100] sm:$0xff]  }
 0xfa7   : > { %v2623_v8 = vpop.f32.mrb[46].mxu0  ;;  %6508 = vmatpush3.bf16.msra.mxu0 %v6907_v43  ;;  %v6922_v5 = vld [vmem:[%s8501_s3 + $0x160] sm:$0xff]   ;;  %v6924_v7 = vld [vmem:[%s8501_s3 + $0x168] sm:$0xff]   ;;  %v6925_v43 = vld [vmem:[%s8519_s18 + $0x158] sm:$0xff]  }
 0xfa8   : > { %v7876_v9 = vadd.f32 %v2623_v8, %v7735_v46  ;;  %v6466_v10 = vpop.f32.mrb[47].mxu0  ;;  %v6908_v46 = vld [vmem:[%s8503_s5 + $0x108] sm:$0xff]   ;;  %6509 = vmatprep.subr.bf16.mxu0 %v7113_v1  ;;  %v6926_v8 = vld [vmem:[%s8501_s3 + $0x170] sm:$0xff]  }
 0xfa9   : > { %v6928_v10 = vld [vmem:[%s8501_s3 + $0x178] sm:$0xff]  }
 0xfab   : > { %6510 = vmatpush3.bf16.msra.mxu0 %v6908_v46  ;;  %v6927_v46 = vld [vmem:[%s8519_s18 + $0x160] sm:$0xff]  }
 0xfac   : > { %6511 = vmatprep.subr.bf16.mxu0 %v7113_v1 }
 0xfaf   : > { %6512 = vmatpush3.bf16.msra.mxu0 %v6909_v25  ;;  %v6929_v25 = vld [vmem:[%s8519_s18 + $0x168] sm:$0xff]  }
 0xfb0   : > { %6513 = vmatprep.subr.bf16.mxu0 %v7113_v1 }
 0xfb3   : > { %6514 = vmatpush3.bf16.msra.mxu0 %v6910_v26  ;;  %v6930_v26 = vld [vmem:[%s8519_s18 + $0x170] sm:$0xff]  }
 0xfb4   : > { %6515 = vmatprep.subr.bf16.mxu0 %v7113_v1 }
 0xfb7   : > { %6516 = vmatpush3.bf16.msra.mxu0 %v6911_v27  ;;  %v6931_v27 = vld [vmem:[%s8519_s18 + $0x178] sm:$0xff]  }
 0xfb8   : > { %6517 = vmatprep.subr.bf16.mxu0 %v7113_v1 }
 0xfbb   : > { %6518 = vmatpush3.bf16.msra.mxu0 %v6912_v28  ;;  %v5618_v28 = vld [vmem:[%s8502_s4 + $0x5] ss:$0 sm:$0xff] }
 0xfbc   : > { %6519 = vmatprep.subr.bf16.mxu0 %v7113_v1 }
 0xfbf   : > { %6520 = vmatpush3.bf16.msra.mxu0 %v6913_v29 }
 0xfc0   : > { %6521 = vmatprep.subr.bf16.mxu0 %v7113_v1 }
 0xfc3   : > { %6522 = vmatpush3.bf16.msra.mxu0 %v6914_v14 }
 0xfc4   : > { %6565 = vmatprep.subr.bf16.mxu0 %v7113_v1 }
 0xfc5   : > { %v2736_v13 = vpop.f32.mrb[48].mxu0 }
 0xfc6   : > { %v6485_v17 = vpop.f32.mrb[49].mxu0  ;;  %v2737_v21 = vadd.f32 %v5508_v12, %v2736_v13  ;;  %6524 = vmatmul.mubr.bf16.vlgmr.msra.gmra.mrb[52].mxu0 %v7298_v19 }
 0xfc7   : > { %v2739_v18 = vpop.f32.mrb[50].mxu0  ;;  %6581 = vmatprep.mubr.msk.bf16.mxu0 %vm7114_vm0, %v7113_v1  ;;  %6566 = vmatpush3.bf16.msra.mxu0 %v6915_v56 }
 0xfc8   : > { %v2740_v22 = vadd.f32 %v5508_v12, %v2739_v18  ;;  %v6486_v23 = vpop.f32.mrb[51].mxu0  ;;  %6567 = vmatprep.subr.bf16.mxu0 %v7113_v1  ;;  %v6919_v18 = vld [vmem:[%s8519_s18 + $0x140] sm:$0xff]  }
 0xfc9   : > { %v6921_v23 = vld [vmem:[%s8519_s18 + $0x148] sm:$0xff]  }
 0xfca   : > { %v2971_v24 = vpack.c.bf16 %v2740_v22, %v2737_v21 }
 0xfcb   : > { %6568 = vmatpush3.bf16.msra.mxu0 %v6917_v57 }
 0xfcc   : > { %6530 = vmatmul.mubr.msk.bf16.vlgmr.msra.gmra.mrb[52].mxu1 %vm891_vm1, %v2971_v24  ;;  %6569 = vmatprep.subr.bf16.mxu0 %v7113_v1  ;;  %v6923_v24 = vld [vmem:[%s8519_s18 + $0x150] sm:$0xff]  }
 0xfcd   : > { %6535 = vmatprep.mubr.msk.bf16.mxu1 %vm7114_vm0, %v7113_v1 }
 0xfcf   : > { %6570 = vmatpush3.bf16.msra.mxu0 %v6918_v3 }
 0xfd0   : > { %6571 = vmatprep.subr.bf16.mxu0 %v7113_v1 }
 0xfd3   : > { %6572 = vmatpush3.bf16.msra.mxu0 %v6920_v4 }
 0xfd4   : > { %6573 = vmatprep.subr.bf16.mxu0 %v7113_v1 }
 0xfd7   : > { %6574 = vmatpush3.bf16.msra.mxu0 %v6922_v5 }
 0xfd8   : > { %6575 = vmatprep.subr.bf16.mxu0 %v7113_v1 }
 0xfdb   : > { %6576 = vmatpush3.bf16.msra.mxu0 %v6924_v7 }
 0xfdc   : > { %6577 = vmatprep.subr.bf16.mxu0 %v7113_v1 }
 0xfdf   : > { %6578 = vmatpush3.bf16.msra.mxu0 %v6926_v8 }
 0xfe0   : > { %6579 = vmatprep.subr.bf16.mxu0 %v7113_v1 }
 0xfe3   : > { %6580 = vmatpush3.bf16.msra.mxu0 %v6928_v10 }
 0xfe4   : > { %6605 = vmatprep.subr.bf16.mxu0 %v7113_v1 }
 0xfe6   : > { %6582 = vmatmul.mubr.bf16.vlgmr.msra.gmra.mrb[56].mxu0 %v7298_v19 }
 0xfe7   : > { %6607 = vmatprep.mubr.msk.bf16.mxu0 %vm7114_vm0, %v7113_v1 }
0x1099   : > { %v2964_v37 = vpop.f32.mrb[52].mxu0 }
0x109a   : > { %v6525_v38 = vpop.f32.mrb[53].mxu0  ;;  %v2965_v52 = vadd.f32 %v5560_v51, %v2964_v37 }
0x109b   : > { %v2967_v53 = vpop.f32.mrb[54].mxu0 }
0x109c   : > { %v6526_v54 = vpop.f32.mrb[55].mxu0  ;;  %v2968_v55 = vadd.f32 %v5560_v51, %v2967_v53  ;;  %v6934_v51 = vld [vmem:[%s8503_s5 + $0x150] sm:$0xff]   ;;  %v6936_v53 = vld [vmem:[%s8503_s5 + $0x160] sm:$0xff]  }
0x109d   : > { %v6937_v54 = vld [vmem:[%s8503_s5 + $0x168] sm:$0xff]  }
0x109e   : > { %v3045_v15 = vpack.c.bf16 %v2968_v55, %v2965_v52  ;;  %v6935_v52 = vld [vmem:[%s8503_s5 + $0x158] sm:$0xff]   ;;  %v6938_v55 = vld [vmem:[%s8503_s5 + $0x170] sm:$0xff]  }
0x109f   : > { %v3013_v16 = vpop.f32.mrb[52].mxu1 }
0x10a0   : > { %v3020_v30 = vmul.f32 0.25, %v3013_v16  ;;  %v6531_v31 = vpop.f32.mrb[53].mxu1  ;;  %v3050_v20 = vand.u32 %v3045_v15, %v7366_v11  ;;  %v6939_v15 = vld [vmem:[%s8503_s5 + $0x178] sm:$0xff]  }
0x10a1   : > { %v3016_v32 = vpop.f32.mrb[54].mxu1 }
0x10a2   : > { %v3021_v33 = vmul.f32 0.25, %v3016_v32  ;;  %v6532_v34 = vpop.f32.mrb[55].mxu1  ;;  %v3022_v35 = vsel %vm941_vm2, %v3020_v30, -inf  ;;  %6534 = vmatpush3.bf16.msra.mxu1 %v3050_v20 }
0x10a3   : > { %3023 = vmax.xlane.f32.xlu0 %v3022_v35  ;;  %6539 = vmatprep.subr.bf16.mxu1 %v7113_v1 }
0x10a4   : > { %v3025_v36 = vsel %vm945_vm3, %v3021_v33, -inf }
0x10a5   : > { %3026 = vmax.xlane.f32.xlu1 %v3025_v36 }
0x10b9   : > { %v3370_v29 = vpop.f32.mrb[56].mxu0 }
0x10ba   : > { %v3371_v14 = vadd.f32 %v5618_v28, %v3370_v29  ;;  %v6583_v16 = vpop.f32.mrb[57].mxu0 }
0x1130   : > { %v3024_v39 = vpop.xlane.xlu0 %3023 }
0x1131   : > { %v3028_v40 = vsub.f32 %v3020_v30, %v3024_v39  ;;  %v3373_v30 = vpop.f32.mrb[58].mxu0 }
0x1132   : > { %v3027_v41 = vpop.xlane.xlu1 %3026  ;;  %v3374_v31 = vadd.f32 %v5618_v28, %v3373_v30  ;;  %v6584_v32 = vpop.f32.mrb[59].mxu0 }
0x1133   : > { %v3030_v42 = vmul.f32 1.442695, %v3028_v40  ;;  %v3029_v44 = vsub.f32 %v3021_v33, %v3027_v41  ;;  %v5592_v41 = vld [vmem:[%s8500_s2 + $0x5] ss:$0 sm:$0xff] }
0x1134   : > { %v3492_v33 = vpack.c.bf16 %v3374_v31, %v3371_v14  ;;  %v6941_v31 = vld [vmem:[%s8505_s7 + $0x28] sm:$0xff]  }
0x1135   : > { %7063 = vpow2.f32 %v3030_v42  ;;  %v3032_v45 = vmul.f32 1.442695, %v3029_v44 }
0x1136   : > { %v3497_v34 = vsel %vm891_vm1, %v3492_v33, 0  ;;  %v6943_v33 = vld [vmem:[%s8501_s3 + $0x190] sm:$0xff]  }
0x1137   : > { %7065 = vpow2.f32 %v3032_v45  ;;  %6606 = vmatpush3.bf16.xpose.msra.mxu0 %v3497_v34  ;;  %v6945_v34 = vld [vmem:[%s8501_s3 + $0x198] sm:$0xff]  }
0x1138   : > { %6611 = vmatprep.subr.bf16.mxu0 %v7113_v1 }
0x113f   : > { %v7064_v47 = vpop.eup %7063 }
0x1140   : > { %v3034_v48 = vsel %vm941_vm2, %v7064_v47, 0.0 }
0x1141   : > { %v7066_v49 = vpop.eup %7065  ;;  %3035 = vadd.xlane.f32.xlu0 %v3034_v48 }
0x1142   : > { %v3037_v50 = vsel %vm945_vm3, %v7066_v49, 0.0 }
0x1143   : > { %3038 = vadd.xlane.f32.xlu1 %v3037_v50 }
0x11ce   : > { %v3036_v58 = vpop.xlane.xlu0 %3035 }
0x11cf   : > { %7067 = vrcp.f32 %v3036_v58 }
0x11d0   : > { %v3039_v59 = vpop.xlane.xlu1 %3038 }
0x11d1   : > { %7069 = vrcp.f32 %v3039_v59 }
0x11d9   : > { %v7068_v60 = vpop.eup %7067 }
0x11da   : > { %v3042_v62 = vmul.f32 %v7068_v60, %v7064_v47 }
0x11db   : > { %v7070_v61 = vpop.eup %7069 }
0x11dc   : > { %v3043_v63 = vmul.f32 %v7070_v61, %v7066_v49 }
0x11de   : > { %v3044_v2 = vpack.c.bf16 %v3043_v63, %v3042_v62 }
0x11e0   : > { %6536 = vmatmul.mubr.msk.bf16.vlgmr.msra.gmra.mrb[56].mxu1 %vm941_vm2, %v3044_v2 }
0x11e1   : > { %6540 = vmatpush3.bf16.msra.mxu1 %v6916_v0  ;;  %6541 = vmatprep.mubr.msk.bf16.mxu1 %vm7114_vm0, %v7113_v1 }
0x11e2   : > { %6545 = vmatprep.subr.bf16.mxu1 %v7113_v1 }
0x12b3   : > { %v3086_v12 = vpop.f32.mrb[56].mxu1 }
0x12b4   : > { %v6537_v13 = vpop.f32.mrb[57].mxu1 }
0x12b5   : > { %v3089_v17 = vpop.f32.mrb[58].mxu1 }
0x12b6   : > { %v3093_v21 = vpack.c.bf16 %v3089_v17, %v3086_v12  ;;  %v6538_v22 = vpop.f32.mrb[59].mxu1 }
0x12b8   : > { %6542 = vmatmul.mubr.msk.bf16.vlgmr.msra.gmra.mrb[60].mxu1 %vm891_vm1, %v3093_v21 }
0x12b9   : > { %6546 = vmatpush3.bf16.msra.mxu1 %v6919_v18  ;;  %6561 = vmatprep.mubr.msk.bf16.mxu1 %vm7114_vm0, %v7113_v1  ;;  %v5644_v18 = vld [vmem:[%s8504_s6 + $0x5] ss:$0 sm:$0xff] }
0x12ba   : > { %6547 = vmatprep.subr.bf16.mxu1 %v7113_v1 }
0x12bd   : > { %6548 = vmatpush3.bf16.msra.mxu1 %v6921_v23 }
0x12be   : > { %6549 = vmatprep.subr.bf16.mxu1 %v7113_v1 }
0x12c1   : > { %6550 = vmatpush3.bf16.msra.mxu1 %v6923_v24 }
0x12c2   : > { %6551 = vmatprep.subr.bf16.mxu1 %v7113_v1 }
0x12c5   : > { %6552 = vmatpush3.bf16.msra.mxu1 %v6925_v43 }
0x12c6   : > { %6553 = vmatprep.subr.bf16.mxu1 %v7113_v1 }
0x12c9   : > { %6554 = vmatpush3.bf16.msra.mxu1 %v6927_v46 }
0x12ca   : > { %6555 = vmatprep.subr.bf16.mxu1 %v7113_v1 }
0x12cd   : > { %6556 = vmatpush3.bf16.msra.mxu1 %v6929_v25  ;;  %v6940_v25 = vld [vmem:[%s8501_s3 + $0x180] sm:$0xff]  }
0x12ce   : > { %6557 = vmatprep.subr.bf16.mxu1 %v7113_v1 }
0x12d1   : > { %6558 = vmatpush3.bf16.msra.mxu1 %v6930_v26  ;;  %v6942_v26 = vld [vmem:[%s8501_s3 + $0x188] sm:$0xff]  }
0x12d2   : > { %6559 = vmatprep.subr.bf16.mxu1 %v7113_v1 }
0x12d5   : > { %6560 = vmatpush3.bf16.msra.mxu1 %v6931_v27 }
0x12d6   : > { %6585 = vmatprep.subr.bf16.mxu1 %v7113_v1 }
0x12d8   : > { %6562 = vmatmul.mubr.bf16.vlgmr.msra.gmra.mrb[64].mxu1 %v7298_v19 }
0x12d9   : > { %6601 = vmatprep.mubr.msk.bf16.mxu1 %vm7114_vm0, %v7113_v1 }
0x138b   : > { %v3140_v35 = vpop.f32.mrb[60].mxu1 }
0x138c   : > { %v8014_v36 = vadd.f32 %v3140_v35, %v7873_v6  ;;  %v6543_v37 = vpop.f32.mrb[61].mxu1  ;;  %v6932_v6 = vld [vmem:[%s8503_s5 + $0x140] sm:$0xff]  }
0x138d   : > { %v3143_v38 = vpop.f32.mrb[62].mxu1  ;;  %6586 = vmatpush3.bf16.msra.mxu1 %v6932_v6  ;;  %v6947_v35 = vld [vmem:[%s8501_s3 + $0x1a0] sm:$0xff]   ;;  %v6949_v37 = vld [vmem:[%s8501_s3 + $0x1a8] sm:$0xff]   ;;  %v6950_v6 = vld [vmem:[%s8519_s18 + $0x198] sm:$0xff]  }
0x138e   : > { %v8017_v39 = vadd.f32 %v3143_v38, %v7876_v9  ;;  %v6544_v40 = vpop.f32.mrb[63].mxu1  ;;  %v6933_v9 = vld [vmem:[%s8503_s5 + $0x148] sm:$0xff]   ;;  %6587 = vmatprep.subr.bf16.mxu1 %v7113_v1  ;;  %v6951_v38 = vld [vmem:[%s8501_s3 + $0x1b0] sm:$0xff]  }
0x138f   : > { %v6953_v40 = vld [vmem:[%s8501_s3 + $0x1b8] sm:$0xff]  }
0x1391   : > { %6588 = vmatpush3.bf16.msra.mxu1 %v6933_v9  ;;  %v6952_v9 = vld [vmem:[%s8519_s18 + $0x1a0] sm:$0xff]  }
0x1392   : > { %6589 = vmatprep.subr.bf16.mxu1 %v7113_v1 }
0x1395   : > { %6590 = vmatpush3.bf16.msra.mxu1 %v6934_v51  ;;  %v6954_v51 = vld [vmem:[%s8519_s18 + $0x1a8] sm:$0xff]  }
0x1396   : > { %6591 = vmatprep.subr.bf16.mxu1 %v7113_v1 }
0x1399   : > { %6592 = vmatpush3.bf16.msra.mxu1 %v6935_v52  ;;  %v6955_v52 = vld [vmem:[%s8519_s18 + $0x1b0] sm:$0xff]  }
0x139a   : > { %6593 = vmatprep.subr.bf16.mxu1 %v7113_v1 }
0x139d   : > { %6594 = vmatpush3.bf16.msra.mxu1 %v6936_v53  ;;  %v6956_v53 = vld [vmem:[%s8519_s18 + $0x1b8] sm:$0xff]  }
0x139e   : > { %6595 = vmatprep.subr.bf16.mxu1 %v7113_v1 }
0x13a1   : > { %6596 = vmatpush3.bf16.msra.mxu1 %v6937_v54  ;;  %v5702_v54 = vld [vmem:[%s8502_s4 + $0x6] ss:$0 sm:$0xff] }
0x13a2   : > { %6597 = vmatprep.subr.bf16.mxu1 %v7113_v1 }
0x13a5   : > { %6598 = vmatpush3.bf16.msra.mxu1 %v6938_v55 }
0x13a6   : > { %6599 = vmatprep.subr.bf16.mxu1 %v7113_v1 }
0x13a9   : > { %6600 = vmatpush3.bf16.msra.mxu1 %v6939_v15 }
0x13aa   : > { %6643 = vmatprep.subr.bf16.mxu1 %v7113_v1 }
0x13ab   : > { %v3256_v42 = vpop.f32.mrb[64].mxu1 }
0x13ac   : > { %v6563_v44 = vpop.f32.mrb[65].mxu1  ;;  %v3257_v47 = vadd.f32 %v5592_v41, %v3256_v42  ;;  %6602 = vmatmul.mubr.bf16.vlgmr.msra.gmra.mrb[68].mxu1 %v7298_v19 }
0x13ad   : > { %v3259_v45 = vpop.f32.mrb[66].mxu1  ;;  %6659 = vmatprep.mubr.msk.bf16.mxu1 %vm7114_vm0, %v7113_v1  ;;  %6644 = vmatpush3.bf16.msra.mxu1 %v6940_v25 }
0x13ae   : > { %v3260_v48 = vadd.f32 %v5592_v41, %v3259_v45  ;;  %v6564_v49 = vpop.f32.mrb[67].mxu1  ;;  %6645 = vmatprep.subr.bf16.mxu1 %v7113_v1  ;;  %v6944_v45 = vld [vmem:[%s8519_s18 + $0x180] sm:$0xff]  }
0x13af   : > { %v6946_v49 = vld [vmem:[%s8519_s18 + $0x188] sm:$0xff]  }
0x13b0   : > { %v3491_v50 = vpack.c.bf16 %v3260_v48, %v3257_v47 }
0x13b1   : > { %6646 = vmatpush3.bf16.msra.mxu1 %v6942_v26 }
0x13b2   : > { %6608 = vmatmul.mubr.msk.bf16.vlgmr.msra.gmra.mrb[60].mxu0 %vm891_vm1, %v3491_v50  ;;  %6647 = vmatprep.subr.bf16.mxu1 %v7113_v1  ;;  %v6948_v50 = vld [vmem:[%s8519_s18 + $0x190] sm:$0xff]  }
0x13b3   : > { %6613 = vmatprep.mubr.msk.bf16.mxu0 %vm7114_vm0, %v7113_v1 }
0x13b5   : > { %6648 = vmatpush3.bf16.msra.mxu1 %v6943_v33 }
0x13b6   : > { %6649 = vmatprep.subr.bf16.mxu1 %v7113_v1 }
0x13b9   : > { %6650 = vmatpush3.bf16.msra.mxu1 %v6945_v34 }
0x13ba   : > { %6651 = vmatprep.subr.bf16.mxu1 %v7113_v1 }
0x13bd   : > { %6652 = vmatpush3.bf16.msra.mxu1 %v6947_v35 }
0x13be   : > { %6653 = vmatprep.subr.bf16.mxu1 %v7113_v1 }
0x13c1   : > { %6654 = vmatpush3.bf16.msra.mxu1 %v6949_v37 }
0x13c2   : > { %6655 = vmatprep.subr.bf16.mxu1 %v7113_v1 }
0x13c5   : > { %6656 = vmatpush3.bf16.msra.mxu1 %v6951_v38 }
0x13c6   : > { %6657 = vmatprep.subr.bf16.mxu1 %v7113_v1 }
0x13c9   : > { %6658 = vmatpush3.bf16.msra.mxu1 %v6953_v40 }
0x13ca   : > { %6683 = vmatprep.subr.bf16.mxu1 %v7113_v1 }
0x13cc   : > { %6660 = vmatmul.mubr.bf16.vlgmr.msra.gmra.mrb[72].mxu1 %v7298_v19 }
0x13cd   : > { %6685 = vmatprep.mubr.msk.bf16.mxu1 %vm7114_vm0, %v7113_v1 }
0x147f   : > { %v3484_v63 = vpop.f32.mrb[68].mxu1 }
0x1480   : > { %v6603_v0 = vpop.f32.mrb[69].mxu1  ;;  %v3485_v21 = vadd.f32 %v5644_v18, %v3484_v63 }
0x1481   : > { %v3487_v22 = vpop.f32.mrb[70].mxu1 }
0x1482   : > { %v6604_v23 = vpop.f32.mrb[71].mxu1  ;;  %v3488_v24 = vadd.f32 %v5644_v18, %v3487_v22  ;;  %v6959_v18 = vld [vmem:[%s8503_s5 + $0x190] sm:$0xff]   ;;  %v6961_v22 = vld [vmem:[%s8503_s5 + $0x1a0] sm:$0xff]  }
0x1483   : > { %v6962_v23 = vld [vmem:[%s8503_s5 + $0x1a8] sm:$0xff]  }
0x1484   : > { %v3565_v43 = vpack.c.bf16 %v3488_v24, %v3485_v21  ;;  %v6960_v21 = vld [vmem:[%s8503_s5 + $0x198] sm:$0xff]   ;;  %v6963_v24 = vld [vmem:[%s8503_s5 + $0x1b0] sm:$0xff]  }
0x1485   : > { %v3533_v20 = vpop.f32.mrb[60].mxu0 }
0x1486   : > { %v3540_v56 = vmul.f32 0.25, %v3533_v20  ;;  %v6609_v57 = vpop.f32.mrb[61].mxu0  ;;  %v3570_v46 = vand.u32 %v3565_v43, %v7366_v11  ;;  %v6964_v43 = vld [vmem:[%s8503_s5 + $0x1b8] sm:$0xff]  }
0x1487   : > { %v3536_v58 = vpop.f32.mrb[62].mxu0 }
0x1488   : > { %v3541_v59 = vmul.f32 0.25, %v3536_v58  ;;  %v6610_v60 = vpop.f32.mrb[63].mxu0  ;;  %v3542_v61 = vsel %vm941_vm2, %v3540_v56, -inf  ;;  %6612 = vmatpush3.bf16.msra.mxu0 %v3570_v46 }
0x1489   : > { %3543 = vmax.xlane.f32.xlu0 %v3542_v61  ;;  %6617 = vmatprep.subr.bf16.mxu0 %v7113_v1 }
0x148a   : > { %v3545_v62 = vsel %vm945_vm3, %v3541_v59, -inf }
0x148b   : > { %3546 = vmax.xlane.f32.xlu1 %v3545_v62 }
0x149f   : > { %v3890_v55 = vpop.f32.mrb[72].mxu1 }
0x14a0   : > { %v3891_v15 = vadd.f32 %v5702_v54, %v3890_v55  ;;  %v6661_v20 = vpop.f32.mrb[73].mxu1 }
0x1516   : > { %v3544_v2 = vpop.xlane.xlu0 %3543 }
0x1517   : > { %v3548_v3 = vsub.f32 %v3540_v56, %v3544_v2  ;;  %v3893_v56 = vpop.f32.mrb[74].mxu1 }
0x1518   : > { %v3547_v4 = vpop.xlane.xlu1 %3546  ;;  %v3894_v57 = vadd.f32 %v5702_v54, %v3893_v56  ;;  %v6662_v58 = vpop.f32.mrb[75].mxu1 }
0x1519   : > { %v3550_v5 = vmul.f32 1.442695, %v3548_v3  ;;  %v3549_v7 = vsub.f32 %v3541_v59, %v3547_v4  ;;  %v5676_v4 = vld [vmem:[%s8500_s2 + $0x6] ss:$0 sm:$0xff] }
0x151a   : > { %v4012_v59 = vpack.c.bf16 %v3894_v57, %v3891_v15  ;;  %v6966_v57 = vld [vmem:[%s8505_s7 + $0x30] sm:$0xff]  }
0x151b   : > { %7071 = vpow2.f32 %v3550_v5  ;;  %v3552_v8 = vmul.f32 1.442695, %v3549_v7 }
0x151c   : > { %v4017_v60 = vsel %vm891_vm1, %v4012_v59, 0  ;;  %v6968_v59 = vld [vmem:[%s8501_s3 + $0x1d0] sm:$0xff]  }
0x151d   : > { %7073 = vpow2.f32 %v3552_v8  ;;  %6684 = vmatpush3.bf16.xpose.msra.mxu1 %v4017_v60  ;;  %v6970_v60 = vld [vmem:[%s8501_s3 + $0x1d8] sm:$0xff]  }
0x151e   : > { %6689 = vmatprep.subr.bf16.mxu1 %v7113_v1 }
0x1525   : > { %v7072_v10 = vpop.eup %7071 }
0x1526   : > { %v3554_v12 = vsel %vm941_vm2, %v7072_v10, 0.0 }
0x1527   : > { %v7074_v13 = vpop.eup %7073  ;;  %3555 = vadd.xlane.f32.xlu0 %v3554_v12 }
0x1528   : > { %v3557_v17 = vsel %vm945_vm3, %v7074_v13, 0.0 }
0x1529   : > { %3558 = vadd.xlane.f32.xlu1 %v3557_v17 }
0x15b4   : > { %v3556_v27 = vpop.xlane.xlu0 %3555 }
0x15b5   : > { %7075 = vrcp.f32 %v3556_v27 }
0x15b6   : > { %v3559_v28 = vpop.xlane.xlu1 %3558 }
0x15b7   : > { %7077 = vrcp.f32 %v3559_v28 }
0x15bf   : > { %v7076_v29 = vpop.eup %7075 }
0x15c0   : > { %v3562_v16 = vmul.f32 %v7076_v29, %v7072_v10 }
0x15c1   : > { %v7078_v14 = vpop.eup %7077 }
0x15c2   : > { %v3563_v30 = vmul.f32 %v7078_v14, %v7074_v13 }
0x15c4   : > { %v3564_v32 = vpack.c.bf16 %v3563_v30, %v3562_v16 }
0x15c6   : > { %6614 = vmatmul.mubr.msk.bf16.vlgmr.msra.gmra.mrb[64].mxu0 %vm941_vm2, %v3564_v32 }
0x15c7   : > { %6618 = vmatpush3.bf16.msra.mxu0 %v6941_v31  ;;  %6619 = vmatprep.mubr.msk.bf16.mxu0 %vm7114_vm0, %v7113_v1 }
0x15c8   : > { %6623 = vmatprep.subr.bf16.mxu0 %v7113_v1 }
0x1699   : > { %v3606_v41 = vpop.f32.mrb[64].mxu0 }
0x169a   : > { %v6615_v42 = vpop.f32.mrb[65].mxu0 }
0x169b   : > { %v3609_v44 = vpop.f32.mrb[66].mxu0 }
0x169c   : > { %v3613_v47 = vpack.c.bf16 %v3609_v44, %v3606_v41  ;;  %v6616_v48 = vpop.f32.mrb[67].mxu0 }
0x169e   : > { %6620 = vmatmul.mubr.msk.bf16.vlgmr.msra.gmra.mrb[68].mxu0 %vm891_vm1, %v3613_v47 }
0x169f   : > { %6624 = vmatpush3.bf16.msra.mxu0 %v6944_v45  ;;  %6639 = vmatprep.mubr.msk.bf16.mxu0 %vm7114_vm0, %v7113_v1  ;;  %v5728_v45 = vld [vmem:[%s8504_s6 + $0x6] ss:$0 sm:$0xff] }
0x16a0   : > { %6625 = vmatprep.subr.bf16.mxu0 %v7113_v1 }
0x16a3   : > { %6626 = vmatpush3.bf16.msra.mxu0 %v6946_v49 }
0x16a4   : > { %6627 = vmatprep.subr.bf16.mxu0 %v7113_v1 }
0x16a7   : > { %6628 = vmatpush3.bf16.msra.mxu0 %v6948_v50 }
0x16a8   : > { %6629 = vmatprep.subr.bf16.mxu0 %v7113_v1 }
0x16ab   : > { %6630 = vmatpush3.bf16.msra.mxu0 %v6950_v6 }
0x16ac   : > { %6631 = vmatprep.subr.bf16.mxu0 %v7113_v1 }
0x16af   : > { %6632 = vmatpush3.bf16.msra.mxu0 %v6952_v9 }
0x16b0   : > { %6633 = vmatprep.subr.bf16.mxu0 %v7113_v1 }
0x16b3   : > { %6634 = vmatpush3.bf16.msra.mxu0 %v6954_v51  ;;  %v6965_v51 = vld [vmem:[%s8501_s3 + $0x1c0] sm:$0xff]  }
0x16b4   : > { %6635 = vmatprep.subr.bf16.mxu0 %v7113_v1 }
0x16b7   : > { %6636 = vmatpush3.bf16.msra.mxu0 %v6955_v52  ;;  %v6967_v52 = vld [vmem:[%s8501_s3 + $0x1c8] sm:$0xff]  }
0x16b8   : > { %6637 = vmatprep.subr.bf16.mxu0 %v7113_v1 }
0x16bb   : > { %6638 = vmatpush3.bf16.msra.mxu0 %v6956_v53 }
0x16bc   : > { %6663 = vmatprep.subr.bf16.mxu0 %v7113_v1 }
0x16be   : > { %6640 = vmatmul.mubr.bf16.vlgmr.msra.gmra.mrb[72].mxu0 %v7298_v19 }
0x16bf   : > { %6679 = vmatprep.mubr.msk.bf16.mxu0 %vm7114_vm0, %v7113_v1 }
0x1771   : > { %v3660_v61 = vpop.f32.mrb[68].mxu0 }
0x1772   : > { %v8155_v62 = vadd.f32 %v3660_v61, %v8014_v36  ;;  %v6621_v63 = vpop.f32.mrb[69].mxu0  ;;  %v6957_v36 = vld [vmem:[%s8503_s5 + $0x180] sm:$0xff]  }
0x1773   : > { %v3663_v0 = vpop.f32.mrb[70].mxu0  ;;  %6664 = vmatpush3.bf16.msra.mxu0 %v6957_v36  ;;  %v6972_v61 = vld [vmem:[%s8501_s3 + $0x1e0] sm:$0xff]   ;;  %v6974_v63 = vld [vmem:[%s8501_s3 + $0x1e8] sm:$0xff]   ;;  %v6975_v36 = vld [vmem:[%s8519_s18 + $0x1d8] sm:$0xff]  }
0x1774   : > { %v8158_v2 = vadd.f32 %v3663_v0, %v8017_v39  ;;  %v6622_v3 = vpop.f32.mrb[71].mxu0  ;;  %v6958_v39 = vld [vmem:[%s8503_s5 + $0x188] sm:$0xff]   ;;  %6665 = vmatprep.subr.bf16.mxu0 %v7113_v1  ;;  %v6976_v0 = vld [vmem:[%s8501_s3 + $0x1f0] sm:$0xff]  }
0x1775   : > { %v6978_v3 = vld [vmem:[%s8501_s3 + $0x1f8] sm:$0xff]  }
0x1777   : > { %6666 = vmatpush3.bf16.msra.mxu0 %v6958_v39  ;;  %v6977_v39 = vld [vmem:[%s8519_s18 + $0x1e0] sm:$0xff]  }
0x1778   : > { %6667 = vmatprep.subr.bf16.mxu0 %v7113_v1 }
0x177b   : > { %6668 = vmatpush3.bf16.msra.mxu0 %v6959_v18  ;;  %v6979_v18 = vld [vmem:[%s8519_s18 + $0x1e8] sm:$0xff]  }
0x177c   : > { %6669 = vmatprep.subr.bf16.mxu0 %v7113_v1 }
0x177f   : > { %6670 = vmatpush3.bf16.msra.mxu0 %v6960_v21  ;;  %v6980_v21 = vld [vmem:[%s8519_s18 + $0x1f0] sm:$0xff]  }
0x1780   : > { %6671 = vmatprep.subr.bf16.mxu0 %v7113_v1 }
0x1783   : > { %6672 = vmatpush3.bf16.msra.mxu0 %v6961_v22  ;;  %v6981_v22 = vld [vmem:[%s8519_s18 + $0x1f8] sm:$0xff]  }
0x1784   : > { %6673 = vmatprep.subr.bf16.mxu0 %v7113_v1 }
0x1787   : > { %6674 = vmatpush3.bf16.msra.mxu0 %v6962_v23  ;;  %v5786_v23 = vld [vmem:[%s8502_s4 + $0x7] ss:$0 sm:$0xff] }
0x1788   : > { %6675 = vmatprep.subr.bf16.mxu0 %v7113_v1 }
0x178b   : > { %6676 = vmatpush3.bf16.msra.mxu0 %v6963_v24 }
0x178c   : > { %6677 = vmatprep.subr.bf16.mxu0 %v7113_v1 }
0x178f   : > { %6678 = vmatpush3.bf16.msra.mxu0 %v6964_v43 }
0x1790   : > { %6721 = vmatprep.subr.bf16.mxu0 %v7113_v1 }
0x1791   : > { %v3776_v5 = vpop.f32.mrb[72].mxu0 }
0x1792   : > { %v6641_v7 = vpop.f32.mrb[73].mxu0  ;;  %v3777_v10 = vadd.f32 %v5676_v4, %v3776_v5  ;;  %6680 = vmatmul.mubr.bf16.vlgmr.msra.gmra.mrb[76].mxu0 %v7298_v19 }
0x1793   : > { %v3779_v8 = vpop.f32.mrb[74].mxu0  ;;  %6737 = vmatprep.mubr.msk.bf16.mxu0 %vm7114_vm0, %v7113_v1  ;;  %6722 = vmatpush3.bf16.msra.mxu0 %v6965_v51 }
0x1794   : > { %v3780_v12 = vadd.f32 %v5676_v4, %v3779_v8  ;;  %v6642_v13 = vpop.f32.mrb[75].mxu0  ;;  %6723 = vmatprep.subr.bf16.mxu0 %v7113_v1  ;;  %v6969_v8 = vld [vmem:[%s8519_s18 + $0x1c0] sm:$0xff]  }
0x1795   : > { %v6971_v13 = vld [vmem:[%s8519_s18 + $0x1c8] sm:$0xff]  }
0x1796   : > { %v4011_v17 = vpack.c.bf16 %v3780_v12, %v3777_v10 }
0x1797   : > { %6724 = vmatpush3.bf16.msra.mxu0 %v6967_v52 }
0x1798   : > { %6686 = vmatmul.mubr.msk.bf16.vlgmr.msra.gmra.mrb[76].mxu1 %vm891_vm1, %v4011_v17  ;;  %6725 = vmatprep.subr.bf16.mxu0 %v7113_v1  ;;  %v6973_v17 = vld [vmem:[%s8519_s18 + $0x1d0] sm:$0xff]  }
0x1799   : > { %6691 = vmatprep.mubr.msk.bf16.mxu1 %vm7114_vm0, %v7113_v1 }
0x179b   : > { %6726 = vmatpush3.bf16.msra.mxu0 %v6968_v59 }
0x179c   : > { %6727 = vmatprep.subr.bf16.mxu0 %v7113_v1 }
0x179f   : > { %6728 = vmatpush3.bf16.msra.mxu0 %v6970_v60 }
0x17a0   : > { %6729 = vmatprep.subr.bf16.mxu0 %v7113_v1 }
0x17a3   : > { %6730 = vmatpush3.bf16.msra.mxu0 %v6972_v61 }
0x17a4   : > { %6731 = vmatprep.subr.bf16.mxu0 %v7113_v1 }
0x17a7   : > { %6732 = vmatpush3.bf16.msra.mxu0 %v6974_v63 }
0x17a8   : > { %6733 = vmatprep.subr.bf16.mxu0 %v7113_v1 }
0x17ab   : > { %6734 = vmatpush3.bf16.msra.mxu0 %v6976_v0 }
0x17ac   : > { %6735 = vmatprep.subr.bf16.mxu0 %v7113_v1 }
0x17af   : > { %6736 = vmatpush3.bf16.msra.mxu0 %v6978_v3 }
0x17b0   : > { %6761 = vmatprep.subr.bf16.mxu0 %v7113_v1 }
0x17b2   : > { %6738 = vmatmul.mubr.bf16.vlgmr.msra.gmra.mrb[80].mxu0 %v7298_v19 }
0x17b3   : > { %6763 = vmatprep.mubr.msk.bf16.mxu0 %vm7114_vm0, %v7113_v1 }
0x1865   : > { %v4004_v30 = vpop.f32.mrb[76].mxu0 }
0x1866   : > { %v6681_v31 = vpop.f32.mrb[77].mxu0  ;;  %v4005_v47 = vadd.f32 %v5728_v45, %v4004_v30 }
0x1867   : > { %v4007_v48 = vpop.f32.mrb[78].mxu0 }
0x1868   : > { %v6682_v49 = vpop.f32.mrb[79].mxu0  ;;  %v4008_v50 = vadd.f32 %v5728_v45, %v4007_v48  ;;  %v6984_v45 = vld [vmem:[%s8503_s5 + $0x1d0] sm:$0xff]   ;;  %v6986_v48 = vld [vmem:[%s8503_s5 + $0x1e0] sm:$0xff]  }
0x1869   : > { %v6987_v49 = vld [vmem:[%s8503_s5 + $0x1e8] sm:$0xff]  }
0x186a   : > { %v4085_v6 = vpack.c.bf16 %v4008_v50, %v4005_v47  ;;  %v6985_v47 = vld [vmem:[%s8503_s5 + $0x1d8] sm:$0xff]   ;;  %v6988_v50 = vld [vmem:[%s8503_s5 + $0x1f0] sm:$0xff]  }
0x186b   : > { %v4053_v46 = vpop.f32.mrb[76].mxu1 }
0x186c   : > { %v4060_v25 = vmul.f32 0.25, %v4053_v46  ;;  %v6687_v26 = vpop.f32.mrb[77].mxu1  ;;  %v4090_v9 = vand.u32 %v4085_v6, %v7366_v11  ;;  %v6989_v6 = vld [vmem:[%s8503_s5 + $0x1f8] sm:$0xff]  }
0x186d   : > { %v4056_v27 = vpop.f32.mrb[78].mxu1 }
0x186e   : > { %v4061_v28 = vmul.f32 0.25, %v4056_v27  ;;  %v6688_v29 = vpop.f32.mrb[79].mxu1  ;;  %v4062_v14 = vsel %vm941_vm2, %v4060_v25, -inf  ;;  %6690 = vmatpush3.bf16.msra.mxu1 %v4090_v9 }
0x186f   : > { %4063 = vmax.xlane.f32.xlu0 %v4062_v14  ;;  %6695 = vmatprep.subr.bf16.mxu1 %v7113_v1 }
0x1870   : > { %v4065_v16 = vsel %vm945_vm3, %v4061_v28, -inf }
0x1871   : > { %4066 = vmax.xlane.f32.xlu1 %v4065_v16 }
0x1885   : > { %v4410_v24 = vpop.f32.mrb[80].mxu0 }
0x1886   : > { %v4411_v43 = vadd.f32 %v5786_v23, %v4410_v24  ;;  %v6739_v46 = vpop.f32.mrb[81].mxu0 }
0x18fc   : > { %v4064_v32 = vpop.xlane.xlu0 %4063 }
0x18fd   : > { %v4068_v33 = vsub.f32 %v4060_v25, %v4064_v32  ;;  %v4413_v25 = vpop.f32.mrb[82].mxu0 }
0x18fe   : > { %v4067_v34 = vpop.xlane.xlu1 %4066  ;;  %v4414_v26 = vadd.f32 %v5786_v23, %v4413_v25  ;;  %v6740_v27 = vpop.f32.mrb[83].mxu0 }
0x18ff   : > { %v4070_v35 = vmul.f32 1.442695, %v4068_v33  ;;  %v4069_v37 = vsub.f32 %v4061_v28, %v4067_v34  ;;  %v5760_v34 = vld [vmem:[%s8500_s2 + $0x7] ss:$0 sm:$0xff] }
0x1900   : > { %v4532_v28 = vpack.c.bf16 %v4414_v26, %v4411_v43  ;;  %v6990_v43 = vld [vmem:[%s8505_s7 + $0x38] sm:$0xff]  }
0x1901   : > { %7079 = vpow2.f32 %v4070_v35  ;;  %v4072_v38 = vmul.f32 1.442695, %v4069_v37 }
0x1902   : > { %v4537_v29 = vsel %vm891_vm1, %v4532_v28, 0 }
0x1903   : > { %7081 = vpow2.f32 %v4072_v38  ;;  %6762 = vmatpush3.bf16.xpose.msra.mxu0 %v4537_v29 }
0x1904   : > { %6767 = vmatprep.subr.bf16.mxu0 %v7113_v1 }
0x190b   : > { %v7080_v40 = vpop.eup %7079 }
0x190c   : > { %v4074_v41 = vsel %vm941_vm2, %v7080_v40, 0.0 }
0x190d   : > { %v7082_v42 = vpop.eup %7081  ;;  %4075 = vadd.xlane.f32.xlu0 %v4074_v41 }
0x190e   : > { %v4077_v44 = vsel %vm945_vm3, %v7082_v42, 0.0 }
0x190f   : > { %4078 = vadd.xlane.f32.xlu1 %v4077_v44 }
0x199a   : > { %v4076_v53 = vpop.xlane.xlu0 %4075 }
0x199b   : > { %7083 = vrcp.f32 %v4076_v53 }
0x199c   : > { %v4079_v54 = vpop.xlane.xlu1 %4078 }
0x199d   : > { %7085 = vrcp.f32 %v4079_v54 }
0x19a5   : > { %v7084_v55 = vpop.eup %7083 }
0x19a6   : > { %v4082_v20 = vmul.f32 %v7084_v55, %v7080_v40 }
0x19a7   : > { %v7086_v15 = vpop.eup %7085 }
0x19a8   : > { %v4083_v56 = vmul.f32 %v7086_v15, %v7082_v42 }
0x19aa   : > { %v4084_v58 = vpack.c.bf16 %v4083_v56, %v4082_v20 }
0x19ac   : > { %6692 = vmatmul.mubr.msk.bf16.vlgmr.msra.gmra.mrb[80].mxu1 %vm941_vm2, %v4084_v58 }
0x19ad   : > { %6696 = vmatpush3.bf16.msra.mxu1 %v6966_v57  ;;  %6697 = vmatprep.mubr.msk.bf16.mxu1 %vm7114_vm0, %v7113_v1 }
0x19ae   : > { %6701 = vmatprep.subr.bf16.mxu1 %v7113_v1 }
0x1a7f   : > { %v4126_v4 = vpop.f32.mrb[80].mxu1 }
0x1a80   : > { %v6693_v5 = vpop.f32.mrb[81].mxu1 }
0x1a81   : > { %v4129_v7 = vpop.f32.mrb[82].mxu1 }
0x1a82   : > { %v4133_v10 = vpack.c.bf16 %v4129_v7, %v4126_v4  ;;  %v6694_v12 = vpop.f32.mrb[83].mxu1  ;;  %v5812_v7 = vld [vmem:[%s8504_s6 + $0x7] ss:$0 sm:$0xff] }
0x1a84   : > { %6698 = vmatmul.mubr.msk.bf16.vlgmr.msra.gmra.mrb[84].mxu1 %vm891_vm1, %v4133_v10 }
0x1a85   : > { %6702 = vmatpush3.bf16.msra.mxu1 %v6969_v8  ;;  %6717 = vmatprep.mubr.msk.bf16.mxu1 %vm7114_vm0, %v7113_v1 }
0x1a86   : > { %6703 = vmatprep.subr.bf16.mxu1 %v7113_v1 }
0x1a89   : > { %6704 = vmatpush3.bf16.msra.mxu1 %v6971_v13 }
0x1a8a   : > { %6705 = vmatprep.subr.bf16.mxu1 %v7113_v1 }
0x1a8d   : > { %6706 = vmatpush3.bf16.msra.mxu1 %v6973_v17 }
0x1a8e   : > { %6707 = vmatprep.subr.bf16.mxu1 %v7113_v1 }
0x1a91   : > { %6708 = vmatpush3.bf16.msra.mxu1 %v6975_v36 }
0x1a92   : > { %6709 = vmatprep.subr.bf16.mxu1 %v7113_v1 }
0x1a95   : > { %6710 = vmatpush3.bf16.msra.mxu1 %v6977_v39 }
0x1a96   : > { %6711 = vmatprep.subr.bf16.mxu1 %v7113_v1 }
0x1a99   : > { %6712 = vmatpush3.bf16.msra.mxu1 %v6979_v18 }
0x1a9a   : > { %6713 = vmatprep.subr.bf16.mxu1 %v7113_v1 }
0x1a9d   : > { %6714 = vmatpush3.bf16.msra.mxu1 %v6980_v21 }
0x1a9e   : > { %6715 = vmatprep.subr.bf16.mxu1 %v7113_v1 }
0x1aa1   : > { %6716 = vmatpush3.bf16.msra.mxu1 %v6981_v22 }
0x1aa2   : > { %6741 = vmatprep.subr.bf16.mxu1 %v7113_v1 }
0x1aa4   : > { %6718 = vmatmul.mubr.bf16.vlgmr.msra.gmra.mrb[88].mxu1 %v7298_v19 }
0x1aa5   : > { %6757 = vmatprep.mubr.msk.bf16.mxu1 %vm7114_vm0, %v7113_v1 }
0x1b57   : > { %v4180_v14 = vpop.f32.mrb[84].mxu1 }
0x1b58   : > { %v8296_v16 = vadd.f32 %v4180_v14, %v8155_v62  ;;  %v6699_v30 = vpop.f32.mrb[85].mxu1  ;;  %v6982_v62 = vld [vmem:[%s8503_s5 + $0x1c0] sm:$0xff]  }
0x1b59   : > { %v4183_v31 = vpop.f32.mrb[86].mxu1  ;;  %6742 = vmatpush3.bf16.msra.mxu1 %v6982_v62  ;;  %v6993_v62 = vld [vmem:[%s8509_s11 + $0x4] ss:$8 sps:$4 sm:$0xff]  }
0x1b5a   : > { %v8299_v32 = vadd.f32 %v4183_v31, %v8158_v2  ;;  %v6700_v33 = vpop.f32.mrb[87].mxu1  ;;  %v6983_v2 = vld [vmem:[%s8503_s5 + $0x1c8] sm:$0xff]   ;;  %6743 = vmatprep.subr.bf16.mxu1 %v7113_v1 }
0x1b5b   : > { %v5827_v33 = vld [vmem:[%s8506_s8] ss:$0 sm:$0xff] }
0x1b5d   : > { %6744 = vmatpush3.bf16.msra.mxu1 %v6983_v2  ;;  %v6994_v2 = vld [vmem:[%s8509_s11 + $0x10] ss:$8 sps:$4 sm:$0xff]  }
0x1b5e   : > { %6745 = vmatprep.subr.bf16.mxu1 %v7113_v1 }
0x1b61   : > { %6746 = vmatpush3.bf16.msra.mxu1 %v6984_v45 }
0x1b62   : > { %6747 = vmatprep.subr.bf16.mxu1 %v7113_v1 }
0x1b65   : > { %6748 = vmatpush3.bf16.msra.mxu1 %v6985_v47 }
0x1b66   : > { %6749 = vmatprep.subr.bf16.mxu1 %v7113_v1 }
0x1b69   : > { %6750 = vmatpush3.bf16.msra.mxu1 %v6986_v48 }
0x1b6a   : > { %6751 = vmatprep.subr.bf16.mxu1 %v7113_v1 }
0x1b6d   : > { %6752 = vmatpush3.bf16.msra.mxu1 %v6987_v49 }
0x1b6e   : > { %6753 = vmatprep.subr.bf16.mxu1 %v7113_v1 }
0x1b71   : > { %6754 = vmatpush3.bf16.msra.mxu1 %v6988_v50 }
0x1b72   : > { %6755 = vmatprep.subr.bf16.mxu1 %v7113_v1 }
0x1b75   : > { %6756 = vmatpush3.bf16.msra.mxu1 %v6989_v6 }
0x1b77   : > { %v4296_v35 = vpop.f32.mrb[88].mxu1 }
0x1b78   : > { %v6719_v37 = vpop.f32.mrb[89].mxu1  ;;  %v4297_v40 = vadd.f32 %v5760_v34, %v4296_v35  ;;  %6758 = vmatmul.mubr.bf16.vlgmr.msra.gmra.mrb[92].mxu1 %v7298_v19 }
0x1b79   : > { %v4299_v38 = vpop.f32.mrb[90].mxu1 }
0x1b7a   : > { %v4300_v41 = vadd.f32 %v5760_v34, %v4299_v38  ;;  %v6720_v42 = vpop.f32.mrb[91].mxu1  ;;  %v7103_v34 = vld [vmem:[%s7282_s19] sm:$0xff]  ;;  %v7104_v38 = vld [vmem:[%s7282_s19 + $0x8] sm:$0x1] }
0x1b7c   : > { %v4531_v44 = vpack.c.bf16 %v4300_v41, %v4297_v40 }
0x1b7e   : > { %6764 = vmatmul.mubr.msk.bf16.vlgmr.msra.gmra.mrb[84].mxu0 %vm891_vm1, %v4531_v44 }
0x1b7f   : > { %6769 = vmatprep.mubr.msk.bf16.mxu0 %vm7114_vm0, %v7113_v1 }
0x1c4b   : > { %v4524_v56 = vpop.f32.mrb[92].mxu1 }
0x1c4c   : > { %v6759_v57 = vpop.f32.mrb[93].mxu1  ;;  %v4525_v8 = vadd.f32 %v5812_v7, %v4524_v56  ;;  %v7003_v56 = vld [vmem:[%s8509_s11 + $0x40] ss:$8 sps:$4 sm:$0xff]  }
0x1c4d   : > { %v4527_v10 = vpop.f32.mrb[94].mxu1  ;;  %v7008_v57 = vld [vmem:[%s8509_s11 + $0x54] ss:$8 sps:$4 sm:$0xff]  }
0x1c4e   : > { %v6760_v12 = vpop.f32.mrb[95].mxu1  ;;  %v4528_v13 = vadd.f32 %v5812_v7, %v4527_v10  ;;  %v7019_v7 = vld [vmem:[%s8511_s13 + $0x50] sm:$0xff]   ;;  %v7021_v10 = vld [vmem:[%s8511_s13 + $0x58] sm:$0xff]  }
0x1c4f   : > { %v7022_v12 = vld [vmem:[%s8511_s13 + $0x18] sm:$0xff]  }
0x1c50   : > { %v4605_v17 = vpack.c.bf16 %v4528_v13, %v4525_v8  ;;  %v7020_v8 = vld [vmem:[%s8511_s13 + $0x10] sm:$0xff]   ;;  %v7023_v13 = vld [vmem:[%s8511_s13 + $0x60] sm:$0xff]  }
0x1c51   : > { %v4573_v9 = vpop.f32.mrb[84].mxu0 }
0x1c52   : > { %v4580_v51 = vmul.f32 0.25, %v4573_v9  ;;  %v6765_v52 = vpop.f32.mrb[85].mxu0  ;;  %v4610_v36 = vand.u32 %v4605_v17, %v7366_v11  ;;  %v7024_v17 = vld [vmem:[%s8511_s13 + $0x20] sm:$0xff]  }
0x1c53   : > { %v4576_v53 = vpop.f32.mrb[86].mxu0 }
0x1c54   : > { %v4581_v54 = vmul.f32 0.25, %v4576_v53  ;;  %v6766_v55 = vpop.f32.mrb[87].mxu0  ;;  %v4582_v15 = vsel %vm941_vm2, %v4580_v51, -inf  ;;  %6768 = vmatpush3.bf16.msra.mxu0 %v4610_v36  ;;  %v6999_v53 = vld [vmem:[%s8509_s11 + $0x24] ss:$8 sps:$4 sm:$0xff]  }
0x1c55   : > { %4583 = vmax.xlane.f32.xlu0 %v4582_v15  ;;  %6773 = vmatprep.subr.bf16.mxu0 %v7113_v1  ;;  %v7002_v55 = vld [vmem:[%s8509_s11 + $0x34] ss:$8 sps:$4 sm:$0xff]   ;;  %v7000_v15 = vld [vmem:[%s8509_s11 + $0x30] ss:$8 sps:$4 sm:$0xff]   ;;  %v7025_v36 = vld [vmem:[%s8511_s13 + $0x68] sm:$0xff]  }
0x1c56   : > { %v4585_v20 = vsel %vm945_vm3, %v4581_v54, -inf }
0x1c57   : > { %4586 = vmax.xlane.f32.xlu1 %v4585_v20  ;;  %v7005_v20 = vld [vmem:[%s8509_s11 + $0x44] ss:$8 sps:$4 sm:$0xff]  }
0x1ce2   : > { %v4584_v58 = vpop.xlane.xlu0 %4583 }
0x1ce3   : > { %v4588_v59 = vsub.f32 %v4580_v51, %v4584_v58  ;;  %v7006_v58 = vld [vmem:[%s8509_s11 + $0x50] ss:$8 sps:$4 sm:$0xff]  }
0x1ce4   : > { %v4587_v60 = vpop.xlane.xlu1 %4586 }
0x1ce5   : > { %v4590_v61 = vmul.f32 1.442695, %v4588_v59  ;;  %v4589_v63 = vsub.f32 %v4581_v54, %v4587_v60  ;;  %v6997_v54 = vld [vmem:[%s8509_s11 + $0x20] ss:$8 sps:$4 sm:$0xff]   ;;  %v7011_v59 = vld [vmem:[%s8509_s11 + $0x64] ss:$8 sps:$4 sm:$0xff]  }
0x1ce6   : > { %v7009_v60 = vld [vmem:[%s8509_s11 + $0x60] ss:$8 sps:$4 sm:$0xff]  }
0x1ce7   : > { %7087 = vpow2.f32 %v4590_v61  ;;  %v4592_v19 = vmul.f32 1.442695, %v4589_v63  ;;  %v7014_v61 = vld [vmem:[%s8509_s11 + $0x74] ss:$8 sps:$4 sm:$0xff]   ;;  %v7012_v63 = vld [vmem:[%s8509_s11 + $0x70] ss:$8 sps:$4 sm:$0xff]  }
0x1ce9   : > { %7089 = vpow2.f32 %v4592_v19  ;;  %v7116_v19 = vmov 0  }
0x1cf1   : > { %v7088_v0 = vpop.eup %7087 }
0x1cf2   : > { %v4594_v3 = vsel %vm941_vm2, %v7088_v0, 0.0 }
0x1cf3   : > { %v7090_v4 = vpop.eup %7089  ;;  %4595 = vadd.xlane.f32.xlu0 %v4594_v3  ;;  %v7016_v3 = vld [vmem:[%s8511_s13] sm:$0xff]  }
0x1cf4   : > { %v4597_v5 = vsel %vm945_vm3, %v7090_v4, 0.0 }
0x1cf5   : > { %4598 = vadd.xlane.f32.xlu1 %v4597_v5  ;;  %v7018_v5 = vld [vmem:[%s8511_s13 + $0x8] sm:$0xff]  }
0x1d80   : > { %v4596_v39 = vpop.xlane.xlu0 %4595 }
0x1d81   : > { %7091 = vrcp.f32 %v4596_v39 }
0x1d82   : > { %v4599_v18 = vpop.xlane.xlu1 %4598 }
0x1d83   : > { %7093 = vrcp.f32 %v4599_v18 }
0x1d8b   : > { %v7092_v21 = vpop.eup %7091 }
0x1d8c   : > { %v4602_v23 = vmul.f32 %v7092_v21, %v7088_v0  ;;  %v7015_v0 = vld [vmem:[%s8511_s13 + $0x40] sm:$0xff]  }
0x1d8d   : > { %v7094_v22 = vpop.eup %7093  ;;  %6133 = vmatprep.subr.bf16.mxu1 %v7015_v0 }
0x1d8e   : > { %v4603_v24 = vmul.f32 %v7094_v22, %v7090_v4  ;;  %v7017_v4 = vld [vmem:[%s8511_s13 + $0x48] sm:$0xff]   ;;  %6134 = vmatpush3.bf16.msra.mxu1 %v7016_v3 }
0x1d8f   : > { %6135 = vmatprep.subr.bf16.mxu1 %v7017_v4 }
0x1d90   : > { %v4604_v46 = vpack.c.bf16 %v4603_v24, %v4602_v23 }
0x1d92   : > { %6770 = vmatmul.mubr.msk.bf16.vlgmr.msra.gmra.mrb[88].mxu0 %vm941_vm2, %v4604_v46  ;;  %6136 = vmatpush3.bf16.msra.mxu1 %v7018_v5 }
0x1d93   : > { %6774 = vmatpush3.bf16.msra.mxu0 %v6990_v43  ;;  %6775 = vmatprep.mubr.msk.bf16.mxu0 %vm7114_vm0, %v7113_v1 }
0x1d94   : > { %4873 = vmatprep.subr.bf16.mxu0 %v6993_v62  ;;  %6137 = vmatprep.subr.bf16.mxu1 %v7019_v7 }
0x1d96   : > { %6138 = vmatpush3.bf16.msra.mxu1 %v7020_v8 }
0x1d97   : > { %6139 = vmatprep.subr.bf16.mxu1 %v7021_v10 }
0x1d9a   : > { %6140 = vmatpush3.bf16.msra.mxu1 %v7022_v12 }
0x1d9b   : > { %6141 = vmatprep.subr.bf16.mxu1 %v7023_v13 }
0x1d9e   : > { %6142 = vmatpush3.bf16.msra.mxu1 %v7024_v17 }
0x1d9f   : > { %6143 = vmatprep.subr.bf16.mxu1 %v7025_v36 }
0x1e65   : > { %v4646_v11 = vpop.f32.mrb[88].mxu0 }
0x1e66   : > { %v6771_v25 = vpop.f32.mrb[89].mxu0 }
0x1e67   : > { %v4649_v26 = vpop.f32.mrb[90].mxu0 }
0x1e68   : > { %v4653_v27 = vpack.c.bf16 %v4649_v26, %v4646_v11  ;;  %v6772_v28 = vpop.f32.mrb[91].mxu0  ;;  %v5828_v11 = vld [vmem:[%s8507_s9] ss:$0 sm:$0xff] }
0x1e69   : > { %v5829_v28 = vld [vmem:[%s8508_s10] ss:$0 sm:$0xff] }
0x1e6a   : > { %6776 = vmatmul.mubr.msk.bf16.vlgmr.msra.gmra.mrb[92].mxu0 %vm891_vm1, %v4653_v27 }
0x1e6b   : > { %4905 = vmatprep.mubr.bf16.mxu0 %v7116_v19 }
0x1f3d   : > { %v4700_v29 = vpop.f32.mrb[92].mxu0 }
0x1f3e   : > { %v4707_v14 = vadd.f32 %v4700_v29, %v8296_v16  ;;  %v6777_v30 = vpop.f32.mrb[93].mxu0  ;;  %v6991_v16 = vld [vmem:[%s8509_s11] ss:$8 sps:$4 sm:$0xff]  }
0x1f3f   : > { %v4703_v31 = vpop.f32.mrb[94].mxu0  ;;  %4874 = vmatpush1.bf16.msra.mxu0 %v6991_v16 }
0x1f40   : > { %v4709_v35 = vadd.f32 %v7103_v34, %v4707_v14  ;;  %v4708_v1 = vadd.f32 %v4703_v31, %v8299_v32  ;;  %v6778_v37 = vpop.f32.mrb[95].mxu0  ;;  %v6996_v32 = vld [vmem:[%s8509_s11 + $0x14] ss:$8 sps:$4 sm:$0xff]  }
0x1f41   : > { %4875 = vmatprep.subr.bf16.mxu0 %v6996_v32  ;;  %v7027_v34 = vld [vmem:[%s8511_s13 + $0x70] sm:$0xff]   ;;  %v7030_v37 = vld [vmem:[%s8511_s13 + $0x38] sm:$0xff]  }
0x1f42   : > { %v4710_v40 = vadd.f32 %v7104_v38, %v4708_v1  ;;  %v4718_v41 = vadd.f32 %v5827_v33, %v4709_v35  ;;  %v7028_v35 = vld [vmem:[%s8511_s13 + $0x30] sm:$0xff]   ;;  %v7029_v1 = vld [vmem:[%s8511_s13 + $0x78] sm:$0xff]   ;;  %v4783_v38 = vlaneseq }
0x1f43   : > { %4876 = vmatpush1.bf16.msra.mxu0 %v6994_v2 }
0x1f44   : > { %4722 = vadd.xlane.f32.xlu1 %v4718_v41  ;;  %v4719_v42 = vadd.f32 %v5827_v33, %v4710_v40  ;;  %4877 = vmatprep.subr.bf16.mxu0 %v6999_v53  ;;  %v7026_v33 = vld [vmem:[%s8511_s13 + $0x28] sm:$0xff]   ;;  %v4784_v40 = vshrl.u32 %v4783_v38, 7 }
0x1f45   : > { %6144 = vmatpush3.bf16.msra.mxu1 %v7026_v33 }
0x1f46   : > { %v4725_v44 = vsel %vm4724_vm6, %v4719_v42, 0.0  ;;  %6145 = vmatprep.subr.bf16.mxu1 %v7027_v34 }
0x1f47   : > { %4726 = vadd.xlane.f32.xlu0 %v4725_v44  ;;  %4878 = vmatpush1.bf16.msra.mxu0 %v6997_v54  ;;  %v4789_v44 = vsub.s32 1, %v4784_v40 }
0x1f48   : > { %4879 = vmatprep.subr.bf16.mxu0 %v7002_v55 }
0x1f49   : > { %6146 = vmatpush3.bf16.msra.mxu1 %v7028_v35 }
0x1f4a   : > { %6147 = vmatprep.subr.bf16.mxu1 %v7029_v1 }
0x1f4b   : > { %4880 = vmatpush1.bf16.msra.mxu0 %v7000_v15 }
0x1f4c   : > { %4881 = vmatprep.subr.bf16.mxu0 %v7005_v20  ;;  %v5846_v20 = vld [vmem:[%s8512_s14] ss:$0 sm:$0xff] }
0x1f4d   : > { %6148 = vmatpush3.bf16.msra.mxu1 %v7030_v37 }
0x1f4f   : > { %4882 = vmatpush1.bf16.msra.mxu0 %v7003_v56 }
0x1f50   : > { %4883 = vmatprep.subr.bf16.mxu0 %v7008_v57 }
0x1f53   : > { %4884 = vmatpush1.bf16.msra.mxu0 %v7006_v58 }
0x1f54   : > { %4885 = vmatprep.subr.bf16.mxu0 %v7011_v59 }
0x1f57   : > { %4886 = vmatpush1.bf16.msra.mxu0 %v7009_v60 }
0x1f58   : > { %4887 = vmatprep.subr.bf16.mxu0 %v7014_v61 }
0x1f5b   : > { %4888 = vmatpush1.bf16.msra.mxu0 %v7012_v63 }
0x1fd1   : > { %v4723_v45 = vpop.xlane.xlu1 %4722 }
0x1fd2   : > { %v4729_v47 = vmul.f32 0.0078125, %v4723_v45 }
0x1fd4   : > { %v8375_v48 = vsub.f32 %v4718_v41, %v4729_v47  ;;  %v4727_v49 = vpop.xlane.xlu0 %4726  ;;  %v4785_v41 = vsub.s32 0, %v4784_v40 }
0x1fd5   : > { %v4730_v50 = vmul.f32 0.0078125, %v4727_v49 }
0x1fd6   : > { %v4733_v6 = vmul.f32 %v8375_v48, %v8375_v48 }
0x1fd7   : > { %v8379_v9 = vsub.f32 %v4719_v42, %v4730_v50  ;;  %v4781_v42 = vld [vmem:[%s8510_s12] sm:$0x3] }
0x1fd8   : > { %4735 = vadd.xlane.f32.xlu0 %v4733_v6  ;;  %v4786_v16 = vrot.slane %v4781_v42, %v4785_v41  ;;  %v4790_v62 = vrot.slane %v4781_v42, %v4789_v44 }
0x1fd9   : > { %v4734_v51 = vmul.f32 %v8379_v9, %v8379_v9 }
0x1fdb   : > { %v4737_v52 = vsel %vm4724_vm6, %v4734_v51, 0.0 }
0x1fdc   : > { %4738 = vadd.xlane.f32.xlu1 %v4737_v52 }
0x2065   : > { %v4736_v39 = vpop.xlane.xlu0 %4735 }
0x2066   : > { %v4740_v18 = vmul.f32 0.0078125, %v4736_v39 }
0x2068   : > { %v4742_v21 = vadd.f32 1e-05, %v4740_v18 }
0x2069   : > { %v4739_v22 = vpop.xlane.xlu1 %4738 }
0x206a   : > { %7095 = vrsqrt.f32 %v4742_v21  ;;  %v4741_v23 = vmul.f32 0.0078125, %v4739_v22 }
0x206c   : > { %v4743_v24 = vadd.f32 1e-05, %v4741_v23 }
0x206e   : > { %7097 = vrsqrt.f32 %v4743_v24 }
0x2074   : > { %v7096_v43 = vpop.eup %7095 }
0x2075   : > { %v4746_v46 = vmul.f32 %v7096_v43, %v8375_v48 }
0x2077   : > { %v4754_v27 = vmul.f32 %v5828_v11, %v4746_v46  ;;  %v5863_v46 = vld [vmem:[%s8513_s15] ss:$0 sm:$0xff] }
0x2078   : > { %v7098_v25 = vpop.eup %7097 }
0x2079   : > { %v4747_v26 = vmul.f32 %v7098_v25, %v8379_v9  ;;  %v4762_v14 = vadd.f32 %v5829_v28, %v4754_v27  ;;  %v5864_v25 = vld [vmem:[%s8514_s16] ss:$0 sm:$0xff] }
0x207b   : > { %v4755_v29 = vmul.f32 %v5828_v11, %v4747_v26 }
0x207d   : > { %v4763_v30 = vadd.f32 %v5829_v28, %v4755_v29 }
0x207f   : > { %v4764_v31 = vpack.c.bf16 %v4763_v30, %v4762_v14 }
0x2081   : > { %4906 = vmatmul.mubr.bf16.vlgmr.msra.gmra.mrb[96].mxu0 %v4764_v31 }
0x2154   : > { %v4907_v32 = vpop.f32.mrb[96].mxu0 }
0x2155   : > { %v4908_v2 = vadd.f32 %v4907_v32, %v4786_v16  ;;  %v4909_v45 = vpop.f32.mrb[97].mxu0 }
0x2156   : > { %v4910_v47 = vadd.f32 %v4909_v45, %v4790_v62  ;;  %v4911_v48 = vpop.f32.mrb[98].mxu0 }
0x2157   : > { %v4912_v49 = vadd.f32 %v4911_v48, %v4786_v16  ;;  %v4913_v50 = vpop.f32.mrb[99].mxu0  ;;  %v4916_v9 = vmax.f32 %v4908_v2, 0.0 }
0x2158   : > { %v4914_v6 = vadd.f32 %v4913_v50, %v4790_v62  ;;  %v4917_v52 = vmax.f32 %v4910_v47, 0.0 }
0x2159   : > { %v4918_v51 = vmax.f32 %v4912_v49, 0.0 }
0x215a   : > { %v4919_v53 = vmax.f32 %v4914_v6, 0.0 }
0x215b   : > { %v4920_v54 = vpack.c.bf16 %v4918_v51, %v4916_v9 }
0x215c   : > { %v4921_v55 = vpack.c.bf16 %v4919_v53, %v4917_v52 }
0x215e   : > { %5089 = vmatprep.mubr.bf16.mxu1 %v4921_v55 }
0x215f   : > { %5090 = vmatmul.mubr.bf16.vlgmr.msra.gmra.mrb[96].mxu1 %v4920_v54 }
0x2232   : > { %v6149_v15 = vpop.f32.mrb[96].mxu1 }
0x2233   : > { %v6150_v56 = vpop.f32.mrb[97].mxu1 }
0x2234   : > { %v6151_v57 = vadd.f32 %v6150_v56, %v6149_v15  ;;  %v6152_v58 = vpop.f32.mrb[98].mxu1 }
0x2235   : > { %v6153_v59 = vpop.f32.mrb[99].mxu1 }
0x2236   : > { %v5092_v60 = vadd.f32 %v6151_v57, %v5846_v20  ;;  %v6154_v61 = vadd.f32 %v6153_v59, %v6152_v58 }
0x2238   : > { %v5095_v63 = vadd.f32 %v6154_v61, %v5846_v20  ;;  %v5098_v19 = vadd.f32 %v5092_v60, %v4762_v14 }
0x223a   : > { %5102 = vadd.xlane.f32.xlu1 %v5098_v19  ;;  %v5099_v0 = vadd.f32 %v5095_v63, %v4763_v30 }
0x223c   : > { %v5104_v3 = vsel %vm4724_vm6, %v5099_v0, 0.0 }
0x223d   : > { %5105 = vadd.xlane.f32.xlu0 %v5104_v3 }
0x22c7   : > { %v5103_v4 = vpop.xlane.xlu1 %5102 }
0x22c8   : > { %v5107_v5 = vmul.f32 0.0078125, %v5103_v4 }
0x22ca   : > { %v5109_v7 = vsub.f32 %v5098_v19, %v5107_v5  ;;  %v5106_v8 = vpop.xlane.xlu0 %5105 }
0x22cb   : > { %v5108_v10 = vmul.f32 0.0078125, %v5106_v8 }
0x22cc   : > { %v5111_v12 = vmul.f32 %v5109_v7, %v5109_v7 }
0x22cd   : > { %v5110_v13 = vsub.f32 %v5099_v0, %v5108_v10 }
0x22ce   : > { %5113 = vadd.xlane.f32.xlu0 %v5111_v12 }
0x22cf   : > { %v5112_v17 = vmul.f32 %v5110_v13, %v5110_v13 }
0x22d1   : > { %v5115_v36 = vsel %vm4724_vm6, %v5112_v17, 0.0 }
0x22d2   : > { %5116 = vadd.xlane.f32.xlu1 %v5115_v36 }
0x235b   : > { %v5114_v39 = vpop.xlane.xlu0 %5113 }
0x235c   : > { %v5118_v18 = vmul.f32 0.0078125, %v5114_v39 }
0x235e   : > { %v5120_v21 = vadd.f32 1e-05, %v5118_v18 }
0x235f   : > { %v5117_v22 = vpop.xlane.xlu1 %5116 }
0x2360   : > { %7099 = vrsqrt.f32 %v5120_v21  ;;  %v5119_v23 = vmul.f32 0.0078125, %v5117_v22 }
0x2362   : > { %v5121_v24 = vadd.f32 1e-05, %v5119_v23 }
0x2364   : > { %7101 = vrsqrt.f32 %v5121_v24 }
0x236a   : > { %v7100_v43 = vpop.eup %7099 }
0x236b   : > { %v5124_v11 = vmul.f32 %v7100_v43, %v5109_v7 }
0x236d   : > { %v5132_v26 = vmul.f32 %v5863_v46, %v5124_v11 }
0x236e   : > { %v7102_v27 = vpop.eup %7101 }
0x236f   : > { %v5140_v28 = vadd.f32 %v5864_v25, %v5132_v26  ;;  %v5125_v29 = vmul.f32 %v7102_v27, %v5110_v13 }
0x2371   : > { %5142 = vst [vmem:[%s548_s27] sm:$0xff] %v5140_v28  ;;  %v5133_v14 = vmul.f32 %v5863_v46, %v5125_v29 }
0x2373   : > { %v5141_v30 = vadd.f32 %v5864_v25, %v5133_v14 }
0x2375   : > { %5143 = vst [vmem:[%s548_s27 + $0x8] sm:$0x1] %v5141_v30 }
0x2376 PF: > { %s27_s24 = sadd.s32 1, %s7111_s24  }
0x2377   : > { %p24_p4 = scmp.ge.s32.totalorder %s27_s24, 4  }
0x2379   :  { %26 = sbr.rel (!%p24_p4) target bundleno = 3 (0x3), region = 167 }

</bundles_post_ra>
